<compile_context>
chip_gen: v6e
topology: v6e:2x2x1
jax: 0.10.0
libtpu: 0.0.40
codegen_flags: <defaults>
</compile_context>

<pallas_src>
import functools
import math

import jax
import jax.numpy as jnp
from jax import lax
from jax.experimental import pallas as pl
from jax.experimental.pallas import tpu as pltpu

NEG_SLOPE = 0.01  # PyTorch nn.LeakyReLU default negative slope


def _round_up(x, m):
    return (x + m - 1) // m * m


def _leaky(x, slope=NEG_SLOPE):
    return jnp.where(x >= 0.0, x, slope * x)


# ---------------------------------------------------------------------------
# Kernel 1: fused matmul   out = act((x @ w) * scale + shift)
#   full-K resident weights, bf16 MXU inputs, f32 accumulation, bf16 outputs.
# ---------------------------------------------------------------------------
def _matmul_kernel(x_ref, w_ref, scale_ref, shift_ref, o_ref, *, negative_slope):
    y = jnp.dot(x_ref[...], w_ref[...], preferred_element_type=jnp.float32)
    y = y * scale_ref[...] + shift_ref[...]
    if negative_slope != 1.0:      # slope == 1.0 -> linear (no activation)
        y = jnp.where(y >= 0.0, y, negative_slope * y)
    o_ref[...] = y.astype(o_ref.dtype)


@functools.partial(jax.jit,
                   static_argnames=("negative_slope", "out_dtype", "tm"))
def fused_matmul(x, w, scale, shift, *, negative_slope=NEG_SLOPE,
                 out_dtype=jnp.bfloat16, tm=1024):
    m, k = x.shape
    k2, n = w.shape
    assert k == k2 and scale.shape == (n,) and shift.shape == (n,)
    tm = min(tm, _round_up(m, 8))
    m_pad = _round_up(m, tm)

    xb = x.astype(jnp.bfloat16)
    if m_pad != m:
        xb = jnp.pad(xb, ((0, m_pad - m), (0, 0)))
    wb = w.astype(jnp.bfloat16)
    sc = scale.astype(jnp.float32).reshape(1, n)
    sh = shift.astype(jnp.float32).reshape(1, n)

    out = pl.pallas_call(
        functools.partial(_matmul_kernel, negative_slope=float(negative_slope)),
        out_shape=jax.ShapeDtypeStruct((m_pad, n), out_dtype),
        grid=(m_pad // tm,),
        in_specs=[
            pl.BlockSpec((tm, k), lambda i: (i, 0)),
            pl.BlockSpec((k, n), lambda i: (0, 0)),     # resident weights
            pl.BlockSpec((1, n), lambda i: (0, 0)),
            pl.BlockSpec((1, n), lambda i: (0, 0)),
        ],
        out_specs=pl.BlockSpec((tm, n), lambda i: (i, 0)),
        compiler_params=pltpu.CompilerParams(
            dimension_semantics=("parallel",)),
    )(xb, wb, sc, sh)
    if m_pad != m:
        out = out[:m]
    return out


# ---------------------------------------------------------------------------
# Kernel 2: window conv
#   For every output row q:  out[q] = act((sum_t x[q + offs[t]] @ w_t) * s + b)
#   x is the spatially padded, row-flattened image (padded-width coordinates),
#   so each 3x3 (dilated) tap is a constant row offset.  The per-step input
#   window is DMA'd from HBM with a manually double-buffered async copy.
# ---------------------------------------------------------------------------
def _window_conv_kernel(x_hbm, w_ref, scale_ref, shift_ref, o_ref,
                        win_ref, sem_ref, *, offs, cin, tm, win_rows,
                        negative_slope):
    i = pl.program_id(0)
    n_steps = pl.num_programs(0)

    def start_copy(step, slot):
        pltpu.make_async_copy(
            x_hbm.at[pl.ds(step * tm, win_rows), :],
            win_ref.at[slot],
            sem_ref.at[slot],
        ).start()

    @pl.when(i == 0)
    def _prime():
        start_copy(i, i % 2)

    slot = i % 2
    # Wait for this step's window.
    pltpu.make_async_copy(
        x_hbm.at[pl.ds(i * tm, win_rows), :],
        win_ref.at[slot],
        sem_ref.at[slot],
    ).wait()

    # Prefetch the next step's window into the other slot.
    @pl.when(i + 1 < n_steps)
    def _prefetch():
        start_copy(i + 1, 1 - slot)

    n_out = o_ref.shape[-1]
    acc = jnp.zeros((tm, n_out), jnp.float32)
    for t, off in enumerate(offs):                       # static tap loop
        xt = win_ref[slot, pl.ds(off, tm), :]            # (tm, cin) bf16
        wt = w_ref[pl.ds(t * cin, cin), :]               # (cin, n) bf16
        acc = acc + jnp.dot(xt, wt, preferred_element_type=jnp.float32)

    y = acc * scale_ref[...] + shift_ref[...]
    if negative_slope != 1.0:
        y = jnp.where(y >= 0.0, y, negative_slope * y)
    o_ref[...] = y.astype(o_ref.dtype)


@functools.partial(jax.jit,
                   static_argnames=("offs", "m_out", "negative_slope",
                                    "out_dtype", "tm"))
def window_conv(xflat, wmat, scale, shift, *, offs, m_out,
                negative_slope=NEG_SLOPE, out_dtype=jnp.bfloat16, tm=1024):
    """xflat: (L, Cin) flattened padded image; wmat: (len(offs)*Cin, Cout)."""
    l0, cin = xflat.shape
    kt, n = wmat.shape
    ntaps = len(offs)
    assert kt == ntaps * cin and scale.shape == (n,) and shift.shape == (n,)

    tm = min(tm, _round_up(m_out, 8))
    off_max = max(offs)
    m_grid = -(-m_out // tm)
    win_rows = _round_up(tm + off_max, 8)
    l_need = (m_grid - 1) * tm + win_rows

    xb = xflat.astype(jnp.bfloat16)
    if l_need > l0:
        xb = jnp.pad(xb, ((0, l_need - l0), (0, 0)))
    wb = wmat.astype(jnp.bfloat16)
    sc = scale.astype(jnp.float32).reshape(1, n)
    sh = shift.astype(jnp.float32).reshape(1, n)

    kernel = functools.partial(
        _window_conv_kernel, offs=tuple(int(o) for o in offs), cin=cin,
        tm=tm, win_rows=win_rows, negative_slope=float(negative_slope))

    out = pl.pallas_call(
        kernel,
        out_shape=jax.ShapeDtypeStruct((m_grid * tm, n), out_dtype),
        grid=(m_grid,),
        in_specs=[
            pl.BlockSpec(memory_space=pl.ANY),            # input stays in HBM
            pl.BlockSpec((kt, n), lambda i: (0, 0)),      # resident weights
            pl.BlockSpec((1, n), lambda i: (0, 0)),
            pl.BlockSpec((1, n), lambda i: (0, 0)),
        ],
        out_specs=pl.BlockSpec((tm, n), lambda i: (i, 0)),
        scratch_shapes=[
            pltpu.VMEM((2, win_rows, cin), jnp.bfloat16),
            pltpu.SemaphoreType.DMA((2,)),
        ],
        compiler_params=pltpu.CompilerParams(
            dimension_semantics=("arbitrary",)),
    )(xb, wb, sc, sh)
    return out[:m_out]


# ---------------------------------------------------------------------------
# Conv wrappers (single image, channels-last)
# ---------------------------------------------------------------------------
def conv1x1_block(x, params, *, negative_slope=NEG_SLOPE,
                  out_dtype=jnp.bfloat16):
    """1x1 Conv (+ folded BN + LeakyReLU).  x: (H, W, Cin)."""
    h, w, cin = x.shape
    wt = params["w"]                                   # (cout, cin, 1, 1)
    cout = wt.shape[0]
    wmat = wt.reshape(cout, cin).T
    y = fused_matmul(x.reshape(h * w, cin), wmat, params["scale"],
                     params["shift"], negative_slope=negative_slope,
                     out_dtype=out_dtype)
    return y.reshape(h, w, cout)


def conv3x3_block(x, params, *, dilation=1, negative_slope=NEG_SLOPE):
    """3x3 Conv (pad = dilation) + folded BN + LeakyReLU.  x: (H, W, Cin)."""
    h, w, cin = x.shape
    d = dilation
    wt = params["w"]                                   # (cout, cin, 3, 3)
    cout = wt.shape[0]
    hp, wp = h + 2 * d, w + 2 * d
    xp = jnp.pad(x.astype(jnp.bfloat16), ((d, d), (d, d), (0, 0)))
    xflat = xp.reshape(hp * wp, cin)
    wmat = jnp.transpose(wt, (2, 3, 1, 0)).reshape(9 * cin, cout)
    offs = tuple(ih * d * wp + iw * d for ih in range(3) for iw in range(3))
    y = window_conv(xflat, wmat, params["scale"], params["shift"],
                    offs=offs, m_out=h * wp, negative_slope=negative_slope)
    return y.reshape(h, wp, cout)[:, :w, :]


def double_3d_conv(x, p1, p2):
    """Two Conv3d(3x3x3, pad=(0,1,1)) + BN + LeakyReLU blocks.
    x: (T=5, H, W) single-channel -> (H, W, 128)."""
    t, h, w = x.shape
    # ---- Conv3d #1: cin=1, K=27 (no lane padding), output frame-interleaved ----
    w1 = p1["w"]                                       # (128, 1, 3, 3, 3)
    cout1 = w1.shape[0]
    xp = jnp.pad(x.astype(jnp.bfloat16), ((0, 0), (1, 1), (1, 1)))
    taps = []
    for it in range(3):
        for ih in range(3):
            for iw in range(3):
                taps.append(lax.slice(xp, (it, ih, iw),
                                      (it + t - 2, ih + h, iw + w)))
    cols = jnp.stack(taps, axis=-1)                    # (T-2, H, W, 27)
    cols = jnp.transpose(cols, (1, 2, 0, 3)).reshape((t - 2) * h * w, 27)
    w1mat = jnp.transpose(w1, (2, 3, 4, 1, 0)).reshape(27, cout1)
    y1 = fused_matmul(cols, w1mat, p1["scale"], p1["shift"])
    # rows ordered (h, w, frame) -> channels become (frame, c) interleaved
    y1 = y1.reshape(h, w, (t - 2) * cout1)             # (H, W, 384)

    # ---- Conv3d #2: 9 spatial taps, K = 3 frames * 128 channels per tap -------
    w2 = p2["w"]                                       # (128, 128, 3, 3, 3)
    cout2 = w2.shape[0]
    cin_eff = y1.shape[-1]
    hp, wp = h + 2, w + 2
    y1p = jnp.pad(y1, ((1, 1), (1, 1), (0, 0))).reshape(hp * wp, cin_eff)
    # weight rows ordered (kh, kw, kt, cin) to match the (frame, c) interleave
    w2mat = jnp.transpose(w2, (3, 4, 2, 1, 0)).reshape(9 * cin_eff, cout2)
    offs = tuple(ih * wp + iw for ih in range(3) for iw in range(3))
    y2 = window_conv(y1p, w2mat, p2["scale"], p2["shift"],
                     offs=offs, m_out=h * wp)
    return y2.reshape(h, wp, cout2)[:, :w, :]


def conv_transpose_up(x, params, *, stride):
    """ConvTranspose2d with kernel == stride ((2,1) or (2,2)); bias, no BN/act."""
    w = params["w"]                                    # (cin, cout, kh, kw)
    bias = params["b"]
    cin, cout, kh, kw = w.shape
    h, wd, c = x.shape
    assert (kh, kw) == tuple(stride) and c == cin
    wmat = jnp.transpose(w, (0, 2, 3, 1)).reshape(cin, kh * kw * cout)
    shift = jnp.tile(bias, kh * kw)
    scale = jnp.ones((kh * kw * cout,), jnp.float32)
    y = fused_matmul(x.reshape(h * wd, cin), wmat, scale, shift,
                     negative_slope=1.0)
    y = y.reshape(h, wd, kh, kw, cout)
    # TODO(synk): fold this interleave into the Pallas out BlockSpec to save one
    # HBM round trip of the upsampled activation.
    return jnp.transpose(y, (0, 2, 1, 3, 4)).reshape(h * kh, wd * kw, cout)


# ---------------------------------------------------------------------------
# Pooling (layout ops, bf16)
# ---------------------------------------------------------------------------
def max_pool_2x2(x):
    h, w, c = x.shape
    return x.reshape(h // 2, 2, w // 2, 2, c).max(axis=(1, 3))


def doppler_max_pool(x):
    """F.pad(x, (0,1,0,0)) followed by MaxPool2d(2, stride=(2,1))."""
    h, w, c = x.shape
    xp = jnp.pad(x, ((0, 0), (0, 1), (0, 0)))
    xw = jnp.maximum(xp[:, :-1, :], xp[:, 1:, :])      # width window 2, stride 1
    return xw.reshape(h // 2, 2, w, c).max(axis=1)


# ---------------------------------------------------------------------------
# TMVANet blocks
# ---------------------------------------------------------------------------
def aspp_block(x, p):
    h, w, c = x.shape
    # Global branch: AvgPool2d((64,64)) on a 64x64 map; bilinear upsample of a
    # 1x1 map is a broadcast; plain 1x1 conv.  One row per image -> keep in XLA.
    g = jnp.mean(x.astype(jnp.float32), axis=(0, 1))                  # (C,)
    w1 = p["conv1_1x1"]["w"].reshape(-1, c)
    g = g @ w1.T + p["conv1_1x1"]["shift"]
    x1 = jnp.broadcast_to(g.astype(jnp.bfloat16)[None, None, :],
                          (h, w, g.shape[0]))
    x2 = conv1x1_block(x, p["cb1_1x1"])
    x3 = conv3x3_block(x, p["cb1_3x3"], dilation=6)
    x4 = conv3x3_block(x, p["cb2_3x3"], dilation=12)
    x5 = conv3x3_block(x, p["cb3_3x3"], dilation=18)
    return jnp.concatenate([x2, x3, x4, x5, x1], axis=-1)


def encoding_branch(x, p, signal_type):
    """x: (T, H, W) single channel."""
    x1 = double_3d_conv(x, p["c3d_1"], p["c3d_2"])                    # (H, W, 128)
    if signal_type in ("range_doppler", "angle_doppler"):
        x1_down = doppler_max_pool(x1)
    else:
        x1_down = max_pool_2x2(x1)
    x2 = conv3x3_block(x1_down, p["dcb2_1"])
    x2 = conv3x3_block(x2, p["dcb2_2"])
    if signal_type in ("range_doppler", "angle_doppler"):
        x2_down = doppler_max_pool(x2)
    else:
        x2_down = max_pool_2x2(x2)
    x3 = conv1x1_block(x2_down, p["scb1_1x1"])
    return x2_down, x3


def tmvanet_encoder(x_rd, x_ra, x_ad, p):
    ra_features, ra_latent = encoding_branch(x_ra, p["ra_branch"], "range_angle")
    rd_features, rd_latent = encoding_branch(x_rd, p["rd_branch"], "range_doppler")
    ad_features, ad_latent = encoding_branch(x_ad, p["ad_branch"], "angle_doppler")
    x1_rd = aspp_block(rd_features, p["rd_aspp"])
    x1_ra = aspp_block(ra_features, p["ra_aspp"])
    x1_ad = aspp_block(ad_features, p["ad_aspp"])
    x2_rd = conv1x1_block(x1_rd, p["rd_scb1_1x1"])
    x2_ra = conv1x1_block(x1_ra, p["ra_scb1_1x1"])
    x2_ad = conv1x1_block(x1_ad, p["ad_scb1_1x1"])
    x3 = jnp.concatenate([rd_latent, ra_latent, ad_latent], axis=-1)
    return x3, x2_rd, x2_ad, x2_ra


def tmvanet_decoder(x3, x2_rd, x2_ad, x2_ra, p):
    x3_rd = conv1x1_block(x3, p["rd_scb2_1x1"])
    x3_ra = conv1x1_block(x3, p["ra_scb2_1x1"])
    x4_rd = jnp.concatenate([x2_rd, x3_rd, x2_ad], axis=-1)
    x4_ra = jnp.concatenate([x2_ra, x3_ra, x2_ad], axis=-1)
    x5_rd = conv_transpose_up(x4_rd, p["rd_upconv1"], stride=(2, 1))
    x5_ra = conv_transpose_up(x4_ra, p["ra_upconv1"], stride=(2, 2))
    x6_rd = conv3x3_block(conv3x3_block(x5_rd, p["rd_dcb1_1"]), p["rd_dcb1_2"])
    x6_ra = conv3x3_block(conv3x3_block(x5_ra, p["ra_dcb1_1"]), p["ra_dcb1_2"])
    x7_rd = conv_transpose_up(x6_rd, p["rd_upconv2"], stride=(2, 1))
    x7_ra = conv_transpose_up(x6_ra, p["ra_upconv2"], stride=(2, 2))
    x8_rd = conv3x3_block(conv3x3_block(x7_rd, p["rd_dcb2_1"]), p["rd_dcb2_2"])
    x8_ra = conv3x3_block(conv3x3_block(x7_ra, p["ra_dcb2_1"]), p["ra_dcb2_2"])
    x9_rd = conv1x1_block(x8_rd, p["rd_final"], negative_slope=1.0,
                          out_dtype=jnp.float32)
    x9_ra = conv1x1_block(x8_ra, p["ra_final"], negative_slope=1.0,
                          out_dtype=jnp.float32)
    return x9_rd, x9_ra


def tmvanet_forward(params, x_rd, x_ra, x_ad):
    """Inputs in PyTorch layout (B, 1, T, H, W); outputs (B, n_classes, H, W)."""
    b = x_rd.shape[0]
    outs_rd, outs_ra = [], []
    for i in range(b):   # TODO(synk): batch > 1 handled by a Python loop
        x3, x2_rd, x2_ad, x2_ra = tmvanet_encoder(
            x_rd[i, 0].astype(jnp.bfloat16),
            x_ra[i, 0].astype(jnp.bfloat16),
            x_ad[i, 0].astype(jnp.bfloat16),
            params["encoder"])
        y_rd, y_ra = tmvanet_decoder(x3, x2_rd, x2_ad, x2_ra, params["decoder"])
        outs_rd.append(jnp.transpose(y_rd, (2, 0, 1)))
        outs_ra.append(jnp.transpose(y_ra, (2, 0, 1)))
    return jnp.stack(outs_rd), jnp.stack(outs_ra)


# ---------------------------------------------------------------------------
# Parameter construction (PyTorch-style init; BatchNorm folded in eval mode)
# ---------------------------------------------------------------------------
def _uniform(key, shape, bound):
    return jax.random.uniform(key, shape, jnp.float32, -bound, bound)


def init_conv_bn_params(key, cin, cout, ksize):
    kw_, kb_, kg_, kbt_ = jax.random.split(key, 4)
    if isinstance(ksize, int):
        kshape = (cout, cin, ksize, ksize)
        fan_in = cin * ksize * ksize
    else:  # 3-D conv
        kshape = (cout, cin) + tuple(ksize)
        fan_in = cin * math.prod(ksize)
    bound = 1.0 / math.sqrt(fan_in)
    w = _uniform(kw_, kshape, bound)
    bias = _uniform(kb_, (cout,), bound)
    gamma = jax.random.uniform(kg_, (cout,), jnp.float32, 0.5, 1.5)
    beta = _uniform(kbt_, (cout,), 0.1)
    scale = gamma / jnp.sqrt(jnp.float32(1.0 + 1e-5))   # running_var=1, mean=0
    shift = beta + bias * scale
    return {"w": w, "scale": scale, "shift": shift}


def init_plain_conv_params(key, cin, cout, ksize=1):
    kw_, kb_ = jax.random.split(key)
    fan_in = cin * ksize * ksize
    bound = 1.0 / math.sqrt(fan_in)
    w = _uniform(kw_, (cout, cin, ksize, ksize), bound)
    bias = _uniform(kb_, (cout,), bound)
    return {"w": w, "scale": jnp.ones((cout,), jnp.float32), "shift": bias}


def init_conv_transpose_params(key, cin, cout, ksize):
    kh, kw = ksize
    kw_, kb_ = jax.random.split(key)
    bound = 1.0 / math.sqrt(cout * kh * kw)
    w = _uniform(kw_, (cin, cout, kh, kw), bound)
    bias = _uniform(kb_, (cout,), bound)
    return {"w": w, "b": bias}


def init_branch(key):
    ks = jax.random.split(key, 5)
    return {
        "c3d_1": init_conv_bn_params(ks[0], 1, 128, (3, 3, 3)),
        "c3d_2": init_conv_bn_params(ks[1], 128, 128, (3, 3, 3)),
        "dcb2_1": init_conv_bn_params(ks[2], 128, 128, 3),
        "dcb2_2": init_conv_bn_params(ks[3], 128, 128, 3),
        "scb1_1x1": init_conv_bn_params(ks[4], 128, 128, 1),
    }


def init_aspp(key, cin=128, cout=128):
    ks = jax.random.split(key, 5)
    return {
        "conv1_1x1": init_plain_conv_params(ks[0], cin, cout, 1),
        "cb1_1x1": init_conv_bn_params(ks[1], cin, cout, 1),
        "cb1_3x3": init_conv_bn_params(ks[2], cin, cout, 3),
        "cb2_3x3": init_conv_bn_params(ks[3], cin, cout, 3),
        "cb3_3x3": init_conv_bn_params(ks[4], cin, cout, 3),
    }


def init_encoder(key):
    ks = jax.random.split(key, 9)
    return {
        "ra_branch": init_branch(ks[0]),
        "rd_branch": init_branch(ks[1]),
        "ad_branch": init_branch(ks[2]),
        "rd_aspp": init_aspp(ks[3]),
        "ra_aspp": init_aspp(ks[4]),
        "ad_aspp": init_aspp(ks[5]),
        "rd_scb1_1x1": init_conv_bn_params(ks[6], 640, 128, 1),
        "ra_scb1_1x1": init_conv_bn_params(ks[7], 640, 128, 1),
        "ad_scb1_1x1": init_conv_bn_params(ks[8], 640, 128, 1),
    }


def init_decoder(key, n_classes):
    ks = jax.random.split(key, 16)
    return {
        "rd_scb2_1x1": init_conv_bn_params(ks[0], 384, 128, 1),
        "ra_scb2_1x1": init_conv_bn_params(ks[1], 384, 128, 1),
        "rd_upconv1": init_conv_transpose_params(ks[2], 384, 128, (2, 1)),
        "ra_upconv1": init_conv_transpose_params(ks[3], 384, 128, (2, 2)),
        "rd_dcb1_1": init_conv_bn_params(ks[4], 128, 128, 3),
        "rd_dcb1_2": init_conv_bn_params(ks[5], 128, 128, 3),
        "ra_dcb1_1": init_conv_bn_params(ks[6], 128, 128, 3),
        "ra_dcb1_2": init_conv_bn_params(ks[7], 128, 128, 3),
        "rd_upconv2": init_conv_transpose_params(ks[8], 128, 128, (2, 1)),
        "ra_upconv2": init_conv_transpose_params(ks[9], 128, 128, (2, 2)),
        "rd_dcb2_1": init_conv_bn_params(ks[10], 128, 128, 3),
        "rd_dcb2_2": init_conv_bn_params(ks[11], 128, 128, 3),
        "ra_dcb2_1": init_conv_bn_params(ks[12], 128, 128, 3),
        "ra_dcb2_2": init_conv_bn_params(ks[13], 128, 128, 3),
        "rd_final": init_plain_conv_params(ks[14], 128, n_classes, 1),
        "ra_final": init_plain_conv_params(ks[15], 128, n_classes, 1),
    }


# ---------------------------------------------------------------------------
if __name__ == "__main__":
    key = jax.random.PRNGKey(0)
    k_params, k_rd, k_ra, k_ad, k_chk = jax.random.split(key, 5)
    k_enc, k_dec = jax.random.split(k_params)
    n_classes = 4
    params = {"encoder": init_encoder(k_enc),
              "decoder": init_decoder(k_dec, n_classes)}

    # ---- self-check 1: fused matmul + epilogue vs XLA (shape reused later) ----
    km1, km2 = jax.random.split(k_chk)
    xs = jax.random.normal(km1, (4096, 640), jnp.float32)
    ws = jax.random.normal(km2, (640, 128), jnp.float32) * 0.04
    sc = jnp.linspace(0.5, 1.5, 128).astype(jnp.float32)
    sh = jnp.linspace(-0.2, 0.2, 128).astype(jnp.float32)
    got = fused_matmul(xs, ws, sc, sh).astype(jnp.float32)
    want = _leaky(jnp.dot(xs.astype(jnp.bfloat16), ws.astype(jnp.bfloat16),
                          preferred_element_type=jnp.float32) * sc + sh)
    assert jnp.allclose(got, want, atol=3e-2, rtol=3e-2), "fused matmul mismatch"

    # ---- self-check 2: dilated 3x3 window conv vs lax.conv (ASPP d=6 shape) ---
    kcx, kc3 = jax.random.split(km2)
    xt = jax.random.normal(kcx, (64, 64, 128), jnp.float32).astype(jnp.bfloat16)
    pt = params["encoder"]["ra_aspp"]["cb1_3x3"]
    got_c = conv3x3_block(xt, pt, dilation=6).astype(jnp.float32)
    ref_c = lax.conv_general_dilated(
        xt[None], jnp.transpose(pt["w"], (2, 3, 1, 0)).astype(jnp.bfloat16),
        window_strides=(1, 1), padding=((6, 6), (6, 6)), rhs_dilation=(6, 6),
        dimension_numbers=("NHWC", "HWIO", "NHWC"),
        preferred_element_type=jnp.float32)[0]
    ref_c = _leaky(ref_c * pt["scale"] + pt["shift"])
    assert jnp.allclose(got_c, ref_c, atol=5e-2, rtol=5e-2), "window conv mismatch"

    # ---- self-check 3: double 3-D conv (frame-interleave path) vs lax.conv ----
    kc3x, kc3p1, kc3p2 = jax.random.split(kc3, 3)
    xt3 = jax.random.normal(kc3x, (5, 16, 24), jnp.float32)
    p1 = init_conv_bn_params(kc3p1, 1, 128, (3, 3, 3))
    p2 = init_conv_bn_params(kc3p2, 128, 128, (3, 3, 3))
    got_3 = double_3d_conv(xt3, p1, p2).astype(jnp.float32)
    w1d = jnp.transpose(p1["w"], (2, 3, 4, 1, 0)).astype(jnp.bfloat16)
    w2d = jnp.transpose(p2["w"], (2, 3, 4, 1, 0)).astype(jnp.bfloat16)
    r = lax.conv_general_dilated(
        xt3[None, ..., None].astype(jnp.bfloat16), w1d, (1, 1, 1),
        padding=((0, 0), (1, 1), (1, 1)),
        dimension_numbers=("NDHWC", "DHWIO", "NDHWC"),
        preferred_element_type=jnp.float32)
    r = _leaky(r * p1["scale"] + p1["shift"]).astype(jnp.bfloat16)
    r = lax.conv_general_dilated(
        r, w2d, (1, 1, 1), padding=((0, 0), (1, 1), (1, 1)),
        dimension_numbers=("NDHWC", "DHWIO", "NDHWC"),
        preferred_element_type=jnp.float32)
    r = _leaky(r * p2["scale"] + p2["shift"])[0, 0]
    assert jnp.allclose(got_3, r, atol=5e-2, rtol=5e-2), "3-D conv mismatch"

    # ---- full TMVANet forward -------------------------------------------------
    # Smallest shapes the reference forward admits: n_frames must be 5 (two valid
    # 3-D convs + squeeze), and ASPP's hard-coded 64x64 global pool forces
    # range = angle = 256 and doppler = 64 at the network input.  batch = 1.
    n_frames, B = 5, 1
    x_rd = jax.random.normal(k_rd, (B, 1, n_frames, 256, 64), jnp.float32)
    x_ra = jax.random.normal(k_ra, (B, 1, n_frames, 256, 256), jnp.float32)
    x_ad = jax.random.normal(k_ad, (B, 1, n_frames, 256, 64), jnp.float32)

    y_rd, y_ra = tmvanet_forward(params, x_rd, x_ra, x_ad)
    y_rd, y_ra = jax.block_until_ready((y_rd, y_ra))

    assert y_rd.shape == (B, n_classes, 256, 64), y_rd.shape
    assert y_ra.shape == (B, n_classes, 256, 256), y_ra.shape
    assert bool(jnp.all(jnp.isfinite(y_rd))) and bool(jnp.all(jnp.isfinite(y_ra)))

    print("KERNEL_OK")
</pallas_src>

<mosaic_0001>
module attributes {stable_mosaic.version = 11 : i64} {
  func.func @_matmul_kernel(%arg0: i32, %arg1: memref<1024x640xbf16, #tpu.memory_space<vmem>>, %arg2: memref<640x128xbf16, #tpu.memory_space<vmem>>, %arg3: memref<1x128xf32, #tpu.memory_space<vmem>>, %arg4: memref<1x128xf32, #tpu.memory_space<vmem>>, %arg5: memref<1024x128xbf16, #tpu.memory_space<vmem>>) attributes {dimension_semantics = [#tpu.dimension_semantics<parallel>], iteration_bounds = array<i64: 4>, scalar_prefetch = 0 : i64, scratch_operands = 0 : i64, tpu.core_type = #tpu.core_type<tc>, window_params = [{transform_indices = @transform_0, window_bounds = array<i64: 1024, 640>}, {pipeline_mode = #tpu.pipeline_mode<synchronous>, transform_indices = @transform_1, window_bounds = array<i64: 640, 128>}, {pipeline_mode = #tpu.pipeline_mode<synchronous>, transform_indices = @transform_2, window_bounds = array<i64: 1, 128>}, {pipeline_mode = #tpu.pipeline_mode<synchronous>, transform_indices = @transform_3, window_bounds = array<i64: 1, 128>}, {transform_indices = @transform_4, window_bounds = array<i64: 1024, 128>}]} {
    %c0 = arith.constant 0 : index
    %c0_0 = arith.constant 0 : index
    %0 = vector.load %arg1[%c0, %c0_0] : memref<1024x640xbf16, #tpu.memory_space<vmem>>, vector<1024x640xbf16>
    %c0_1 = arith.constant 0 : index
    %c0_2 = arith.constant 0 : index
    %1 = vector.load %arg2[%c0_1, %c0_2] : memref<640x128xbf16, #tpu.memory_space<vmem>>, vector<640x128xbf16>
    %cst = arith.constant dense<0.000000e+00> : vector<1024x128xf32>
    %2 = tpu.matmul %0, %1, %cst {dimension_numbers = #tpu.dot_dimension_numbers<[1], [0], [0], [1], [0, 0, 1, 1], [], []>} : vector<1024x640xbf16>, vector<640x128xbf16>, vector<1024x128xf32> -> vector<1024x128xf32>
    %c0_3 = arith.constant 0 : index
    %c0_4 = arith.constant 0 : index
    %3 = vector.load %arg3[%c0_3, %c0_4] : memref<1x128xf32, #tpu.memory_space<vmem>>, vector<1x128xf32>
    %4 = vector.broadcast %3 : vector<1x128xf32> to vector<1024x128xf32>
    %5 = arith.mulf %2, %4 : vector<1024x128xf32>
    %c0_5 = arith.constant 0 : index
    %c0_6 = arith.constant 0 : index
    %6 = vector.load %arg4[%c0_5, %c0_6] : memref<1x128xf32, #tpu.memory_space<vmem>>, vector<1x128xf32>
    %7 = vector.broadcast %6 : vector<1x128xf32> to vector<1024x128xf32>
    %8 = arith.addf %5, %7 : vector<1024x128xf32>
    %cst_7 = arith.constant 0.000000e+00 : f32
    %9 = vector.broadcast %cst_7 : f32 to vector<1024x128xf32>
    %10 = arith.cmpf oge, %8, %9 : vector<1024x128xf32>
    %cst_8 = arith.constant 0.00999999977 : f32
    %11 = vector.broadcast %cst_8 : f32 to vector<1024x128xf32>
    %12 = arith.mulf %11, %8 : vector<1024x128xf32>
    %13 = arith.select %10, %8, %12 : vector<1024x128xi1>, vector<1024x128xf32>
    %14 = arith.truncf %13 : vector<1024x128xf32> to vector<1024x128xbf16>
    %c0_9 = arith.constant 0 : index
    %c0_10 = arith.constant 0 : index
    %15 = vector.load %arg5[%c0_9, %c0_10] : memref<1024x128xbf16, #tpu.memory_space<vmem>>, vector<1024x128xbf16>
    tpu.vector_store %arg5[%c0_9, %c0_10], %14 {strides = array<i32>} : memref<1024x128xbf16, #tpu.memory_space<vmem>>, vector<1024x128xbf16>,
    return
  }
  func.func @transform_0(%arg0: i32) -> (i32, i32) {
    %c0_i32 = arith.constant 0 : i32
    %c0_i32_0 = arith.constant 0 : i32
    return %arg0, %c0_i32 : i32, i32
  }
  func.func @transform_1(%arg0: i32) -> (i32, i32) {
    %c0_i32 = arith.constant 0 : i32
    %c0_i32_0 = arith.constant 0 : i32
    %c0_i32_1 = arith.constant 0 : i32
    return %c0_i32, %c0_i32_0 : i32, i32
  }
  func.func @transform_2(%arg0: i32) -> (i32, i32) {
    %c0_i32 = arith.constant 0 : i32
    %c0_i32_0 = arith.constant 0 : i32
    %c0_i32_1 = arith.constant 0 : i32
    return %c0_i32, %c0_i32_0 : i32, i32
  }
  func.func @transform_3(%arg0: i32) -> (i32, i32) {
    %c0_i32 = arith.constant 0 : i32
    %c0_i32_0 = arith.constant 0 : i32
    %c0_i32_1 = arith.constant 0 : i32
    return %c0_i32, %c0_i32_0 : i32, i32
  }
  func.func @transform_4(%arg0: i32) -> (i32, i32) {
    %c0_i32 = arith.constant 0 : i32
    %c0_i32_0 = arith.constant 0 : i32
    return %arg0, %c0_i32 : i32, i32
  }
}

</mosaic_0001>

<bundles_post_ra>
// kernel: fused_matmul.1
= control target key start
LH: loop header
LB: loop body
LE: loop exit
PB: predicated region body
PF: predicated region fallthrough
CT: control target
= control target key end

     0   :  { %9 = vsyncpa [#allocation3], 0  ;;  %s9225_s0 = inlined_call_operand.vmem [shape: bf16[4096,640], index: 0, kind: input, shape index: {}]   ;;  %s9226_s1 = inlined_call_operand.vmem [shape: bf16[640,128], index: 1, kind: input, shape index: {}]   ;;  %s9227_s2 = inlined_call_operand.vmem [shape: f32[1,128], index: 2, kind: input, shape index: {}]   ;;  %s9228_s3 = inlined_call_operand.vmem [shape: f32[1,128], index: 3, kind: input, shape index: {}]   ;;  %s9229_s4 = inlined_call_operand.hbm [shape: bf16[4096,128], index: 4, kind: output, shape index: {}]  }
   0x1   :  { %11 = vsyncpa [#allocation3 + $0x1], 0  ;;  %s7464_s15 = smov 0   ;;  %s7466_s16 = smov 0  }
   0x2   :  { %s7468_s17 = smov 0   ;;  %s7470_s18 = smov 0  }
   0x3 LB: > { %s7485_s19 = sadd.s32 4294967295, %s7433_s18   ;;  %s5576_s20 = sadd.s32 4294967294, %s7433_s18   ;;  %s7433_s18 = sphi %s7470_s18, %s9525_s18   ;;  %s7429_s17 = sphi %s7468_s17, %s9524_s17   ;;  %s7425_s16 = sphi %s7466_s16, %s9523_s16   ;;  %s7421_s15 = sphi %s7464_s15, %s9522_s15  }
   0x4   : > { %s7489_s21 = sadd.s32 1, %s7433_s18   ;;  %s113_s22 = sadd.s32 1, %s7429_s17 }
   0x5   : > { %s110_s23 = ssub.s32 %s7433_s18, %s7489_s21  ;;  %p123_p0 = scmp.ne.s32.totalorder %s7429_s17, %s7425_s16 }
   0x6   : > { %p111_p1 = scmp.eq.s32.totalorder %s110_s23, 0  ;;  %p124_p2 = scmp.eq.s32.totalorder %s7485_s19, 3 }
   0x7   : > { %p129_p3 = scmp.ne.s32.totalorder %s7425_s16, %s7421_s15  ;;  %p130_p4 = scmp.eq.s32.totalorder %s5576_s20, 3 }
   0x8   : > { %s7500_s24 = scalar_select %p111_p1, %s7429_s17, %s113_s22  }
   0x9   : > { %p7502_p5 = por %p124_p2, %p123_p0  ;;  %p7506_p6 = por %p130_p4, %p129_p3 }
   0xa   : > { %p5579_p7 = scmp.ge.s32.totalorder %s7433_s18, 1  ;;  %p167_p8 = scmp.lt.s32.totalorder %s7433_s18, 5 }
   0xc   : > { %p168_p9 = pnand %p5579_p7, %p167_p8 }
   0xe   : > { %171 = sbr.rel (%p168_p9) target bundleno = 940 (0x3ac), region = 36 }
  0x13   : > { %v6881_v0 = vld [vmem:[%s9226_s1 + $0x38] sm:$0xff]   ;;  %v7435_v1 = vmov 0   ;;  %s5581_s29 = sshll.u32 %s7485_s19, 7  ;;  %v6882_v2 = vld [vmem:[%s9226_s1 + $0x30] sm:$0xff]   ;;  %v6883_v3 = vld [vmem:[%s9226_s1 + $0x28] sm:$0xff]   ;;  %s191_s9 = sand.u32 1, %s7425_s16  }
  0x14   : > { %2571 = vmatprep.subr.bf16.mxu0 %v7435_v1  ;;  %6806 = vmatprep.subr.bf16.mxu1 %v7435_v1  ;;  %p195_p10 = scmp.lt.s32.totalorder %s5581_s29, 511  ;;  %v6884_v4 = vld [vmem:[%s9226_s1 + $0x20] sm:$0xff]   ;;  %v6885_v5 = vld [vmem:[%s9226_s1 + $0x18] sm:$0xff]   ;;  %v6886_v7 = vld [vmem:[%s9226_s1 + $0x10] sm:$0xff]  }
  0x15   : > { %2572 = vmatpush1.bf16.msra.mxu0 %v6881_v0  ;;  %6822 = vmatpush1.bf16.msra.mxu1 %v6881_v0  ;;  %v6887_v9 = vld [vmem:[%s9226_s1 + $0x8] sm:$0xff]   ;;  %v6888_v10 = vld [vmem:[%s9226_s1] sm:$0xff]   ;;  %v6889_v11 = vld [vmem:[%s9226_s1 + $0x78] sm:$0xff]  }
  0x16   : > { %2573 = vmatprep.subr.bf16.mxu0 %v7435_v1  ;;  %6807 = vmatprep.subr.bf16.mxu1 %v7435_v1  ;;  %s9527_s29 = smov (!%p195_p10, %s5581_s29), 511  ;;  %v6890_v12 = vld [vmem:[%s9226_s1 + $0x70] sm:$0xff]   ;;  %v6891_v13 = vld [vmem:[%s9226_s1 + $0x68] sm:$0xff]   ;;  %v6892_v14 = vld [vmem:[%s9226_s1 + $0x60] sm:$0xff]  }
  0x17   : > { %s6838_s10 = smul.u32 20, %s9527_s29  ;;  %v6893_v15 = vld [vmem:[%s9226_s1 + $0x58] sm:$0xff]   ;;  %v6894_v16 = vld [vmem:[%s9226_s1 + $0x50] sm:$0xff]   ;;  %v6895_v17 = vld [vmem:[%s9226_s1 + $0x48] sm:$0xff]   ;;  %s6206_s29 = sshll.u32 %s7485_s19, 13 }
  0x18   : > { %v6896_v18 = vld [vmem:[%s9226_s1 + $0x40] sm:$0xff]   ;;  %v6903_v19 = vld [vmem:[%s9226_s1 + $0x138] sm:$0xff]   ;;  %v6946_v25 = vld [vmem:[%s9226_s1 + $0x130] sm:$0xff]   ;;  %s9177_s7 = scalar_lea.hbm %s9229_s4, %s6206_s29  ;;  %s9185_s19 = scalar_lea.sflag [#allocation3], %s191_s9 }
  0x19   : > { %2574 = vmatpush1.bf16.msra.mxu0 %v6882_v2  ;;  %6823 = vmatpush1.bf16.msra.mxu1 %v6882_v2  ;;  %s7539_s20 = scalar_lea.vmem %s9225_s0, %s6838_s10  ;;  %v6904_v22 = vld [vmem:[%s9226_s1 + $0xb8] sm:$0xff]   ;;  %v6911_v26 = vld [vmem:[%s9226_s1 + $0xb0] sm:$0xff]   ;;  %v6989_v27 = vld [vmem:[%s9226_s1 + $0x128] sm:$0xff]   ;;  %s8407_s10 = sshll.u32 %s191_s9, 9 }
  0x1a   : > { %2575 = vmatprep.subr.bf16.mxu0 %v7435_v1  ;;  %6808 = vmatprep.subr.bf16.mxu1 %v7435_v1  ;;  %v6899_v6 = vld [vmem:[%s7539_s20 + $0x4] ss:$20 sps:$4 sm:$0xff]   ;;  %v6897_v20 = vld [vmem:[%s7539_s20] ss:$20 sps:$4 sm:$0xff]   ;;  %v6909_v28 = vld [vmem:[%s7539_s20 + $0x28] ss:$20 sps:$4 sm:$0xff]  }
  0x1b   : > { %v6902_v8 = vld [vmem:[%s7539_s20 + $0x784] ss:$20 sps:$4 sm:$0xff]   ;;  %2603 = vmatprep.mubr.bf16.mxu0 %v6899_v6  ;;  %v6900_v21 = vld [vmem:[%s7539_s20 + $0x780] ss:$20 sps:$4 sm:$0xff]   ;;  %v6910_v29 = vld [vmem:[%s7539_s20 + $0x7a8] ss:$20 sps:$4 sm:$0xff]  }
  0x1c   : > { %2987 = vmatprep.mubr.bf16.mxu1 %v6902_v8  ;;  %v6905_v23 = vld [vmem:[%s7539_s20 + $0x2c] ss:$20 sps:$4 sm:$0xff]   ;;  %v6912_v30 = vld [vmem:[%s7539_s20 + $0x54] ss:$20 sps:$4 sm:$0xff]   ;;  %v6916_v34 = vld [vmem:[%s7539_s20 + $0x50] ss:$20 sps:$4 sm:$0xff]  }
  0x1d   : > { %2576 = vmatpush1.bf16.msra.mxu0 %v6883_v3  ;;  %6824 = vmatpush1.bf16.msra.mxu1 %v6883_v3  ;;  %v6907_v24 = vld [vmem:[%s7539_s20 + $0x7ac] ss:$20 sps:$4 sm:$0xff]   ;;  %v6914_v31 = vld [vmem:[%s7539_s20 + $0x7d4] ss:$20 sps:$4 sm:$0xff]   ;;  %v6917_v35 = vld [vmem:[%s7539_s20 + $0x7d0] ss:$20 sps:$4 sm:$0xff]  }
  0x1e   : > { %2577 = vmatprep.subr.bf16.mxu0 %v7435_v1  ;;  %6809 = vmatprep.subr.bf16.mxu1 %v7435_v1  ;;  %v6918_v32 = vld [vmem:[%s9226_s1 + $0xa8] sm:$0xff]   ;;  %v6925_v33 = vld [vmem:[%s9226_s1 + $0xa0] sm:$0xff]   ;;  %v6919_v36 = vld [vmem:[%s7539_s20 + $0x7c] ss:$20 sps:$4 sm:$0xff]   ;;  %s8426_s11 = scalar_lea.vmem [#allocation2], %s8407_s10  ;;  %s7436_s10 = smov [#allocation2]  }
  0x1f   : > { %v6921_v37 = vld [vmem:[%s7539_s20 + $0x7fc] ss:$20 sps:$4 sm:$0xff]   ;;  %v6923_v39 = vld [vmem:[%s7539_s20 + $0x78] ss:$20 sps:$4 sm:$0xff]   ;;  %v7030_v44 = vld [vmem:[%s9226_s1 + $0x120] sm:$0xff]   ;;  %s5514_s30 = sshll.u32 %s8426_s11, 4  ;;  %s9179_s30 = int_to_ptr.vmem [resolvable:$true] %s5514_s30 }
  0x20   : > { %v6932_v38 = vld [vmem:[%s9226_s1 + $0x98] sm:$0xff]   ;;  %v6939_v40 = vld [vmem:[%s9226_s1 + $0x90] sm:$0xff]   ;;  %v6947_v45 = vld [vmem:[%s9226_s1 + $0x88] sm:$0xff]   ;;  %s7373_s8 = scalar_lea.vmem %s9179_s30, 8192 }
  0x21   : > { %2578 = vmatpush1.bf16.msra.mxu0 %v6884_v4  ;;  %6825 = vmatpush1.bf16.msra.mxu1 %v6884_v4  ;;  %v6924_v41 = vld [vmem:[%s7539_s20 + $0x7f8] ss:$20 sps:$4 sm:$0xff]   ;;  %v6930_v46 = vld [vmem:[%s7539_s20 + $0xa0] ss:$20 sps:$4 sm:$0xff]   ;;  %v6937_v53 = vld [vmem:[%s7539_s20 + $0xc8] ss:$20 sps:$4 sm:$0xff]   ;;  %p7374_p11 = scmp.ne.s32.totalorder %s9179_s30, %s7373_s8 }
  0x22   : > { %2579 = vmatprep.subr.bf16.mxu0 %v7435_v1  ;;  %6810 = vmatprep.subr.bf16.mxu1 %v7435_v1  ;;  %v6926_v42 = vld [vmem:[%s7539_s20 + $0xa4] ss:$20 sps:$4 sm:$0xff]   ;;  %v6931_v47 = vld [vmem:[%s7539_s20 + $0x820] ss:$20 sps:$4 sm:$0xff]   ;;  %v6938_v54 = vld [vmem:[%s7539_s20 + $0x848] ss:$20 sps:$4 sm:$0xff]  }
  0x23   : > { %v6928_v43 = vld [vmem:[%s7539_s20 + $0x824] ss:$20 sps:$4 sm:$0xff]   ;;  %v6933_v49 = vld [vmem:[%s7539_s20 + $0xcc] ss:$20 sps:$4 sm:$0xff]   ;;  %v6968_v52 = vld [vmem:[%s9226_s1 + $0xf0] sm:$0xff]   ;;  %p7375_p12 = pnand %p7374_p11, %p7502_p5 }
  0x24   : > { %v6954_v48 = vld [vmem:[%s9226_s1 + $0x80] sm:$0xff]   ;;  %v6961_v51 = vld [vmem:[%s9226_s1 + $0xf8] sm:$0xff]   ;;  %v6940_v55 = vld [vmem:[%s7539_s20 + $0xf4] ss:$20 sps:$4 sm:$0xff]  }
  0x25   : > { %2580 = vmatpush1.bf16.msra.mxu0 %v6885_v5  ;;  %6826 = vmatpush1.bf16.msra.mxu1 %v6885_v5  ;;  %v6935_v50 = vld [vmem:[%s7539_s20 + $0x84c] ss:$20 sps:$4 sm:$0xff]   ;;  %v6942_v56 = vld [vmem:[%s7539_s20 + $0x874] ss:$20 sps:$4 sm:$0xff]   ;;  %v6944_v59 = vld [vmem:[%s7539_s20 + $0xf0] ss:$20 sps:$4 sm:$0xff]   ;;  %p7376_p13 = pneg %p7375_p12 }
  0x26   : > { %2581 = vmatprep.subr.bf16.mxu0 %v7435_v1  ;;  %6811 = vmatprep.subr.bf16.mxu1 %v7435_v1  ;;  %v6975_v57 = vld [vmem:[%s9226_s1 + $0xe8] sm:$0xff]   ;;  %v6982_v58 = vld [vmem:[%s9226_s1 + $0xe0] sm:$0xff]   ;;  %v6948_v61 = vld [vmem:[%s7539_s20 + $0x11c] ss:$20 sps:$4 sm:$0xff]  }
  0x27   : > { %v6945_v60 = vld [vmem:[%s7539_s20 + $0x870] ss:$20 sps:$4 sm:$0xff]   ;;  %v6990_v63 = vld [vmem:[%s9226_s1 + $0xd8] sm:$0xff]   ;;  %v7004_v6 = vld [vmem:[%s9226_s1 + $0xc8] sm:$0xff]  }
  0x28   : > { %v6950_v62 = vld [vmem:[%s7539_s20 + $0x89c] ss:$20 sps:$4 sm:$0xff]   ;;  %v6952_v2 = vld [vmem:[%s7539_s20 + $0x118] ss:$20 sps:$4 sm:$0xff]   ;;  %v6959_v8 = vld [vmem:[%s7539_s20 + $0x140] ss:$20 sps:$4 sm:$0xff]  }
  0x29   : > { %2582 = vmatpush1.bf16.msra.mxu0 %v6886_v7  ;;  %6827 = vmatpush1.bf16.msra.mxu1 %v6886_v7  ;;  %v6997_v0 = vld [vmem:[%s9226_s1 + $0xd0] sm:$0xff]   ;;  %v6953_v3 = vld [vmem:[%s7539_s20 + $0x898] ss:$20 sps:$4 sm:$0xff]   ;;  %v7011_v7 = vld [vmem:[%s9226_s1 + $0xc0] sm:$0xff]  }
  0x2a   : > { %2583 = vmatprep.subr.bf16.mxu0 %v7435_v1  ;;  %6812 = vmatprep.subr.bf16.mxu1 %v7435_v1  ;;  %v6955_v4 = vld [vmem:[%s7539_s20 + $0x144] ss:$20 sps:$4 sm:$0xff]  }
  0x2b   : > { %v6957_v5 = vld [vmem:[%s7539_s20 + $0x8c4] ss:$20 sps:$4 sm:$0xff]  }
  0x2d   : > { %2584 = vmatpush1.bf16.msra.mxu0 %v6887_v9  ;;  %6828 = vmatpush1.bf16.msra.mxu1 %v6887_v9  ;;  %v6960_v9 = vld [vmem:[%s7539_s20 + $0x8c0] ss:$20 sps:$4 sm:$0xff]  }
  0x2e   : > { %2585 = vmatprep.subr.bf16.mxu0 %v7435_v1  ;;  %6813 = vmatprep.subr.bf16.mxu1 %v7435_v1 }
  0x31   : > { %2586 = vmatpush1.bf16.msra.mxu0 %v6888_v10  ;;  %6829 = vmatpush1.bf16.msra.mxu1 %v6888_v10  ;;  %v6962_v10 = vld [vmem:[%s7539_s20 + $0x16c] ss:$20 sps:$4 sm:$0xff]  }
  0x32   : > { %2587 = vmatprep.subr.bf16.mxu0 %v7435_v1  ;;  %6814 = vmatprep.subr.bf16.mxu1 %v7435_v1 }
  0x35   : > { %2588 = vmatpush2.bf16.msra.mxu0 %v6889_v11  ;;  %6830 = vmatpush2.bf16.msra.mxu1 %v6889_v11  ;;  %v6964_v11 = vld [vmem:[%s7539_s20 + $0x8ec] ss:$20 sps:$4 sm:$0xff]  }
  0x36   : > { %2589 = vmatprep.subr.bf16.mxu0 %v7435_v1  ;;  %6815 = vmatprep.subr.bf16.mxu1 %v7435_v1 }
  0x39   : > { %2590 = vmatpush2.bf16.msra.mxu0 %v6890_v12  ;;  %6831 = vmatpush2.bf16.msra.mxu1 %v6890_v12  ;;  %v7067_v12 = vld [vmem:[%s9226_s1 + $0x118] sm:$0xff]  }
  0x3a   : > { %2591 = vmatprep.subr.bf16.mxu0 %v7435_v1  ;;  %6816 = vmatprep.subr.bf16.mxu1 %v7435_v1 }
  0x3d   : > { %2592 = vmatpush2.bf16.msra.mxu0 %v6891_v13  ;;  %6832 = vmatpush2.bf16.msra.mxu1 %v6891_v13  ;;  %v6966_v13 = vld [vmem:[%s7539_s20 + $0x168] ss:$20 sps:$4 sm:$0xff]  }
  0x3e   : > { %2593 = vmatprep.subr.bf16.mxu0 %v7435_v1  ;;  %6817 = vmatprep.subr.bf16.mxu1 %v7435_v1 }
  0x41   : > { %2594 = vmatpush2.bf16.msra.mxu0 %v6892_v14  ;;  %6833 = vmatpush2.bf16.msra.mxu1 %v6892_v14  ;;  %v6967_v14 = vld [vmem:[%s7539_s20 + $0x8e8] ss:$20 sps:$4 sm:$0xff]  }
  0x42   : > { %2595 = vmatprep.subr.bf16.mxu0 %v7435_v1  ;;  %6818 = vmatprep.subr.bf16.mxu1 %v7435_v1 }
  0x45   : > { %2596 = vmatpush2.bf16.msra.mxu0 %v6893_v15  ;;  %6834 = vmatpush2.bf16.msra.mxu1 %v6893_v15  ;;  %v6971_v15 = vld [vmem:[%s7539_s20 + $0x914] ss:$20 sps:$4 sm:$0xff]  }
  0x46   : > { %2597 = vmatprep.subr.bf16.mxu0 %v7435_v1  ;;  %6819 = vmatprep.subr.bf16.mxu1 %v7435_v1 }
  0x49   : > { %2598 = vmatpush2.bf16.msra.mxu0 %v6894_v16  ;;  %6835 = vmatpush2.bf16.msra.mxu1 %v6894_v16  ;;  %v6973_v16 = vld [vmem:[%s7539_s20 + $0x190] ss:$20 sps:$4 sm:$0xff]  }
  0x4a   : > { %2599 = vmatprep.subr.bf16.mxu0 %v7435_v1  ;;  %6820 = vmatprep.subr.bf16.mxu1 %v7435_v1 }
  0x4d   : > { %2600 = vmatpush2.bf16.msra.mxu0 %v6895_v17  ;;  %6836 = vmatpush2.bf16.msra.mxu1 %v6895_v17  ;;  %v6974_v17 = vld [vmem:[%s7539_s20 + $0x910] ss:$20 sps:$4 sm:$0xff]  }
  0x4e   : > { %2601 = vmatprep.subr.bf16.mxu0 %v7435_v1  ;;  %6821 = vmatprep.subr.bf16.mxu1 %v7435_v1 }
  0x51   : > { %2602 = vmatpush2.bf16.msra.mxu0 %v6896_v18  ;;  %6837 = vmatpush2.bf16.msra.mxu1 %v6896_v18  ;;  %v6976_v18 = vld [vmem:[%s7539_s20 + $0x1bc] ss:$20 sps:$4 sm:$0xff]  }
  0x52   : > { %3116 = vmatprep.subr.bf16.mxu1 %v7435_v1  ;;  %6662 = vmatprep.subr.bf16.mxu0 %v6903_v19 }
  0x54   : > { %2604 = vmatmul.mubr.bf16.vlgmr.msra.gmra.mxu0 %v6897_v20  ;;  %2988 = vmatmul.mubr.bf16.vlgmr.msra.gmra.mxu1 %v6900_v21  ;;  %v6980_v20 = vld [vmem:[%s7539_s20 + $0x1b8] ss:$20 sps:$4 sm:$0xff]  }
  0x55   : > { %3117 = vmatpush1.bf16.msra.mxu1 %v6904_v22  ;;  %6663 = vmatpush3.bf16.msra.mxu0 %v6903_v19  ;;  %v6978_v19 = vld [vmem:[%s7539_s20 + $0x93c] ss:$20 sps:$4 sm:$0xff]   ;;  %v6981_v21 = vld [vmem:[%s7539_s20 + $0x938] ss:$20 sps:$4 sm:$0xff]  }
  0x56   : > { %2611 = vmatprep.mubr.bf16.mxu0 %v6905_v23  ;;  %2995 = vmatprep.mubr.bf16.mxu1 %v6907_v24  ;;  %v6983_v22 = vld [vmem:[%s7539_s20 + $0x1e4] ss:$20 sps:$4 sm:$0xff]   ;;  %v6987_v24 = vld [vmem:[%s7539_s20 + $0x1e0] ss:$20 sps:$4 sm:$0xff]  }
  0x57   : > { %3118 = vmatprep.subr.bf16.mxu1 %v7435_v1  ;;  %6664 = vmatprep.subr.bf16.mxu0 %v6946_v25  ;;  %v6985_v23 = vld [vmem:[%s7539_s20 + $0x964] ss:$20 sps:$4 sm:$0xff]  }
  0x59   : > { %3119 = vmatpush1.bf16.msra.mxu1 %v6911_v26  ;;  %6665 = vmatpush3.bf16.msra.mxu0 %v6946_v25  ;;  %v6988_v25 = vld [vmem:[%s7539_s20 + $0x960] ss:$20 sps:$4 sm:$0xff]  }
  0x5a   : > { %3120 = vmatprep.subr.bf16.mxu1 %v7435_v1  ;;  %6666 = vmatprep.subr.bf16.mxu0 %v6989_v27  ;;  %v6991_v26 = vld [vmem:[%s7539_s20 + $0x20c] ss:$20 sps:$4 sm:$0xff]  }
  0x5c   : > { %2612 = vmatmul.mubr.bf16.gmra.mxu0 %v6909_v28  ;;  %2996 = vmatmul.mubr.bf16.gmra.mxu1 %v6910_v29  ;;  %v6995_v28 = vld [vmem:[%s7539_s20 + $0x208] ss:$20 sps:$4 sm:$0xff]  }
  0x5d   : > { %2619 = vmatprep.mubr.bf16.mxu0 %v6912_v30  ;;  %3003 = vmatprep.mubr.bf16.mxu1 %v6914_v31  ;;  %v6996_v29 = vld [vmem:[%s7539_s20 + $0x988] ss:$20 sps:$4 sm:$0xff]  }
  0x5e   : > { %3121 = vmatpush1.bf16.msra.mxu1 %v6918_v32  ;;  %6667 = vmatpush3.bf16.msra.mxu0 %v6989_v27  ;;  %v6993_v27 = vld [vmem:[%s7539_s20 + $0x98c] ss:$20 sps:$4 sm:$0xff]   ;;  %v6998_v30 = vld [vmem:[%s7539_s20 + $0x234] ss:$20 sps:$4 sm:$0xff]   ;;  %v7002_v32 = vld [vmem:[%s7539_s20 + $0x230] ss:$20 sps:$4 sm:$0xff]  }
  0x5f   : > { %3122 = vmatprep.subr.bf16.mxu1 %v7435_v1  ;;  %6668 = vmatprep.subr.bf16.mxu0 %v7030_v44  ;;  %v7000_v31 = vld [vmem:[%s7539_s20 + $0x9b4] ss:$20 sps:$4 sm:$0xff]  }
  0x62   : > { %3123 = vmatpush1.bf16.msra.mxu1 %v6925_v33  ;;  %6669 = vmatpush3.bf16.msra.mxu0 %v7030_v44  ;;  %v7003_v33 = vld [vmem:[%s7539_s20 + $0x9b0] ss:$20 sps:$4 sm:$0xff]   ;;  %v7020_v44 = vld [vmem:[%s7539_s20 + $0x34] ss:$20 sps:$4 sm:$0xff]  }
  0x63   : > { %3124 = vmatprep.subr.bf16.mxu1 %v7435_v1  ;;  %6670 = vmatprep.subr.bf16.mxu0 %v7067_v12 }
  0x64   : > { %2620 = vmatmul.mubr.bf16.gmra.mxu0 %v6916_v34  ;;  %3004 = vmatmul.mubr.bf16.gmra.mxu1 %v6917_v35  ;;  %v7005_v34 = vld [vmem:[%s7539_s20 + $0x25c] ss:$20 sps:$4 sm:$0xff]  }
  0x65   : > { %2627 = vmatprep.mubr.bf16.mxu0 %v6919_v36  ;;  %3011 = vmatprep.mubr.bf16.mxu1 %v6921_v37  ;;  %v7007_v35 = vld [vmem:[%s7539_s20 + $0x9dc] ss:$20 sps:$4 sm:$0xff]   ;;  %v7009_v37 = vld [vmem:[%s7539_s20 + $0x258] ss:$20 sps:$4 sm:$0xff]  }
  0x66   : > { %3125 = vmatpush1.bf16.msra.mxu1 %v6932_v38  ;;  %6671 = vmatpush3.bf16.msra.mxu0 %v7067_v12  ;;  %v7104_v36 = vld [vmem:[%s9226_s1 + $0x110] sm:$0xff]   ;;  %v7010_v38 = vld [vmem:[%s7539_s20 + $0x9d8] ss:$20 sps:$4 sm:$0xff]   ;;  %v7066_v12 = vld [vmem:[%s7539_s20 + $0x148] ss:$20 sps:$4 sm:$0xff]  }
  0x67   : > { %3126 = vmatprep.subr.bf16.mxu1 %v7435_v1  ;;  %6672 = vmatprep.subr.bf16.mxu0 %v7104_v36 }
  0x6a   : > { %3127 = vmatpush1.bf16.msra.mxu1 %v6939_v40  ;;  %6673 = vmatpush3.bf16.msra.mxu0 %v7104_v36  ;;  %v7016_v40 = vld [vmem:[%s7539_s20 + $0xc] ss:$20 sps:$4 sm:$0xff]  }
  0x6b   : > { %3128 = vmatprep.subr.bf16.mxu1 %v7435_v1 }
  0x6c   : > { %2628 = vmatmul.mubr.bf16.gmra.mxu0 %v6923_v39  ;;  %3012 = vmatmul.mubr.bf16.gmra.mxu1 %v6924_v41  ;;  %v7012_v39 = vld [vmem:[%s7539_s20 + $0x284] ss:$20 sps:$4 sm:$0xff]   ;;  %v7014_v41 = vld [vmem:[%s7539_s20 + $0x8] ss:$20 sps:$4 sm:$0xff]  }
  0x6d   : > { %2635 = vmatprep.mubr.bf16.mxu0 %v6926_v42  ;;  %3019 = vmatprep.mubr.bf16.mxu1 %v6928_v43  ;;  %v7017_v42 = vld [vmem:[%s7539_s20 + $0x280] ss:$20 sps:$4 sm:$0xff]  }
  0x6e   : > { %3129 = vmatpush1.bf16.msra.mxu1 %v6947_v45  ;;  %v7018_v43 = vld [vmem:[%s7539_s20 + $0x2ac] ss:$20 sps:$4 sm:$0xff]   ;;  %v7022_v45 = vld [vmem:[%s7539_s20 + $0x2a8] ss:$20 sps:$4 sm:$0xff]  }
  0x6f   : > { %3130 = vmatprep.subr.bf16.mxu1 %v7435_v1 }
  0x72   : > { %3131 = vmatpush1.bf16.msra.mxu1 %v6954_v48  ;;  %v7026_v48 = vld [vmem:[%s7539_s20 + $0x5c] ss:$20 sps:$4 sm:$0xff]  }
  0x73   : > { %3132 = vmatprep.subr.bf16.mxu1 %v7435_v1 }
  0x74   : > { %2636 = vmatmul.mubr.bf16.gmra.mxu0 %v6930_v46  ;;  %3020 = vmatmul.mubr.bf16.gmra.mxu1 %v6931_v47  ;;  %v7023_v46 = vld [vmem:[%s7539_s20 + $0x30] ss:$20 sps:$4 sm:$0xff]   ;;  %v7024_v47 = vld [vmem:[%s7539_s20 + $0x2d4] ss:$20 sps:$4 sm:$0xff]  }
  0x75   : > { %2643 = vmatprep.mubr.bf16.mxu0 %v6933_v49  ;;  %3027 = vmatprep.mubr.bf16.mxu1 %v6935_v50  ;;  %v7028_v49 = vld [vmem:[%s7539_s20 + $0x2d0] ss:$20 sps:$4 sm:$0xff]   ;;  %v7029_v50 = vld [vmem:[%s7539_s20 + $0x58] ss:$20 sps:$4 sm:$0xff]  }
  0x76   : > { %3133 = vmatpush2.bf16.msra.mxu1 %v6961_v51  ;;  %v7031_v51 = vld [vmem:[%s7539_s20 + $0x2fc] ss:$20 sps:$4 sm:$0xff]  }
  0x77   : > { %3134 = vmatprep.subr.bf16.mxu1 %v7435_v1 }
  0x7a   : > { %3135 = vmatpush2.bf16.msra.mxu1 %v6968_v52  ;;  %v7033_v52 = vld [vmem:[%s7539_s20 + $0x84] ss:$20 sps:$4 sm:$0xff]  }
  0x7b   : > { %3136 = vmatprep.subr.bf16.mxu1 %v7435_v1 }
  0x7c   : > { %2644 = vmatmul.mubr.bf16.gmra.mxu0 %v6937_v53  ;;  %3028 = vmatmul.mubr.bf16.gmra.mxu1 %v6938_v54  ;;  %v7035_v53 = vld [vmem:[%s7539_s20 + $0x2f8] ss:$20 sps:$4 sm:$0xff]   ;;  %v7036_v54 = vld [vmem:[%s7539_s20 + $0x80] ss:$20 sps:$4 sm:$0xff]  }
  0x7d   : > { %2651 = vmatprep.mubr.bf16.mxu0 %v6940_v55  ;;  %3035 = vmatprep.mubr.bf16.mxu1 %v6942_v56  ;;  %v7037_v55 = vld [vmem:[%s7539_s20 + $0x324] ss:$20 sps:$4 sm:$0xff]   ;;  %v7039_v56 = vld [vmem:[%s7539_s20 + $0xac] ss:$20 sps:$4 sm:$0xff]  }
  0x7e   : > { %3137 = vmatpush2.bf16.msra.mxu1 %v6975_v57  ;;  %v7041_v57 = vld [vmem:[%s7539_s20 + $0x320] ss:$20 sps:$4 sm:$0xff]  }
  0x7f   : > { %3138 = vmatprep.subr.bf16.mxu1 %v7435_v1 }
  0x82   : > { %3139 = vmatpush2.bf16.msra.mxu1 %v6982_v58  ;;  %v7042_v58 = vld [vmem:[%s7539_s20 + $0xa8] ss:$20 sps:$4 sm:$0xff]  }
  0x83   : > { %3140 = vmatprep.subr.bf16.mxu1 %v7435_v1 }
  0x84   : > { %2652 = vmatmul.mubr.bf16.gmra.mxu0 %v6944_v59  ;;  %3036 = vmatmul.mubr.bf16.gmra.mxu1 %v6945_v60  ;;  %v7043_v59 = vld [vmem:[%s7539_s20 + $0x34c] ss:$20 sps:$4 sm:$0xff]   ;;  %v7045_v60 = vld [vmem:[%s7539_s20 + $0xd4] ss:$20 sps:$4 sm:$0xff]  }
  0x85   : > { %2659 = vmatprep.mubr.bf16.mxu0 %v6948_v61  ;;  %3043 = vmatprep.mubr.bf16.mxu1 %v6950_v62  ;;  %v7141_v61 = vld [vmem:[%s9226_s1 + $0x108] sm:$0xff]  }
  0x86   : > { %3141 = vmatpush2.bf16.msra.mxu1 %v6990_v63  ;;  %6674 = vmatprep.subr.bf16.mxu0 %v7141_v61  ;;  %v7047_v62 = vld [vmem:[%s7539_s20 + $0x348] ss:$20 sps:$4 sm:$0xff]   ;;  %v7048_v63 = vld [vmem:[%s7539_s20 + $0xd0] ss:$20 sps:$4 sm:$0xff]  }
  0x87   : > { %3142 = vmatprep.subr.bf16.mxu1 %v7435_v1  ;;  %6675 = vmatpush3.bf16.msra.mxu0 %v7141_v61 }
  0x8a   : > { %3143 = vmatpush2.bf16.msra.mxu1 %v6997_v0  ;;  %v7049_v0 = vld [vmem:[%s7539_s20 + $0x374] ss:$20 sps:$4 sm:$0xff]  }
  0x8b   : > { %3144 = vmatprep.subr.bf16.mxu1 %v7435_v1 }
  0x8c   : > { %2660 = vmatmul.mubr.bf16.gmra.mxu0 %v6952_v2  ;;  %3044 = vmatmul.mubr.bf16.gmra.mxu1 %v6953_v3  ;;  %v7051_v2 = vld [vmem:[%s7539_s20 + $0xfc] ss:$20 sps:$4 sm:$0xff]  }
  0x8d   : > { %2667 = vmatprep.mubr.bf16.mxu0 %v6955_v4  ;;  %3051 = vmatprep.mubr.bf16.mxu1 %v6957_v5  ;;  %v7053_v3 = vld [vmem:[%s7539_s20 + $0x370] ss:$20 sps:$4 sm:$0xff]   ;;  %v7054_v4 = vld [vmem:[%s7539_s20 + $0xf8] ss:$20 sps:$4 sm:$0xff]  }
  0x8e   : > { %3145 = vmatpush2.bf16.msra.mxu1 %v7004_v6  ;;  %v7055_v5 = vld [vmem:[%s7539_s20 + $0x39c] ss:$20 sps:$4 sm:$0xff]   ;;  %v7057_v6 = vld [vmem:[%s7539_s20 + $0x124] ss:$20 sps:$4 sm:$0xff]  }
  0x8f   : > { %3146 = vmatprep.subr.bf16.mxu1 %v7435_v1  ;;  %v6969_v1 = vld [vmem:[%s7539_s20 + $0x194] ss:$20 sps:$4 sm:$0xff]  }
  0x92   : > { %3147 = vmatpush2.bf16.msra.mxu1 %v7011_v7  ;;  %v7059_v7 = vld [vmem:[%s7539_s20 + $0x398] ss:$20 sps:$4 sm:$0xff]  }
  0x94   : > { %2668 = vmatmul.mubr.bf16.gmra.mxu0 %v6959_v8  ;;  %3052 = vmatmul.mubr.bf16.gmra.mxu1 %v6960_v9  ;;  %v7060_v8 = vld [vmem:[%s7539_s20 + $0x120] ss:$20 sps:$4 sm:$0xff]   ;;  %v7061_v9 = vld [vmem:[%s7539_s20 + $0x3c4] ss:$20 sps:$4 sm:$0xff]  }
  0x95   : > { %2675 = vmatprep.mubr.bf16.mxu0 %v6962_v10  ;;  %3059 = vmatprep.mubr.bf16.mxu1 %v6964_v11  ;;  %v7063_v10 = vld [vmem:[%s7539_s20 + $0x14c] ss:$20 sps:$4 sm:$0xff]  }
  0x96   : > { %v7065_v11 = vld [vmem:[%s7539_s20 + $0x3c0] ss:$20 sps:$4 sm:$0xff]  }
  0x9c   : > { %2676 = vmatmul.mubr.bf16.gmra.mxu0 %v6966_v13  ;;  %3060 = vmatmul.mubr.bf16.gmra.mxu1 %v6967_v14  ;;  %v7068_v13 = vld [vmem:[%s7539_s20 + $0x3ec] ss:$20 sps:$4 sm:$0xff]   ;;  %v7070_v14 = vld [vmem:[%s7539_s20 + $0x174] ss:$20 sps:$4 sm:$0xff]  }
  0x9d   : > { %2683 = vmatprep.mubr.bf16.mxu0 %v6969_v1  ;;  %3067 = vmatprep.mubr.bf16.mxu1 %v6971_v15 }
  0xa4   : > { %2684 = vmatmul.mubr.bf16.gmra.mxu0 %v6973_v16  ;;  %3068 = vmatmul.mubr.bf16.gmra.mxu1 %v6974_v17 }
  0xa5   : > { %2691 = vmatprep.mubr.bf16.mxu0 %v6976_v18  ;;  %3075 = vmatprep.mubr.bf16.mxu1 %v6978_v19 }
  0xac   : > { %2692 = vmatmul.mubr.bf16.gmra.mxu0 %v6980_v20  ;;  %3076 = vmatmul.mubr.bf16.gmra.mxu1 %v6981_v21  ;;  %v7072_v20 = vld [vmem:[%s7539_s20 + $0x3e8] ss:$20 sps:$4 sm:$0xff]   ;;  %v7073_v21 = vld [vmem:[%s7539_s20 + $0x170] ss:$20 sps:$4 sm:$0xff]  }
  0xad   : > { %2699 = vmatprep.mubr.bf16.mxu0 %v6983_v22  ;;  %3083 = vmatprep.mubr.bf16.mxu1 %v6985_v23  ;;  %v7074_v22 = vld [vmem:[%s7539_s20 + $0x414] ss:$20 sps:$4 sm:$0xff]   ;;  %v7076_v23 = vld [vmem:[%s7539_s20 + $0x19c] ss:$20 sps:$4 sm:$0xff]  }
  0xb4   : > { %2700 = vmatmul.mubr.bf16.gmra.mxu0 %v6987_v24  ;;  %3084 = vmatmul.mubr.bf16.gmra.mxu1 %v6988_v25 }
  0xb5   : > { %2707 = vmatprep.mubr.bf16.mxu0 %v6991_v26  ;;  %3091 = vmatprep.mubr.bf16.mxu1 %v6993_v27 }
  0xbc   : > { %2708 = vmatmul.mubr.bf16.gmra.mxu0 %v6995_v28  ;;  %3092 = vmatmul.mubr.bf16.gmra.mxu1 %v6996_v29 }
  0xbd   : > { %2715 = vmatprep.mubr.bf16.mxu0 %v6998_v30  ;;  %3099 = vmatprep.mubr.bf16.mxu1 %v7000_v31 }
  0xc4   : > { %2716 = vmatmul.mubr.bf16.gmra.mxu0 %v7002_v32  ;;  %3100 = vmatmul.mubr.bf16.gmra.mxu1 %v7003_v33  ;;  %v7078_v32 = vld [vmem:[%s7539_s20 + $0x410] ss:$20 sps:$4 sm:$0xff]   ;;  %v7079_v33 = vld [vmem:[%s7539_s20 + $0x198] ss:$20 sps:$4 sm:$0xff]  }
  0xc5   : > { %2723 = vmatprep.mubr.bf16.mxu0 %v7005_v34  ;;  %3107 = vmatprep.mubr.bf16.mxu1 %v7007_v35  ;;  %v7080_v34 = vld [vmem:[%s7539_s20 + $0x43c] ss:$20 sps:$4 sm:$0xff]   ;;  %v7082_v35 = vld [vmem:[%s7539_s20 + $0x1c4] ss:$20 sps:$4 sm:$0xff]  }
  0xcc   : > { %2724 = vmatmul.mubr.bf16.gmra.mxu0 %v7009_v37  ;;  %3108 = vmatmul.mubr.bf16.gmra.mxu1 %v7010_v38 }
  0xcd   : > { %2731 = vmatprep.mubr.bf16.mxu0 %v7012_v39  ;;  %3148 = vmatprep.mubr.bf16.mxu1 %v7016_v40  ;;  %v7178_v40 = vld [vmem:[%s9226_s1 + $0x100] sm:$0xff]  }
  0xce   : > { %6676 = vmatprep.subr.bf16.mxu0 %v7178_v40 }
  0xcf   : > { %6677 = vmatpush3.bf16.msra.mxu0 %v7178_v40  ;;  %v7108_v40 = vld [vmem:[%s7539_s20 + $0x260] ss:$20 sps:$4 sm:$0xff]  }
  0xd4   : > { %2732 = vmatmul.mubr.bf16.gmra.mxu0 %v7017_v42  ;;  %3149 = vmatmul.mubr.bf16.vlgmr.msra.gmra.mxu1 %v7014_v41 }
  0xd5   : > { %2739 = vmatprep.mubr.bf16.mxu0 %v7018_v43  ;;  %3156 = vmatprep.mubr.bf16.mxu1 %v7020_v44 }
  0xdc   : > { %2740 = vmatmul.mubr.bf16.gmra.mxu0 %v7022_v45  ;;  %3157 = vmatmul.mubr.bf16.gmra.mxu1 %v7023_v46  ;;  %v7084_v45 = vld [vmem:[%s7539_s20 + $0x438] ss:$20 sps:$4 sm:$0xff]   ;;  %v7085_v46 = vld [vmem:[%s7539_s20 + $0x1c0] ss:$20 sps:$4 sm:$0xff]  }
  0xdd   : > { %2747 = vmatprep.mubr.bf16.mxu0 %v7024_v47  ;;  %3164 = vmatprep.mubr.bf16.mxu1 %v7026_v48  ;;  %v7088_v47 = vld [vmem:[%s7539_s20 + $0x464] ss:$20 sps:$4 sm:$0xff]   ;;  %v7091_v48 = vld [vmem:[%s7539_s20 + $0x1ec] ss:$20 sps:$4 sm:$0xff]  }
  0xe4   : > { %2748 = vmatmul.mubr.bf16.gmra.mxu0 %v7028_v49  ;;  %3165 = vmatmul.mubr.bf16.gmra.mxu1 %v7029_v50 }
  0xe5   : > { %2755 = vmatprep.mubr.bf16.mxu0 %v7031_v51  ;;  %3172 = vmatprep.mubr.bf16.mxu1 %v7033_v52 }
  0xec   : > { %2756 = vmatmul.mubr.bf16.gmra.mxu0 %v7035_v53  ;;  %3173 = vmatmul.mubr.bf16.gmra.mxu1 %v7036_v54 }
  0xed   : > { %2763 = vmatprep.mubr.bf16.mxu0 %v7037_v55  ;;  %3180 = vmatprep.mubr.bf16.mxu1 %v7039_v56 }
  0xf4   : > { %2764 = vmatmul.mubr.bf16.gmra.mxu0 %v7041_v57  ;;  %3181 = vmatmul.mubr.bf16.gmra.mxu1 %v7042_v58  ;;  %v7086_v57 = vld [vmem:[%s7539_s20 + $0x460] ss:$20 sps:$4 sm:$0xff]   ;;  %v7089_v58 = vld [vmem:[%s7539_s20 + $0x1e8] ss:$20 sps:$4 sm:$0xff]  }
  0xf5   : > { %2771 = vmatprep.mubr.bf16.mxu0 %v7043_v59  ;;  %3188 = vmatprep.mubr.bf16.mxu1 %v7045_v60  ;;  %v7094_v59 = vld [vmem:[%s7539_s20 + $0x48c] ss:$20 sps:$4 sm:$0xff]   ;;  %v7097_v60 = vld [vmem:[%s7539_s20 + $0x214] ss:$20 sps:$4 sm:$0xff]  }
  0xfc   : > { %2772 = vmatmul.mubr.bf16.gmra.mxu0 %v7047_v62  ;;  %3189 = vmatmul.mubr.bf16.gmra.mxu1 %v7048_v63 }
  0xfd   : > { %2779 = vmatprep.mubr.bf16.mxu0 %v7049_v0  ;;  %3196 = vmatprep.mubr.bf16.mxu1 %v7051_v2 }
 0x104   : > { %2780 = vmatmul.mubr.bf16.gmra.mxu0 %v7053_v3  ;;  %3197 = vmatmul.mubr.bf16.gmra.mxu1 %v7054_v4 }
 0x105   : > { %2787 = vmatprep.mubr.bf16.mxu0 %v7055_v5  ;;  %3204 = vmatprep.mubr.bf16.mxu1 %v7057_v6  ;;  %v7092_v6 = vld [vmem:[%s7539_s20 + $0x488] ss:$20 sps:$4 sm:$0xff]  }
 0x10c   : > { %2788 = vmatmul.mubr.bf16.gmra.mxu0 %v7059_v7  ;;  %3205 = vmatmul.mubr.bf16.gmra.mxu1 %v7060_v8  ;;  %v7095_v7 = vld [vmem:[%s7539_s20 + $0x210] ss:$20 sps:$4 sm:$0xff]   ;;  %v7100_v8 = vld [vmem:[%s7539_s20 + $0x4b4] ss:$20 sps:$4 sm:$0xff]  }
 0x10d   : > { %2795 = vmatprep.mubr.bf16.mxu0 %v7061_v9  ;;  %3212 = vmatprep.mubr.bf16.mxu1 %v7063_v10  ;;  %v7103_v9 = vld [vmem:[%s7539_s20 + $0x23c] ss:$20 sps:$4 sm:$0xff]  }
 0x114   : > { %v7785_v1 = vpop.f32.mrf.mxu0  ;;  %2796 = vmatmul.mubr.bf16.gmra.mxu0 %v7065_v11  ;;  %v7787_v15 = vpop.f32.mrf.mxu1  ;;  %3213 = vmatmul.mubr.bf16.gmra.mxu1 %v7066_v12 }
 0x115   : > { %9232 = vst [vmem:[#allocation5_spill] sm:$0xff] %v7787_v15  ;;  %2803 = vmatprep.mubr.bf16.mxu0 %v7068_v13  ;;  %3220 = vmatprep.mubr.bf16.mxu1 %v7070_v14 }
 0x116   : > { %v2607_v16 = vpop.f32.mrf.mxu0  ;;  %v2991_v17 = vpop.f32.mrf.mxu1 }
 0x118   : > { %v7789_v18 = vpop.f32.mrf.mxu0  ;;  %v7791_v19 = vpop.f32.mrf.mxu1 }
 0x119   : > { %9233 = vst [vmem:[#allocation6_spill] sm:$0xff] %v7791_v19  ;;  %v7194_v19 = vld [vmem:[%s7539_s20 + $0x490] ss:$20 sps:$4 sm:$0xff]  }
 0x11a   : > { %v2610_v24 = vpop.f32.mrf.mxu0  ;;  %v2994_v25 = vpop.f32.mrf.mxu1 }
 0x11b   : > { %v7110_v24 = vld [vmem:[%s7539_s20 + $0x264] ss:$20 sps:$4 sm:$0xff]  }
 0x11c   : > { %v7797_v26 = vpop.f32.mrf.mxu0  ;;  %2804 = vmatmul.mubr.bf16.gmra.mxu0 %v7072_v20  ;;  %v7799_v27 = vpop.f32.mrf.mxu1  ;;  %3221 = vmatmul.mubr.bf16.gmra.mxu1 %v7073_v21  ;;  %v7098_v21 = vld [vmem:[%s7539_s20 + $0x4b0] ss:$20 sps:$4 sm:$0xff]  }
 0x11d   : > { %9234 = vst [vmem:[#allocation7_spill] sm:$0xff] %v7799_v27  ;;  %2811 = vmatprep.mubr.bf16.mxu0 %v7074_v22  ;;  %3228 = vmatprep.mubr.bf16.mxu1 %v7076_v23  ;;  %v7101_v22 = vld [vmem:[%s7539_s20 + $0x238] ss:$20 sps:$4 sm:$0xff]   ;;  %v7107_v23 = vld [vmem:[%s7539_s20 + $0x4dc] ss:$20 sps:$4 sm:$0xff]  }
 0x11e   : > { %v2615_v28 = vpop.f32.mrf.mxu0  ;;  %v2999_v29 = vpop.f32.mrf.mxu1 }
 0x120   : > { %v7801_v30 = vpop.f32.mrf.mxu0  ;;  %v7803_v31 = vpop.f32.mrf.mxu1 }
 0x121   : > { %9235 = vst [vmem:[#allocation8_spill] sm:$0xff] %v7803_v31  ;;  %v7191_v31 = vld [vmem:[%s7539_s20 + $0x708] ss:$20 sps:$4 sm:$0xff]  }
 0x122   : > { %v2618_v36 = vpop.f32.mrf.mxu0  ;;  %v3002_v37 = vpop.f32.mrf.mxu1 }
 0x123   : > { %v7105_v37 = vld [vmem:[%s7539_s20 + $0x4d8] ss:$20 sps:$4 sm:$0xff]  }
 0x124   : > { %v7809_v38 = vpop.f32.mrf.mxu0  ;;  %2812 = vmatmul.mubr.bf16.gmra.mxu0 %v7078_v32  ;;  %v7811_v39 = vpop.f32.mrf.mxu1  ;;  %3229 = vmatmul.mubr.bf16.gmra.mxu1 %v7079_v33 }
 0x125   : > { %9236 = vst [vmem:[#allocation9_spill] sm:$0xff] %v7811_v39  ;;  %2819 = vmatprep.mubr.bf16.mxu0 %v7080_v34  ;;  %3236 = vmatprep.mubr.bf16.mxu1 %v7082_v35 }
 0x126   : > { %v2623_v41 = vpop.f32.mrf.mxu0  ;;  %v3007_v42 = vpop.f32.mrf.mxu1 }
 0x127   : > { %v7113_v41 = vld [vmem:[%s7539_s20 + $0x504] ss:$20 sps:$4 sm:$0xff]   ;;  %v7116_v42 = vld [vmem:[%s7539_s20 + $0x28c] ss:$20 sps:$4 sm:$0xff]  }
 0x128   : > { %v7816_v43 = vpop.f32.mrf.mxu0  ;;  %v7818_v44 = vpop.f32.mrf.mxu1 }
 0x129   : > { %9237 = vst [vmem:[#allocation10_spill] sm:$0xff] %v7818_v44  ;;  %v7188_v44 = vld [vmem:[%s7539_s20 + $0x468] ss:$20 sps:$4 sm:$0xff]  }
 0x12a   : > { %v2626_v49 = vpop.f32.mrf.mxu0  ;;  %v3010_v50 = vpop.f32.mrf.mxu1 }
 0x12c   : > { %v7824_v51 = vpop.f32.mrf.mxu0  ;;  %2820 = vmatmul.mubr.bf16.gmra.mxu0 %v7084_v45  ;;  %v7826_v52 = vpop.f32.mrf.mxu1  ;;  %3237 = vmatmul.mubr.bf16.gmra.mxu1 %v7085_v46 }
 0x12d   : > { %9238 = vst [vmem:[#allocation11_spill] sm:$0xff] %v7826_v52  ;;  %2827 = vmatprep.mubr.bf16.mxu0 %v7088_v47  ;;  %3244 = vmatprep.mubr.bf16.mxu1 %v7091_v48 }
 0x12e   : > { %v2631_v53 = vpop.f32.mrf.mxu0  ;;  %v3015_v54 = vpop.f32.mrf.mxu1 }
 0x130   : > { %v7828_v55 = vpop.f32.mrf.mxu0  ;;  %v7830_v56 = vpop.f32.mrf.mxu1 }
 0x131   : > { %9239 = vst [vmem:[#allocation12_spill] sm:$0xff] %v7830_v56  ;;  %v7185_v56 = vld [vmem:[%s7539_s20 + $0x6e0] ss:$20 sps:$4 sm:$0xff]  }
 0x132   : > { %v2634_v61 = vpop.f32.mrf.mxu0  ;;  %v3018_v62 = vpop.f32.mrf.mxu1 }
 0x134   : > { %v7836_v63 = vpop.f32.mrf.mxu0  ;;  %2828 = vmatmul.mubr.bf16.gmra.mxu0 %v7086_v57  ;;  %v7838_v0 = vpop.f32.mrf.mxu1  ;;  %3245 = vmatmul.mubr.bf16.gmra.mxu1 %v7089_v58  ;;  %v7111_v57 = vld [vmem:[%s7539_s20 + $0x500] ss:$20 sps:$4 sm:$0xff]   ;;  %v7114_v58 = vld [vmem:[%s7539_s20 + $0x288] ss:$20 sps:$4 sm:$0xff]  }
 0x135   : > { %9240 = vst [vmem:[#allocation13_spill] sm:$0xff] %v7838_v0  ;;  %2835 = vmatprep.mubr.bf16.mxu0 %v7094_v59  ;;  %3252 = vmatprep.mubr.bf16.mxu1 %v7097_v60  ;;  %v7119_v59 = vld [vmem:[%s7539_s20 + $0x52c] ss:$20 sps:$4 sm:$0xff]   ;;  %v7122_v60 = vld [vmem:[%s7539_s20 + $0x2b4] ss:$20 sps:$4 sm:$0xff]  }
 0x136   : > { %v2639_v2 = vpop.f32.mrf.mxu0  ;;  %v3023_v3 = vpop.f32.mrf.mxu1 }
 0x138   : > { %v7840_v4 = vpop.f32.mrf.mxu0  ;;  %v7842_v5 = vpop.f32.mrf.mxu1 }
 0x139   : > { %9241 = vst [vmem:[#allocation14_spill] sm:$0xff] %v7842_v5  ;;  %v7182_v5 = vld [vmem:[%s7539_s20 + $0x440] ss:$20 sps:$4 sm:$0xff]  }
 0x13a   : > { %v2642_v10 = vpop.f32.mrf.mxu0  ;;  %v3026_v11 = vpop.f32.mrf.mxu1 }
 0x13b   : > { %v7117_v10 = vld [vmem:[%s7539_s20 + $0x528] ss:$20 sps:$4 sm:$0xff]   ;;  %v7120_v11 = vld [vmem:[%s7539_s20 + $0x2b0] ss:$20 sps:$4 sm:$0xff]  }
 0x13c   : > { %v7848_v12 = vpop.f32.mrf.mxu0  ;;  %2836 = vmatmul.mubr.bf16.gmra.mxu0 %v7092_v6  ;;  %v7850_v13 = vpop.f32.mrf.mxu1  ;;  %3253 = vmatmul.mubr.bf16.gmra.mxu1 %v7095_v7 }
 0x13d   : > { %9242 = vst [vmem:[#allocation15_spill] sm:$0xff] %v7850_v13  ;;  %2843 = vmatprep.mubr.bf16.mxu0 %v7100_v8  ;;  %3260 = vmatprep.mubr.bf16.mxu1 %v7103_v9 }
 0x13e   : > { %v2647_v14 = vpop.f32.mrf.mxu0  ;;  %v3031_v16 = vpop.f32.mrf.mxu1 }
 0x13f   : > { %v7125_v14 = vld [vmem:[%s7539_s20 + $0x554] ss:$20 sps:$4 sm:$0xff]   ;;  %v7128_v16 = vld [vmem:[%s7539_s20 + $0x2dc] ss:$20 sps:$4 sm:$0xff]  }
 0x140   : > { %v7852_v17 = vpop.f32.mrf.mxu0  ;;  %v7854_v20 = vpop.f32.mrf.mxu1 }
 0x141   : > { %9243 = vst [vmem:[#allocation16_spill] sm:$0xff] %v7854_v20  ;;  %v7179_v20 = vld [vmem:[%s7539_s20 + $0x6b8] ss:$20 sps:$4 sm:$0xff]  }
 0x142   : > { %v2650_v25 = vpop.f32.mrf.mxu0  ;;  %v3034_v28 = vpop.f32.mrf.mxu1 }
 0x144   : > { %v7860_v29 = vpop.f32.mrf.mxu0  ;;  %2844 = vmatmul.mubr.bf16.gmra.mxu0 %v7098_v21  ;;  %v7862_v32 = vpop.f32.mrf.mxu1  ;;  %3261 = vmatmul.mubr.bf16.gmra.mxu1 %v7101_v22 }
 0x145   : > { %9244 = vst [vmem:[#allocation17_spill] sm:$0xff] %v7862_v32  ;;  %2851 = vmatprep.mubr.bf16.mxu0 %v7107_v23  ;;  %3268 = vmatprep.mubr.bf16.mxu1 %v7110_v24 }
 0x146   : > { %v2655_v33 = vpop.f32.mrf.mxu0  ;;  %v3039_v34 = vpop.f32.mrf.mxu1 }
 0x148   : > { %v7864_v35 = vpop.f32.mrf.mxu0  ;;  %v7866_v36 = vpop.f32.mrf.mxu1 }
 0x149   : > { %9245 = vst [vmem:[#allocation18_spill] sm:$0xff] %v7866_v36  ;;  %v7175_v36 = vld [vmem:[%s7539_s20 + $0x418] ss:$20 sps:$4 sm:$0xff]  }
 0x14a   : > { %v2658_v45 = vpop.f32.mrf.mxu0  ;;  %v3042_v46 = vpop.f32.mrf.mxu1 }
 0x14c   : > { %v7872_v47 = vpop.f32.mrf.mxu0  ;;  %2852 = vmatmul.mubr.bf16.gmra.mxu0 %v7105_v37  ;;  %v7874_v48 = vpop.f32.mrf.mxu1  ;;  %3269 = vmatmul.mubr.bf16.gmra.mxu1 %v7108_v40  ;;  %v7123_v37 = vld [vmem:[%s7539_s20 + $0x550] ss:$20 sps:$4 sm:$0xff]   ;;  %v7126_v40 = vld [vmem:[%s7539_s20 + $0x2d8] ss:$20 sps:$4 sm:$0xff]  }
 0x14d   : > { %9246 = vst [vmem:[#allocation19_spill] sm:$0xff] %v7874_v48  ;;  %2859 = vmatprep.mubr.bf16.mxu0 %v7113_v41  ;;  %3276 = vmatprep.mubr.bf16.mxu1 %v7116_v42  ;;  %v7131_v41 = vld [vmem:[%s7539_s20 + $0x57c] ss:$20 sps:$4 sm:$0xff]   ;;  %v7134_v42 = vld [vmem:[%s7539_s20 + $0x304] ss:$20 sps:$4 sm:$0xff]  }
 0x14e   : > { %v2663_v49 = vpop.f32.mrf.mxu0  ;;  %v3047_v50 = vpop.f32.mrf.mxu1 }
 0x150   : > { %v7876_v53 = vpop.f32.mrf.mxu0  ;;  %v7878_v54 = vpop.f32.mrf.mxu1 }
 0x151   : > { %9247 = vst [vmem:[#allocation20_spill] sm:$0xff] %v7878_v54  ;;  %v7172_v54 = vld [vmem:[%s7539_s20 + $0x690] ss:$20 sps:$4 sm:$0xff]  }
 0x152   : > { %v2666_v61 = vpop.f32.mrf.mxu0  ;;  %v3050_v62 = vpop.f32.mrf.mxu1 }
 0x153   : > { %v7129_v61 = vld [vmem:[%s7539_s20 + $0x578] ss:$20 sps:$4 sm:$0xff]   ;;  %v7132_v62 = vld [vmem:[%s7539_s20 + $0x300] ss:$20 sps:$4 sm:$0xff]  }
 0x154   : > { %v7884_v2 = vpop.f32.mrf.mxu0  ;;  %2860 = vmatmul.mubr.bf16.gmra.mxu0 %v7111_v57  ;;  %v7886_v3 = vpop.f32.mrf.mxu1  ;;  %3277 = vmatmul.mubr.bf16.gmra.mxu1 %v7114_v58 }
 0x155   : > { %9248 = vst [vmem:[#allocation21_spill] sm:$0xff] %v7886_v3  ;;  %2867 = vmatprep.mubr.bf16.mxu0 %v7119_v59  ;;  %3284 = vmatprep.mubr.bf16.mxu1 %v7122_v60 }
 0x156   : > { %v2671_v6 = vpop.f32.mrf.mxu0  ;;  %v3055_v7 = vpop.f32.mrf.mxu1 }
 0x157   : > { %v7137_v6 = vld [vmem:[%s7539_s20 + $0x5a4] ss:$20 sps:$4 sm:$0xff]   ;;  %v7140_v7 = vld [vmem:[%s7539_s20 + $0x32c] ss:$20 sps:$4 sm:$0xff]  }
 0x158   : > { %v7888_v8 = vpop.f32.mrf.mxu0  ;;  %v7890_v9 = vpop.f32.mrf.mxu1 }
 0x159   : > { %9249 = vst [vmem:[#allocation22_spill] sm:$0xff] %v7890_v9  ;;  %v7169_v9 = vld [vmem:[%s7539_s20 + $0x3f0] ss:$20 sps:$4 sm:$0xff]  }
 0x15a   : > { %v2674_v21 = vpop.f32.mrf.mxu0  ;;  %v3058_v22 = vpop.f32.mrf.mxu1 }
 0x15c   : > { %v7896_v23 = vpop.f32.mrf.mxu0  ;;  %2868 = vmatmul.mubr.bf16.gmra.mxu0 %v7117_v10  ;;  %v7898_v24 = vpop.f32.mrf.mxu1  ;;  %3285 = vmatmul.mubr.bf16.gmra.mxu1 %v7120_v11 }
 0x15d   : > { %9250 = vst [vmem:[#allocation23_spill] sm:$0xff] %v7898_v24  ;;  %2875 = vmatprep.mubr.bf16.mxu0 %v7125_v14  ;;  %3292 = vmatprep.mubr.bf16.mxu1 %v7128_v16 }
 0x15e   : > { %v2679_v25 = vpop.f32.mrf.mxu0  ;;  %v3063_v28 = vpop.f32.mrf.mxu1 }
 0x160   : > { %v7900_v33 = vpop.f32.mrf.mxu0  ;;  %v7902_v34 = vpop.f32.mrf.mxu1 }
 0x161   : > { %9251 = vst [vmem:[#allocation24_spill] sm:$0xff] %v7902_v34 }
 0x162   : > { %v2682_v45 = vpop.f32.mrf.mxu0  ;;  %v3066_v46 = vpop.f32.mrf.mxu1 }
 0x164   : > { %v7908_v49 = vpop.f32.mrf.mxu0  ;;  %2876 = vmatmul.mubr.bf16.gmra.mxu0 %v7123_v37  ;;  %v7910_v50 = vpop.f32.mrf.mxu1  ;;  %3293 = vmatmul.mubr.bf16.gmra.mxu1 %v7126_v40  ;;  %v7135_v37 = vld [vmem:[%s7539_s20 + $0x5a0] ss:$20 sps:$4 sm:$0xff]   ;;  %v7138_v40 = vld [vmem:[%s7539_s20 + $0x328] ss:$20 sps:$4 sm:$0xff]  }
 0x165   : > { %9252 = vst [vmem:[#allocation25_spill] sm:$0xff] %v7910_v50  ;;  %2883 = vmatprep.mubr.bf16.mxu0 %v7131_v41  ;;  %3300 = vmatprep.mubr.bf16.mxu1 %v7134_v42  ;;  %v7144_v41 = vld [vmem:[%s7539_s20 + $0x5cc] ss:$20 sps:$4 sm:$0xff]   ;;  %v7147_v42 = vld [vmem:[%s7539_s20 + $0x354] ss:$20 sps:$4 sm:$0xff]  }
 0x166   : > { %v2687_v57 = vpop.f32.mrf.mxu0  ;;  %v3071_v58 = vpop.f32.mrf.mxu1 }
 0x168   : > { %v7912_v59 = vpop.f32.mrf.mxu0  ;;  %v7914_v60 = vpop.f32.mrf.mxu1 }
 0x169   : > { %9253 = vst [vmem:[#allocation26_spill] sm:$0xff] %v7914_v60  ;;  %v7157_v60 = vld [vmem:[%s7539_s20 + $0x3a0] ss:$20 sps:$4 sm:$0xff]  }
 0x16a   : > { %v2690_v10 = vpop.f32.mrf.mxu0  ;;  %v3074_v11 = vpop.f32.mrf.mxu1 }
 0x16b   : > { %v7142_v10 = vld [vmem:[%s7539_s20 + $0x5c8] ss:$20 sps:$4 sm:$0xff]   ;;  %v7145_v11 = vld [vmem:[%s7539_s20 + $0x350] ss:$20 sps:$4 sm:$0xff]  }
 0x16c   : > { %v7920_v14 = vpop.f32.mrf.mxu0  ;;  %2884 = vmatmul.mubr.bf16.gmra.mxu0 %v7129_v61  ;;  %v7922_v16 = vpop.f32.mrf.mxu1  ;;  %3301 = vmatmul.mubr.bf16.gmra.mxu1 %v7132_v62 }
 0x16d   : > { %9254 = vst [vmem:[#allocation27_spill] sm:$0xff] %v7922_v16  ;;  %2891 = vmatprep.mubr.bf16.mxu0 %v7137_v6  ;;  %3308 = vmatprep.mubr.bf16.mxu1 %v7140_v7  ;;  %v7163_v16 = vld [vmem:[%s7539_s20 + $0x3c8] ss:$20 sps:$4 sm:$0xff]  }
 0x16e   : > { %v2695_v21 = vpop.f32.mrf.mxu0  ;;  %v3079_v22 = vpop.f32.mrf.mxu1 }
 0x16f   : > { %v7150_v21 = vld [vmem:[%s7539_s20 + $0x5f4] ss:$20 sps:$4 sm:$0xff]   ;;  %v7153_v22 = vld [vmem:[%s7539_s20 + $0x37c] ss:$20 sps:$4 sm:$0xff]  }
 0x170   : > { %v7924_v25 = vpop.f32.mrf.mxu0  ;;  %v7926_v28 = vpop.f32.mrf.mxu1 }
 0x171   : > { %9255 = vst [vmem:[#allocation28_spill] sm:$0xff] %v7926_v28 }
 0x172   : > { %v2698_v45 = vpop.f32.mrf.mxu0  ;;  %v3082_v46 = vpop.f32.mrf.mxu1 }
 0x174   : > { %v7932_v57 = vpop.f32.mrf.mxu0  ;;  %2892 = vmatmul.mubr.bf16.gmra.mxu0 %v7135_v37  ;;  %v7934_v58 = vpop.f32.mrf.mxu1  ;;  %3309 = vmatmul.mubr.bf16.gmra.mxu1 %v7138_v40 }
 0x175   : > { %9256 = vst [vmem:[#allocation29_spill] sm:$0xff] %v7932_v57  ;;  %9257 = vst [vmem:[#allocation30_spill] sm:$0xff] %v7934_v58  ;;  %2899 = vmatprep.mubr.bf16.mxu0 %v7144_v41  ;;  %3316 = vmatprep.mubr.bf16.mxu1 %v7147_v42  ;;  %v7151_v58 = vld [vmem:[%s7539_s20 + $0x378] ss:$20 sps:$4 sm:$0xff]  }
 0x176   : > { %v2703_v61 = vpop.f32.mrf.mxu0  ;;  %v3087_v62 = vpop.f32.mrf.mxu1 }
 0x178   : > { %v7936_v6 = vpop.f32.mrf.mxu0  ;;  %v7938_v7 = vpop.f32.mrf.mxu1 }
 0x179   : > { %9258 = vst [vmem:[#allocation31_spill] sm:$0xff] %v7936_v6  ;;  %9259 = vst [vmem:[#allocation32_spill] sm:$0xff] %v7938_v7  ;;  %v7148_v7 = vld [vmem:[%s7539_s20 + $0x5f0] ss:$20 sps:$4 sm:$0xff]   ;;  %v7238_v6 = vld [vmem:[%s7539_s20 + $0x1c8] ss:$20 sps:$4 sm:$0xff]  }
 0x17a   : > { %v2706_v37 = vpop.f32.mrf.mxu0  ;;  %v3090_v45 = vpop.f32.mrf.mxu1 }
 0x17b   : > { %v7156_v37 = vld [vmem:[%s7539_s20 + $0x61c] ss:$20 sps:$4 sm:$0xff]   ;;  %v7159_v45 = vld [vmem:[%s7539_s20 + $0x3a4] ss:$20 sps:$4 sm:$0xff]  }
 0x17c   : > { %v7944_v46 = vpop.f32.mrf.mxu0  ;;  %2900 = vmatmul.mubr.bf16.gmra.mxu0 %v7142_v10  ;;  %v7946_v40 = vpop.f32.mrf.mxu1  ;;  %3317 = vmatmul.mubr.bf16.gmra.mxu1 %v7145_v11 }
 0x17d   : > { %9260 = vst [vmem:[#allocation33_spill] sm:$0xff] %v7944_v46  ;;  %9261 = vst [vmem:[#allocation34_spill] sm:$0xff] %v7946_v40  ;;  %2907 = vmatprep.mubr.bf16.mxu0 %v7150_v21  ;;  %3324 = vmatprep.mubr.bf16.mxu1 %v7153_v22  ;;  %v7337_v46 = vld [vmem:[%s7539_s20 + $0x7e0] ss:$20 sps:$4 sm:$0xff]  }
 0x17e   : > { %v2711_v41 = vpop.f32.mrf.mxu0  ;;  %v3095_v42 = vpop.f32.mrf.mxu1 }
 0x180   : > { %v7948_v61 = vpop.f32.mrf.mxu0  ;;  %v7950_v62 = vpop.f32.mrf.mxu1 }
 0x181   : > { %9262 = vst [vmem:[#allocation35_spill] sm:$0xff] %v7948_v61  ;;  %9263 = vst [vmem:[#allocation36_spill] sm:$0xff] %v7950_v62  ;;  %v7154_v62 = vld [vmem:[%s7539_s20 + $0x618] ss:$20 sps:$4 sm:$0xff]  }
 0x182   : > { %v2714_v10 = vpop.f32.mrf.mxu0  ;;  %v3098_v28 = vpop.f32.mrf.mxu1 }
 0x183   : > { %v7162_v10 = vld [vmem:[%s7539_s20 + $0x644] ss:$20 sps:$4 sm:$0xff]   ;;  %v7165_v28 = vld [vmem:[%s7539_s20 + $0x3cc] ss:$20 sps:$4 sm:$0xff]  }
 0x184   : > { %v7956_v40 = vpop.f32.mrf.mxu0  ;;  %2908 = vmatmul.mubr.bf16.gmra.mxu0 %v7148_v7  ;;  %v7958_v11 = vpop.f32.mrf.mxu1  ;;  %3325 = vmatmul.mubr.bf16.gmra.mxu1 %v7151_v58 }
 0x185   : > { %9264 = vst [vmem:[#allocation37_spill] sm:$0xff] %v7956_v40  ;;  %9265 = vst [vmem:[#allocation38_spill] sm:$0xff] %v7958_v11  ;;  %2915 = vmatprep.mubr.bf16.mxu0 %v7156_v37  ;;  %3332 = vmatprep.mubr.bf16.mxu1 %v7159_v45 }
 0x186   : > { %v2719_v21 = vpop.f32.mrf.mxu0  ;;  %v3103_v22 = vpop.f32.mrf.mxu1 }
 0x188   : > { %v7960_v41 = vpop.f32.mrf.mxu0  ;;  %v7962_v42 = vpop.f32.mrf.mxu1 }
 0x189   : > { %9266 = vst [vmem:[#allocation39_spill] sm:$0xff] %v7960_v41  ;;  %9267 = vst [vmem:[#allocation40_spill] sm:$0xff] %v7962_v42  ;;  %v7160_v42 = vld [vmem:[%s7539_s20 + $0x640] ss:$20 sps:$4 sm:$0xff]   ;;  %v7228_v41 = vld [vmem:[%s7539_s20 + $0x128] ss:$20 sps:$4 sm:$0xff]  }
 0x18a   : > { %v2722_v7 = vpop.f32.mrf.mxu0  ;;  %v3106_v50 = vpop.f32.mrf.mxu1 }
 0x18b   : > { %v7168_v7 = vld [vmem:[%s7539_s20 + $0x66c] ss:$20 sps:$4 sm:$0xff]   ;;  %v7171_v50 = vld [vmem:[%s7539_s20 + $0x3f4] ss:$20 sps:$4 sm:$0xff]  }
 0x18c   : > { %v7968_v11 = vpop.f32.mrf.mxu0  ;;  %2916 = vmatmul.mubr.bf16.gmra.mxu0 %v7154_v62  ;;  %v7970_v58 = vpop.f32.mrf.mxu1  ;;  %3333 = vmatmul.mubr.bf16.gmra.mxu1 %v7157_v60 }
 0x18d   : > { %9268 = vst [vmem:[#allocation41_spill] sm:$0xff] %v7968_v11  ;;  %9269 = vst [vmem:[#allocation42_spill] sm:$0xff] %v7970_v58  ;;  %2923 = vmatprep.mubr.bf16.mxu0 %v7162_v10  ;;  %3340 = vmatprep.mubr.bf16.mxu1 %v7165_v28  ;;  %v7233_v11 = vld [vmem:[%s7539_s20 + $0x178] ss:$20 sps:$4 sm:$0xff]  }
 0x18e   : > { %v2727_v37 = vpop.f32.mrf.mxu0  ;;  %v3111_v45 = vpop.f32.mrf.mxu1 }
 0x190   : > { %v7972_v21 = vpop.f32.mrf.mxu0  ;;  %v7974_v22 = vpop.f32.mrf.mxu1 }
 0x191   : > { %9270 = vst [vmem:[#allocation43_spill] sm:$0xff] %v7972_v21  ;;  %9271 = vst [vmem:[#allocation44_spill] sm:$0xff] %v7974_v22  ;;  %v7166_v22 = vld [vmem:[%s7539_s20 + $0x668] ss:$20 sps:$4 sm:$0xff]  }
 0x192   : > { %v2730_v62 = vpop.f32.mrf.mxu0  ;;  %v3114_v34 = vpop.f32.mrf.mxu1 }
 0x193   : > { %v7174_v62 = vld [vmem:[%s7539_s20 + $0x694] ss:$20 sps:$4 sm:$0xff]   ;;  %v7177_v34 = vld [vmem:[%s7539_s20 + $0x41c] ss:$20 sps:$4 sm:$0xff]  }
 0x194   : > { %v7980_v58 = vpop.f32.mrf.mxu0  ;;  %2924 = vmatmul.mubr.bf16.gmra.mxu0 %v7160_v42  ;;  %v7982_v60 = vpop.f32.mrf.mxu1  ;;  %3341 = vmatmul.mubr.bf16.gmra.mxu1 %v7163_v16 }
 0x195   : > { %9272 = vst [vmem:[#allocation45_spill] sm:$0xff] %v7980_v58  ;;  %2931 = vmatprep.mubr.bf16.mxu0 %v7168_v7  ;;  %3348 = vmatprep.mubr.bf16.mxu1 %v7171_v50 }
 0x196   : > { %v2735_v10 = vpop.f32.mrf.mxu0  ;;  %v3152_v28 = vpop.f32.mrf.mxu1 }
 0x198   : > { %v7984_v37 = vpop.f32.mrf.mxu0  ;;  %v7986_v45 = vpop.f32.mrf.mxu1 }
 0x199   : > { %9273 = vst [vmem:[#allocation46_spill] sm:$0xff] %v7984_v37  ;;  %v7218_v37 = vld [vmem:[%s7539_s20 + $0x88] ss:$20 sps:$4 sm:$0xff]  }
 0x19a   : > { %v2738_v42 = vpop.f32.mrf.mxu0  ;;  %v3155_v3 = vpop.f32.mrf.mxu1 }
 0x19b   : > { %v7181_v42 = vld [vmem:[%s7539_s20 + $0x6bc] ss:$20 sps:$4 sm:$0xff]   ;;  %v7184_v3 = vld [vmem:[%s7539_s20 + $0x444] ss:$20 sps:$4 sm:$0xff]  }
 0x19c   : > { %v7992_v24 = vpop.f32.mrf.mxu0  ;;  %2932 = vmatmul.mubr.bf16.gmra.mxu0 %v7166_v22  ;;  %v7994_v16 = vpop.f32.mrf.mxu1  ;;  %3349 = vmatmul.mubr.bf16.gmra.mxu1 %v7169_v9 }
 0x19d   : > { %9274 = vst [vmem:[#allocation47_spill] sm:$0xff] %v7992_v24  ;;  %2939 = vmatprep.mubr.bf16.mxu0 %v7174_v62  ;;  %3356 = vmatprep.mubr.bf16.mxu1 %v7177_v34  ;;  %v7223_v24 = vld [vmem:[%s7539_s20 + $0xd8] ss:$20 sps:$4 sm:$0xff]  }
 0x19e   : > { %v2743_v7 = vpop.f32.mrf.mxu0  ;;  %v3160_v50 = vpop.f32.mrf.mxu1 }
 0x1a0   : > { %v7996_v10 = vpop.f32.mrf.mxu0  ;;  %v7998_v28 = vpop.f32.mrf.mxu1 }
 0x1a1   : > { %9275 = vst [vmem:[#allocation48_spill] sm:$0xff] %v7996_v10 }
 0x1a2   : > { %v2746_v22 = vpop.f32.mrf.mxu0  ;;  %v3163_v32 = vpop.f32.mrf.mxu1 }
 0x1a3   : > { %v7187_v22 = vld [vmem:[%s7539_s20 + $0x6e4] ss:$20 sps:$4 sm:$0xff]   ;;  %v7190_v32 = vld [vmem:[%s7539_s20 + $0x46c] ss:$20 sps:$4 sm:$0xff]  }
 0x1a4   : > { %v8004_v48 = vpop.f32.mrf.mxu0  ;;  %2940 = vmatmul.mubr.bf16.gmra.mxu0 %v7172_v54  ;;  %v8006_v9 = vpop.f32.mrf.mxu1  ;;  %3357 = vmatmul.mubr.bf16.gmra.mxu1 %v7175_v36 }
 0x1a5   : > { %9276 = vst [vmem:[#allocation49_spill] sm:$0xff] %v8004_v48  ;;  %2947 = vmatprep.mubr.bf16.mxu0 %v7181_v42  ;;  %3364 = vmatprep.mubr.bf16.mxu1 %v7184_v3 }
 0x1a6   : > { %v2751_v62 = vpop.f32.mrf.mxu0  ;;  %v3168_v34 = vpop.f32.mrf.mxu1 }
 0x1a8   : > { %v8008_v7 = vpop.f32.mrf.mxu0  ;;  %v8010_v50 = vpop.f32.mrf.mxu1 }
 0x1a9   : > { %9277 = vst [vmem:[#allocation50_spill] sm:$0xff] %v8008_v7  ;;  %v7206_v7 = vld [vmem:[%s7539_s20 + $0x4e0] ss:$20 sps:$4 sm:$0xff]  }
 0x1aa   : > { %v2754_v54 = vpop.f32.mrf.mxu0  ;;  %v3171_v0 = vpop.f32.mrf.mxu1 }
 0x1ab   : > { %v7193_v54 = vld [vmem:[%s7539_s20 + $0x70c] ss:$20 sps:$4 sm:$0xff]   ;;  %v7196_v0 = vld [vmem:[%s7539_s20 + $0x494] ss:$20 sps:$4 sm:$0xff]  }
 0x1ac   : > { %v8016_v13 = vpop.f32.mrf.mxu0  ;;  %2948 = vmatmul.mubr.bf16.gmra.mxu0 %v7179_v20  ;;  %v8018_v36 = vpop.f32.mrf.mxu1  ;;  %3365 = vmatmul.mubr.bf16.gmra.mxu1 %v7182_v5 }
 0x1ad   : > { %9278 = vst [vmem:[#allocation51_spill] sm:$0xff] %v8016_v13  ;;  %2955 = vmatprep.mubr.bf16.mxu0 %v7187_v22  ;;  %3372 = vmatprep.mubr.bf16.mxu1 %v7190_v32  ;;  %v7213_v13 = vld [vmem:[%s7539_s20 + $0x38] ss:$20 sps:$4 sm:$0xff]  }
 0x1ae   : > { %v2759_v42 = vpop.f32.mrf.mxu0  ;;  %v3176_v3 = vpop.f32.mrf.mxu1 }
 0x1b0   : > { %v8020_v62 = vpop.f32.mrf.mxu0  ;;  %v8022_v34 = vpop.f32.mrf.mxu1 }
 0x1b1   : > { %9279 = vst [vmem:[#allocation52_spill] sm:$0xff] %v8020_v62 }
 0x1b2   : > { %v2762_v20 = vpop.f32.mrf.mxu0  ;;  %v3179_v39 = vpop.f32.mrf.mxu1 }
 0x1b3   : > { %v7199_v20 = vld [vmem:[%s7539_s20 + $0x734] ss:$20 sps:$4 sm:$0xff]   ;;  %v7202_v39 = vld [vmem:[%s7539_s20 + $0x4bc] ss:$20 sps:$4 sm:$0xff]  }
 0x1b4   : > { %v8028_v52 = vpop.f32.mrf.mxu0  ;;  %2956 = vmatmul.mubr.bf16.gmra.mxu0 %v7185_v56  ;;  %v8030_v5 = vpop.f32.mrf.mxu1  ;;  %3373 = vmatmul.mubr.bf16.gmra.mxu1 %v7188_v44 }
 0x1b5   : > { %9280 = vst [vmem:[#allocation53_spill] sm:$0xff] %v8028_v52  ;;  %2963 = vmatprep.mubr.bf16.mxu0 %v7193_v54  ;;  %3380 = vmatprep.mubr.bf16.mxu1 %v7196_v0  ;;  %v7200_v52 = vld [vmem:[%s7539_s20 + $0x4b8] ss:$20 sps:$4 sm:$0xff]  }
 0x1b6   : > { %v2767_v22 = vpop.f32.mrf.mxu0  ;;  %v3184_v32 = vpop.f32.mrf.mxu1 }
 0x1b8   : > { %v8032_v42 = vpop.f32.mrf.mxu0  ;;  %v8034_v3 = vpop.f32.mrf.mxu1 }
 0x1b9   : > { %9281 = vst [vmem:[#allocation54_spill] sm:$0xff] %v8032_v42  ;;  %v7197_v42 = vld [vmem:[%s7539_s20 + $0x730] ss:$20 sps:$4 sm:$0xff]  }
 0x1ba   : > { %v2770_v56 = vpop.f32.mrf.mxu0  ;;  %v3187_v15 = vpop.f32.mrf.mxu1 }
 0x1bb   : > { %v7205_v56 = vld [vmem:[%s7539_s20 + $0x75c] ss:$20 sps:$4 sm:$0xff]   ;;  %v7208_v15 = vld [vmem:[%s7539_s20 + $0x4e4] ss:$20 sps:$4 sm:$0xff]  }
 0x1bc   : > { %v8040_v27 = vpop.f32.mrf.mxu0  ;;  %2964 = vmatmul.mubr.bf16.gmra.mxu0 %v7191_v31  ;;  %v8042_v44 = vpop.f32.mrf.mxu1  ;;  %3381 = vmatmul.mubr.bf16.gmra.mxu1 %v7194_v19 }
 0x1bd   : > { %9282 = vst [vmem:[#allocation55_spill] sm:$0xff] %v8040_v27  ;;  %2971 = vmatprep.mubr.bf16.mxu0 %v7199_v20  ;;  %3388 = vmatprep.mubr.bf16.mxu1 %v7202_v39 }
 0x1be   : > { %v2775_v54 = vpop.f32.mrf.mxu0  ;;  %v3192_v0 = vpop.f32.mrf.mxu1 }
 0x1c0   : > { %v8044_v22 = vpop.f32.mrf.mxu0  ;;  %v8046_v32 = vpop.f32.mrf.mxu1 }
 0x1c1   : > { %9283 = vst [vmem:[#allocation56_spill] sm:$0xff] %v8044_v22  ;;  %v7203_v22 = vld [vmem:[%s7539_s20 + $0x758] ss:$20 sps:$4 sm:$0xff]  }
 0x1c2   : > { %v2778_v31 = vpop.f32.mrf.mxu0  ;;  %v3195_v27 = vpop.f32.mrf.mxu1 }
 0x1c3   : > { %v7211_v31 = vld [vmem:[%s7539_s20 + $0x50c] ss:$20 sps:$4 sm:$0xff]   ;;  %v7212_v27 = vld [vmem:[%s7539_s20 + $0x10] ss:$20 sps:$4 sm:$0xff]  }
 0x1c4   : > { %v8052_v62 = vpop.f32.mrf.mxu0  ;;  %2972 = vmatmul.mubr.bf16.gmra.mxu0 %v7197_v42  ;;  %v8054_v19 = vpop.f32.mrf.mxu1  ;;  %3389 = vmatmul.mubr.bf16.gmra.mxu1 %v7200_v52 }
 0x1c5   : > { %9284 = vst [vmem:[#allocation57_spill] sm:$0xff] %v8052_v62  ;;  %2979 = vmatprep.mubr.bf16.mxu0 %v7205_v56  ;;  %3396 = vmatprep.mubr.bf16.mxu1 %v7208_v15 }
 0x1c6   : > { %v2783_v20 = vpop.f32.mrf.mxu0  ;;  %v3200_v39 = vpop.f32.mrf.mxu1 }
 0x1c8   : > { %v8056_v54 = vpop.f32.mrf.mxu0  ;;  %v8058_v0 = vpop.f32.mrf.mxu1 }
 0x1c9   : > { %9285 = vst [vmem:[#allocation58_spill] sm:$0xff] %v8056_v54  ;;  %v7209_v54 = vld [vmem:[%s7539_s20 + $0x508] ss:$20 sps:$4 sm:$0xff]  }
 0x1ca   : > { %v2786_v42 = vpop.f32.mrf.mxu0  ;;  %v3203_v62 = vpop.f32.mrf.mxu1 }
 0x1cb   : > { %v7216_v42 = vld [vmem:[%s7539_s20 + $0x534] ss:$20 sps:$4 sm:$0xff]  }
 0x1cc   : > { %v8064_v48 = vpop.f32.mrf.mxu0  ;;  %2980 = vmatmul.mubr.bf16.gmra.mxu0 %v7203_v22  ;;  %v8066_v52 = vpop.f32.mrf.mxu1  ;;  %3397 = vmatmul.mubr.bf16.gmra.mxu1 %v7206_v7  ;;  %v7217_v62 = vld [vmem:[%s7539_s20 + $0x60] ss:$20 sps:$4 sm:$0xff]  }
 0x1cd   : > { %9286 = vst [vmem:[#allocation59_spill] sm:$0xff] %v8064_v48  ;;  %3404 = vmatprep.mubr.bf16.mxu1 %v7211_v31  ;;  %6678 = vmatprep.mubr.bf16.mxu0 %v7212_v27 }
 0x1ce   : > { %v2791_v56 = vpop.f32.mrf.mxu0  ;;  %v3208_v15 = vpop.f32.mrf.mxu1 }
 0x1d0   : > { %v8068_v20 = vpop.f32.mrf.mxu0  ;;  %v8070_v39 = vpop.f32.mrf.mxu1 }
 0x1d1   : > { %9287 = vst [vmem:[#allocation60_spill] sm:$0xff] %v8068_v20  ;;  %v7214_v20 = vld [vmem:[%s7539_s20 + $0x530] ss:$20 sps:$4 sm:$0xff]  }
 0x1d2   : > { %v2794_v22 = vpop.f32.mrf.mxu0  ;;  %v3211_v48 = vpop.f32.mrf.mxu1 }
 0x1d3   : > { %v7221_v22 = vld [vmem:[%s7539_s20 + $0x55c] ss:$20 sps:$4 sm:$0xff]  }
 0x1d4   : > { %v8076_v10 = vpop.f32.mrf.mxu0  ;;  %v8078_v7 = vpop.f32.mrf.mxu1  ;;  %3405 = vmatmul.mubr.bf16.gmra.mxu1 %v7209_v54  ;;  %6679 = vmatmul.mubr.bf16.vlgmr.msra.gmra.mxu0 %v7213_v13  ;;  %v7222_v48 = vld [vmem:[%s7539_s20 + $0xb0] ss:$20 sps:$4 sm:$0xff]  }
 0x1d5   : > { %9288 = vst [vmem:[#allocation61_spill] sm:$0xff] %v8076_v10  ;;  %3412 = vmatprep.mubr.bf16.mxu1 %v7216_v42  ;;  %6682 = vmatprep.mubr.bf16.mxu0 %v7217_v62 }
 0x1d6   : > { %v2799_v31 = vpop.f32.mrf.mxu0  ;;  %v3216_v27 = vpop.f32.mrf.mxu1 }
 0x1d8   : > { %v8080_v56 = vpop.f32.mrf.mxu0  ;;  %v8082_v15 = vpop.f32.mrf.mxu1 }
 0x1d9   : > { %9289 = vst [vmem:[#allocation62_spill] sm:$0xff] %v8080_v56  ;;  %v7219_v56 = vld [vmem:[%s7539_s20 + $0x558] ss:$20 sps:$4 sm:$0xff]  }
 0x1da   : > { %v2802_v10 = vpop.f32.mrf.mxu0  ;;  %v3219_v58 = vpop.f32.mrf.mxu1 }
 0x1db   : > { %v7226_v10 = vld [vmem:[%s7539_s20 + $0x584] ss:$20 sps:$4 sm:$0xff]   ;;  %v7227_v58 = vld [vmem:[%s7539_s20 + $0x100] ss:$20 sps:$4 sm:$0xff]  }
 0x1dc   : > { %v8088_v54 = vpop.f32.mrf.mxu0  ;;  %v8090_v13 = vpop.f32.mrf.mxu1  ;;  %3413 = vmatmul.mubr.bf16.gmra.mxu1 %v7214_v20  ;;  %6683 = vmatmul.mubr.bf16.gmra.mxu0 %v7218_v37 }
 0x1dd   : > { %9290 = vst [vmem:[#allocation63_spill] sm:$0xff] %v8088_v54  ;;  %3420 = vmatprep.mubr.bf16.mxu1 %v7221_v22  ;;  %6686 = vmatprep.mubr.bf16.mxu0 %v7222_v48 }
 0x1de   : > { %v2807_v42 = vpop.f32.mrf.mxu0  ;;  %v3224_v62 = vpop.f32.mrf.mxu1 }
 0x1e0   : > { %v8092_v31 = vpop.f32.mrf.mxu0  ;;  %v8094_v27 = vpop.f32.mrf.mxu1 }
 0x1e1   : > { %9291 = vst [vmem:[#allocation64_spill] sm:$0xff] %v8092_v31  ;;  %v7224_v31 = vld [vmem:[%s7539_s20 + $0x580] ss:$20 sps:$4 sm:$0xff]  }
 0x1e2   : > { %v2810_v54 = vpop.f32.mrf.mxu0  ;;  %v3227_v21 = vpop.f32.mrf.mxu1 }
 0x1e3   : > { %v7231_v54 = vld [vmem:[%s7539_s20 + $0x5ac] ss:$20 sps:$4 sm:$0xff]   ;;  %v7232_v21 = vld [vmem:[%s7539_s20 + $0x150] ss:$20 sps:$4 sm:$0xff]  }
 0x1e4   : > { %v8100_v20 = vpop.f32.mrf.mxu0  ;;  %v8102_v37 = vpop.f32.mrf.mxu1  ;;  %3421 = vmatmul.mubr.bf16.gmra.mxu1 %v7219_v56  ;;  %6687 = vmatmul.mubr.bf16.gmra.mxu0 %v7223_v24 }
 0x1e5   : > { %9292 = vst [vmem:[#allocation65_spill] sm:$0xff] %v8100_v20  ;;  %3428 = vmatprep.mubr.bf16.mxu1 %v7226_v10  ;;  %6690 = vmatprep.mubr.bf16.mxu0 %v7227_v58 }
 0x1e6   : > { %v2815_v22 = vpop.f32.mrf.mxu0  ;;  %v3232_v48 = vpop.f32.mrf.mxu1 }
 0x1e8   : > { %v8104_v42 = vpop.f32.mrf.mxu0  ;;  %v8106_v62 = vpop.f32.mrf.mxu1 }
 0x1e9   : > { %9293 = vst [vmem:[#allocation66_spill] sm:$0xff] %v8104_v42  ;;  %v7229_v42 = vld [vmem:[%s7539_s20 + $0x5a8] ss:$20 sps:$4 sm:$0xff]  }
 0x1ea   : > { %v2818_v20 = vpop.f32.mrf.mxu0  ;;  %v3235_v40 = vpop.f32.mrf.mxu1 }
 0x1eb   : > { %v7236_v20 = vld [vmem:[%s7539_s20 + $0x5d4] ss:$20 sps:$4 sm:$0xff]  }
 0x1ec   : > { %v8112_v56 = vpop.f32.mrf.mxu0  ;;  %v8114_v24 = vpop.f32.mrf.mxu1  ;;  %3429 = vmatmul.mubr.bf16.gmra.mxu1 %v7224_v31  ;;  %6691 = vmatmul.mubr.bf16.gmra.mxu0 %v7228_v41  ;;  %v7237_v40 = vld [vmem:[%s7539_s20 + $0x1a0] ss:$20 sps:$4 sm:$0xff]  }
 0x1ed   : > { %9294 = vst [vmem:[#allocation67_spill] sm:$0xff] %v8112_v56  ;;  %3436 = vmatprep.mubr.bf16.mxu1 %v7231_v54  ;;  %6694 = vmatprep.mubr.bf16.mxu0 %v7232_v21 }
 0x1ee   : > { %v2823_v10 = vpop.f32.mrf.mxu0  ;;  %v3240_v58 = vpop.f32.mrf.mxu1 }
 0x1f0   : > { %v8116_v22 = vpop.f32.mrf.mxu0  ;;  %v8118_v48 = vpop.f32.mrf.mxu1 }
 0x1f1   : > { %9295 = vst [vmem:[#allocation68_spill] sm:$0xff] %v8116_v22  ;;  %v7234_v22 = vld [vmem:[%s7539_s20 + $0x5d0] ss:$20 sps:$4 sm:$0xff]  }
 0x1f2   : > { %v2826_v56 = vpop.f32.mrf.mxu0  ;;  %v3243_v61 = vpop.f32.mrf.mxu1 }
 0x1f3   : > { %v7241_v56 = vld [vmem:[%s7539_s20 + $0x5fc] ss:$20 sps:$4 sm:$0xff]  }
 0x1f4   : > { %v8124_v31 = vpop.f32.mrf.mxu0  ;;  %v8126_v41 = vpop.f32.mrf.mxu1  ;;  %3437 = vmatmul.mubr.bf16.gmra.mxu1 %v7229_v42  ;;  %6695 = vmatmul.mubr.bf16.gmra.mxu0 %v7233_v11  ;;  %v7242_v61 = vld [vmem:[%s7539_s20 + $0x1f0] ss:$20 sps:$4 sm:$0xff]  }
 0x1f5   : > { %9296 = vst [vmem:[#allocation69_spill] sm:$0xff] %v8124_v31  ;;  %9297 = vst [vmem:[#allocation70_spill] sm:$0xff] %v8126_v41  ;;  %3444 = vmatprep.mubr.bf16.mxu1 %v7236_v20  ;;  %6698 = vmatprep.mubr.bf16.mxu0 %v7237_v40 }
 0x1f6   : > { %v2831_v54 = vpop.f32.mrf.mxu0  ;;  %v3248_v21 = vpop.f32.mrf.mxu1 }
 0x1f8   : > { %v8128_v10 = vpop.f32.mrf.mxu0  ;;  %v8130_v58 = vpop.f32.mrf.mxu1 }
 0x1f9   : > { %9298 = vst [vmem:[#allocation71_spill] sm:$0xff] %v8128_v10  ;;  %9299 = vst [vmem:[#allocation72_spill] sm:$0xff] %v8130_v58  ;;  %v7239_v10 = vld [vmem:[%s7539_s20 + $0x5f8] ss:$20 sps:$4 sm:$0xff]  }
 0x1fa   : > { %v2834_v31 = vpop.f32.mrf.mxu0  ;;  %v3251_v41 = vpop.f32.mrf.mxu1  ;;  %v7243_v58 = vld [vmem:[%s7539_s20 + $0x218] ss:$20 sps:$4 sm:$0xff]  }
 0x1fb   : > { %v7246_v31 = vld [vmem:[%s7539_s20 + $0x624] ss:$20 sps:$4 sm:$0xff]   ;;  %v7247_v41 = vld [vmem:[%s7539_s20 + $0x240] ss:$20 sps:$4 sm:$0xff]  }
 0x1fc   : > { %v8136_v42 = vpop.f32.mrf.mxu0  ;;  %v8138_v11 = vpop.f32.mrf.mxu1  ;;  %3445 = vmatmul.mubr.bf16.gmra.mxu1 %v7234_v22  ;;  %6699 = vmatmul.mubr.bf16.gmra.mxu0 %v7238_v6 }
 0x1fd   : > { %9300 = vst [vmem:[#allocation73_spill] sm:$0xff] %v8136_v42  ;;  %9301 = vst [vmem:[#allocation74_spill] sm:$0xff] %v8138_v11  ;;  %3452 = vmatprep.mubr.bf16.mxu1 %v7241_v56  ;;  %6702 = vmatprep.mubr.bf16.mxu0 %v7242_v61  ;;  %v7336_v11 = vld [vmem:[%s7539_s20 + $0x8f4] ss:$20 sps:$4 sm:$0xff]  }
 0x1fe   : > { %v2839_v20 = vpop.f32.mrf.mxu0  ;;  %v3256_v40 = vpop.f32.mrf.mxu1 }
 0x200   : > { %v8140_v54 = vpop.f32.mrf.mxu0  ;;  %v8142_v21 = vpop.f32.mrf.mxu1 }
 0x201   : > { %9302 = vst [vmem:[#allocation75_spill] sm:$0xff] %v8140_v54  ;;  %9303 = vst [vmem:[#allocation76_spill] sm:$0xff] %v8142_v21  ;;  %v7244_v54 = vld [vmem:[%s7539_s20 + $0x620] ss:$20 sps:$4 sm:$0xff]   ;;  %v7248_v21 = vld [vmem:[%s7539_s20 + $0x268] ss:$20 sps:$4 sm:$0xff]  }
 0x202   : > { %v2842_v42 = vpop.f32.mrf.mxu0  ;;  %v3259_v57 = vpop.f32.mrf.mxu1 }
 0x203   : > { %v7251_v42 = vld [vmem:[%s7539_s20 + $0x64c] ss:$20 sps:$4 sm:$0xff]   ;;  %v7252_v57 = vld [vmem:[%s7539_s20 + $0x290] ss:$20 sps:$4 sm:$0xff]  }
 0x204   : > { %v8148_v22 = vpop.f32.mrf.mxu0  ;;  %v8150_v6 = vpop.f32.mrf.mxu1  ;;  %3453 = vmatmul.mubr.bf16.gmra.mxu1 %v7239_v10  ;;  %6703 = vmatmul.mubr.bf16.gmra.mxu0 %v7243_v58 }
 0x205   : > { %9304 = vst [vmem:[#allocation77_spill] sm:$0xff] %v8148_v22  ;;  %9305 = vst [vmem:[#allocation78_spill] sm:$0xff] %v8150_v6  ;;  %3460 = vmatprep.mubr.bf16.mxu1 %v7246_v31  ;;  %6706 = vmatprep.mubr.bf16.mxu0 %v7247_v41 }
 0x206   : > { %v2847_v56 = vpop.f32.mrf.mxu0  ;;  %v3264_v61 = vpop.f32.mrf.mxu1 }
 0x208   : > { %v8152_v20 = vpop.f32.mrf.mxu0  ;;  %v8154_v40 = vpop.f32.mrf.mxu1 }
 0x209   : > { %9306 = vst [vmem:[#allocation79_spill] sm:$0xff] %v8152_v20  ;;  %9307 = vst [vmem:[#allocation80_spill] sm:$0xff] %v8154_v40  ;;  %v7249_v20 = vld [vmem:[%s7539_s20 + $0x648] ss:$20 sps:$4 sm:$0xff]   ;;  %v7253_v40 = vld [vmem:[%s7539_s20 + $0x2b8] ss:$20 sps:$4 sm:$0xff]  }
 0x20a   : > { %v2850_v22 = vpop.f32.mrf.mxu0  ;;  %v3267_v6 = vpop.f32.mrf.mxu1 }
 0x20b   : > { %v7256_v22 = vld [vmem:[%s7539_s20 + $0x674] ss:$20 sps:$4 sm:$0xff]  }
 0x20c   : > { %v8160_v10 = vpop.f32.mrf.mxu0  ;;  %v8162_v58 = vpop.f32.mrf.mxu1  ;;  %3461 = vmatmul.mubr.bf16.gmra.mxu1 %v7244_v54  ;;  %6707 = vmatmul.mubr.bf16.gmra.mxu0 %v7248_v21  ;;  %v7257_v6 = vld [vmem:[%s7539_s20 + $0x2e0] ss:$20 sps:$4 sm:$0xff]  }
 0x20d   : > { %9308 = vst [vmem:[#allocation81_spill] sm:$0xff] %v8160_v10  ;;  %9309 = vst [vmem:[#allocation82_spill] sm:$0xff] %v8162_v58  ;;  %3468 = vmatprep.mubr.bf16.mxu1 %v7251_v42  ;;  %6710 = vmatprep.mubr.bf16.mxu0 %v7252_v57 }
 0x20e   : > { %v2855_v31 = vpop.f32.mrf.mxu0  ;;  %v3272_v41 = vpop.f32.mrf.mxu1 }
 0x210   : > { %v8164_v56 = vpop.f32.mrf.mxu0  ;;  %v8166_v61 = vpop.f32.mrf.mxu1 }
 0x211   : > { %9310 = vst [vmem:[#allocation83_spill] sm:$0xff] %v8164_v56  ;;  %9311 = vst [vmem:[#allocation84_spill] sm:$0xff] %v8166_v61  ;;  %v7254_v56 = vld [vmem:[%s7539_s20 + $0x670] ss:$20 sps:$4 sm:$0xff]   ;;  %v7258_v61 = vld [vmem:[%s7539_s20 + $0x308] ss:$20 sps:$4 sm:$0xff]  }
 0x212   : > { %v2858_v10 = vpop.f32.mrf.mxu0  ;;  %v3275_v58 = vpop.f32.mrf.mxu1 }
 0x213   : > { %v7261_v10 = vld [vmem:[%s7539_s20 + $0x69c] ss:$20 sps:$4 sm:$0xff]  }
 0x214   : > { %v8172_v54 = vpop.f32.mrf.mxu0  ;;  %v8174_v21 = vpop.f32.mrf.mxu1  ;;  %3469 = vmatmul.mubr.bf16.gmra.mxu1 %v7249_v20  ;;  %6711 = vmatmul.mubr.bf16.gmra.mxu0 %v7253_v40  ;;  %v7262_v58 = vld [vmem:[%s7539_s20 + $0x330] ss:$20 sps:$4 sm:$0xff]  }
 0x215   : > { %9312 = vst [vmem:[#allocation85_spill] sm:$0xff] %v8172_v54  ;;  %9313 = vst [vmem:[#allocation86_spill] sm:$0xff] %v8174_v21  ;;  %3476 = vmatprep.mubr.bf16.mxu1 %v7256_v22  ;;  %6714 = vmatprep.mubr.bf16.mxu0 %v7257_v6 }
 0x216   : > { %v2863_v42 = vpop.f32.mrf.mxu0  ;;  %v3280_v57 = vpop.f32.mrf.mxu1 }
 0x218   : > { %v8176_v31 = vpop.f32.mrf.mxu0  ;;  %v8178_v41 = vpop.f32.mrf.mxu1 }
 0x219   : > { %9314 = vst [vmem:[#allocation87_spill] sm:$0xff] %v8176_v31  ;;  %9315 = vst [vmem:[#allocation88_spill] sm:$0xff] %v8178_v41  ;;  %v7259_v31 = vld [vmem:[%s7539_s20 + $0x698] ss:$20 sps:$4 sm:$0xff]  }
 0x21a   : > { %v2866_v54 = vpop.f32.mrf.mxu0  ;;  %v3283_v21 = vpop.f32.mrf.mxu1  ;;  %v7263_v41 = vld [vmem:[%s7539_s20 + $0x358] ss:$20 sps:$4 sm:$0xff]  }
 0x21b   : > { %v7266_v54 = vld [vmem:[%s7539_s20 + $0x6c4] ss:$20 sps:$4 sm:$0xff]   ;;  %v7267_v21 = vld [vmem:[%s7539_s20 + $0x380] ss:$20 sps:$4 sm:$0xff]  }
 0x21c   : > { %v8184_v20 = vpop.f32.mrf.mxu0  ;;  %v8186_v40 = vpop.f32.mrf.mxu1  ;;  %3477 = vmatmul.mubr.bf16.gmra.mxu1 %v7254_v56  ;;  %6715 = vmatmul.mubr.bf16.gmra.mxu0 %v7258_v61 }
 0x21d   : > { %9316 = vst [vmem:[#allocation89_spill] sm:$0xff] %v8184_v20  ;;  %9317 = vst [vmem:[#allocation90_spill] sm:$0xff] %v8186_v40  ;;  %3484 = vmatprep.mubr.bf16.mxu1 %v7261_v10  ;;  %6718 = vmatprep.mubr.bf16.mxu0 %v7262_v58 }
 0x21e   : > { %v2871_v22 = vpop.f32.mrf.mxu0  ;;  %v3288_v6 = vpop.f32.mrf.mxu1 }
 0x220   : > { %v8188_v42 = vpop.f32.mrf.mxu0  ;;  %v8190_v57 = vpop.f32.mrf.mxu1 }
 0x221   : > { %9318 = vst [vmem:[#allocation91_spill] sm:$0xff] %v8188_v42  ;;  %9319 = vst [vmem:[#allocation92_spill] sm:$0xff] %v8190_v57  ;;  %v7264_v42 = vld [vmem:[%s7539_s20 + $0x6c0] ss:$20 sps:$4 sm:$0xff]   ;;  %v7268_v57 = vld [vmem:[%s7539_s20 + $0x3a8] ss:$20 sps:$4 sm:$0xff]  }
 0x222   : > { %v2874_v20 = vpop.f32.mrf.mxu0  ;;  %v3291_v40 = vpop.f32.mrf.mxu1 }
 0x223   : > { %v7271_v20 = vld [vmem:[%s7539_s20 + $0x6ec] ss:$20 sps:$4 sm:$0xff]   ;;  %v7272_v40 = vld [vmem:[%s7539_s20 + $0x3d0] ss:$20 sps:$4 sm:$0xff]  }
 0x224   : > { %v8196_v56 = vpop.f32.mrf.mxu0  ;;  %v8198_v61 = vpop.f32.mrf.mxu1  ;;  %3485 = vmatmul.mubr.bf16.gmra.mxu1 %v7259_v31  ;;  %6719 = vmatmul.mubr.bf16.gmra.mxu0 %v7263_v41 }
 0x225   : > { %9320 = vst [vmem:[#allocation93_spill] sm:$0xff] %v8196_v56  ;;  %9321 = vst [vmem:[#allocation94_spill] sm:$0xff] %v8198_v61  ;;  %3492 = vmatprep.mubr.bf16.mxu1 %v7266_v54  ;;  %6722 = vmatprep.mubr.bf16.mxu0 %v7267_v21 }
 0x226   : > { %v2879_v10 = vpop.f32.mrf.mxu0  ;;  %v3296_v58 = vpop.f32.mrf.mxu1 }
 0x228   : > { %v8200_v22 = vpop.f32.mrf.mxu0  ;;  %v8202_v6 = vpop.f32.mrf.mxu1 }
 0x229   : > { %9322 = vst [vmem:[#allocation95_spill] sm:$0xff] %v8200_v22  ;;  %9323 = vst [vmem:[#allocation96_spill] sm:$0xff] %v8202_v6  ;;  %v7269_v22 = vld [vmem:[%s7539_s20 + $0x6e8] ss:$20 sps:$4 sm:$0xff]   ;;  %v7273_v6 = vld [vmem:[%s7539_s20 + $0x3f8] ss:$20 sps:$4 sm:$0xff]  }
 0x22a   : > { %v2882_v56 = vpop.f32.mrf.mxu0  ;;  %v3299_v61 = vpop.f32.mrf.mxu1 }
 0x22b   : > { %v7276_v56 = vld [vmem:[%s7539_s20 + $0x714] ss:$20 sps:$4 sm:$0xff]  }
 0x22c   : > { %v8208_v31 = vpop.f32.mrf.mxu0  ;;  %v8210_v41 = vpop.f32.mrf.mxu1  ;;  %3493 = vmatmul.mubr.bf16.gmra.mxu1 %v7264_v42  ;;  %6723 = vmatmul.mubr.bf16.gmra.mxu0 %v7268_v57  ;;  %v7277_v61 = vld [vmem:[%s7539_s20 + $0x420] ss:$20 sps:$4 sm:$0xff]  }
 0x22d   : > { %9324 = vst [vmem:[#allocation97_spill] sm:$0xff] %v8208_v31  ;;  %9325 = vst [vmem:[#allocation98_spill] sm:$0xff] %v8210_v41  ;;  %3500 = vmatprep.mubr.bf16.mxu1 %v7271_v20  ;;  %6726 = vmatprep.mubr.bf16.mxu0 %v7272_v40 }
 0x22e   : > { %v2887_v54 = vpop.f32.mrf.mxu0  ;;  %v3304_v21 = vpop.f32.mrf.mxu1 }
 0x230   : > { %v8212_v10 = vpop.f32.mrf.mxu0  ;;  %v8214_v58 = vpop.f32.mrf.mxu1 }
 0x231   : > { %9326 = vst [vmem:[#allocation99_spill] sm:$0xff] %v8212_v10  ;;  %9327 = vst [vmem:[#allocation100_spill] sm:$0xff] %v8214_v58  ;;  %v7274_v10 = vld [vmem:[%s7539_s20 + $0x710] ss:$20 sps:$4 sm:$0xff]   ;;  %v7278_v58 = vld [vmem:[%s7539_s20 + $0x448] ss:$20 sps:$4 sm:$0xff]  }
 0x232   : > { %v2890_v31 = vpop.f32.mrf.mxu0  ;;  %v3307_v41 = vpop.f32.mrf.mxu1 }
 0x233   : > { %v7281_v31 = vld [vmem:[%s7539_s20 + $0x73c] ss:$20 sps:$4 sm:$0xff]  }
 0x234   : > { %v8220_v42 = vpop.f32.mrf.mxu0  ;;  %v8222_v57 = vpop.f32.mrf.mxu1  ;;  %3501 = vmatmul.mubr.bf16.gmra.mxu1 %v7269_v22  ;;  %6727 = vmatmul.mubr.bf16.gmra.mxu0 %v7273_v6  ;;  %v7282_v41 = vld [vmem:[%s7539_s20 + $0x470] ss:$20 sps:$4 sm:$0xff]  }
 0x235   : > { %9328 = vst [vmem:[#allocation101_spill] sm:$0xff] %v8220_v42  ;;  %9329 = vst [vmem:[#allocation102_spill] sm:$0xff] %v8222_v57  ;;  %3508 = vmatprep.mubr.bf16.mxu1 %v7276_v56  ;;  %6730 = vmatprep.mubr.bf16.mxu0 %v7277_v61 }
 0x236   : > { %v2895_v20 = vpop.f32.mrf.mxu0  ;;  %v3312_v40 = vpop.f32.mrf.mxu1 }
 0x238   : > { %v8224_v54 = vpop.f32.mrf.mxu0  ;;  %v8226_v21 = vpop.f32.mrf.mxu1 }
 0x239   : > { %9330 = vst [vmem:[#allocation103_spill] sm:$0xff] %v8224_v54  ;;  %9331 = vst [vmem:[#allocation104_spill] sm:$0xff] %v8226_v21  ;;  %v7279_v54 = vld [vmem:[%s7539_s20 + $0x738] ss:$20 sps:$4 sm:$0xff]  }
 0x23a   : > { %v2898_v42 = vpop.f32.mrf.mxu0  ;;  %v3315_v57 = vpop.f32.mrf.mxu1  ;;  %v7283_v21 = vld [vmem:[%s7539_s20 + $0x498] ss:$20 sps:$4 sm:$0xff]  }
 0x23b   : > { %v7286_v42 = vld [vmem:[%s7539_s20 + $0x764] ss:$20 sps:$4 sm:$0xff]   ;;  %v7287_v57 = vld [vmem:[%s7539_s20 + $0x4c0] ss:$20 sps:$4 sm:$0xff]  }
 0x23c   : > { %v8232_v22 = vpop.f32.mrf.mxu0  ;;  %v8234_v6 = vpop.f32.mrf.mxu1  ;;  %3509 = vmatmul.mubr.bf16.gmra.mxu1 %v7274_v10  ;;  %6731 = vmatmul.mubr.bf16.gmra.mxu0 %v7278_v58 }
 0x23d   : > { %9332 = vst [vmem:[#allocation105_spill] sm:$0xff] %v8232_v22  ;;  %9333 = vst [vmem:[#allocation106_spill] sm:$0xff] %v8234_v6  ;;  %3516 = vmatprep.mubr.bf16.mxu1 %v7281_v31  ;;  %6734 = vmatprep.mubr.bf16.mxu0 %v7282_v41 }
 0x23e   : > { %v2903_v56 = vpop.f32.mrf.mxu0  ;;  %v3320_v61 = vpop.f32.mrf.mxu1 }
 0x240   : > { %v8236_v20 = vpop.f32.mrf.mxu0  ;;  %v8238_v40 = vpop.f32.mrf.mxu1 }
 0x241   : > { %9334 = vst [vmem:[#allocation107_spill] sm:$0xff] %v8236_v20  ;;  %9335 = vst [vmem:[#allocation108_spill] sm:$0xff] %v8238_v40  ;;  %v7284_v20 = vld [vmem:[%s7539_s20 + $0x760] ss:$20 sps:$4 sm:$0xff]   ;;  %v7288_v40 = vld [vmem:[%s7539_s20 + $0x4e8] ss:$20 sps:$4 sm:$0xff]  }
 0x242   : > { %v2906_v22 = vpop.f32.mrf.mxu0  ;;  %v3323_v6 = vpop.f32.mrf.mxu1 }
 0x243   : > { %v7291_v22 = vld [vmem:[%s7539_s20 + $0x78c] ss:$20 sps:$4 sm:$0xff]   ;;  %v7292_v6 = vld [vmem:[%s7539_s20 + $0x510] ss:$20 sps:$4 sm:$0xff]  }
 0x244   : > { %v8244_v10 = vpop.f32.mrf.mxu0  ;;  %v8246_v58 = vpop.f32.mrf.mxu1  ;;  %3517 = vmatmul.mubr.bf16.gmra.mxu1 %v7279_v54  ;;  %6735 = vmatmul.mubr.bf16.gmra.mxu0 %v7283_v21 }
 0x245   : > { %9336 = vst [vmem:[#allocation109_spill] sm:$0xff] %v8244_v10  ;;  %9337 = vst [vmem:[#allocation110_spill] sm:$0xff] %v8246_v58  ;;  %3524 = vmatprep.mubr.bf16.mxu1 %v7286_v42  ;;  %6738 = vmatprep.mubr.bf16.mxu0 %v7287_v57 }
 0x246   : > { %v2911_v31 = vpop.f32.mrf.mxu0  ;;  %v3328_v41 = vpop.f32.mrf.mxu1 }
 0x248   : > { %v8248_v56 = vpop.f32.mrf.mxu0  ;;  %v8250_v61 = vpop.f32.mrf.mxu1 }
 0x249   : > { %9338 = vst [vmem:[#allocation111_spill] sm:$0xff] %v8248_v56  ;;  %9339 = vst [vmem:[#allocation112_spill] sm:$0xff] %v8250_v61  ;;  %v7289_v56 = vld [vmem:[%s7539_s20 + $0x788] ss:$20 sps:$4 sm:$0xff]   ;;  %v7293_v61 = vld [vmem:[%s7539_s20 + $0x538] ss:$20 sps:$4 sm:$0xff]  }
 0x24a   : > { %v2914_v10 = vpop.f32.mrf.mxu0  ;;  %v3331_v58 = vpop.f32.mrf.mxu1 }
 0x24b   : > { %v7296_v10 = vld [vmem:[%s7539_s20 + $0x7b4] ss:$20 sps:$4 sm:$0xff]  }
 0x24c   : > { %v8256_v54 = vpop.f32.mrf.mxu0  ;;  %v8258_v21 = vpop.f32.mrf.mxu1  ;;  %3525 = vmatmul.mubr.bf16.gmra.mxu1 %v7284_v20  ;;  %6739 = vmatmul.mubr.bf16.gmra.mxu0 %v7288_v40  ;;  %v7297_v58 = vld [vmem:[%s7539_s20 + $0x560] ss:$20 sps:$4 sm:$0xff]  }
 0x24d   : > { %9340 = vst [vmem:[#allocation113_spill] sm:$0xff] %v8256_v54  ;;  %9341 = vst [vmem:[#allocation114_spill] sm:$0xff] %v8258_v21  ;;  %3532 = vmatprep.mubr.bf16.mxu1 %v7291_v22  ;;  %6742 = vmatprep.mubr.bf16.mxu0 %v7292_v6 }
 0x24e   : > { %v2919_v42 = vpop.f32.mrf.mxu0  ;;  %v3336_v57 = vpop.f32.mrf.mxu1 }
 0x250   : > { %v8260_v31 = vpop.f32.mrf.mxu0  ;;  %v8262_v41 = vpop.f32.mrf.mxu1 }
 0x251   : > { %9342 = vst [vmem:[#allocation115_spill] sm:$0xff] %v8260_v31  ;;  %9343 = vst [vmem:[#allocation116_spill] sm:$0xff] %v8262_v41  ;;  %v7294_v31 = vld [vmem:[%s7539_s20 + $0x7b0] ss:$20 sps:$4 sm:$0xff]   ;;  %v7298_v41 = vld [vmem:[%s7539_s20 + $0x588] ss:$20 sps:$4 sm:$0xff]  }
 0x252   : > { %v2922_v54 = vpop.f32.mrf.mxu0  ;;  %v3339_v21 = vpop.f32.mrf.mxu1 }
 0x253   : > { %v7301_v54 = vld [vmem:[%s7539_s20 + $0x7dc] ss:$20 sps:$4 sm:$0xff]  }
 0x254   : > { %v8268_v20 = vpop.f32.mrf.mxu0  ;;  %v8270_v40 = vpop.f32.mrf.mxu1  ;;  %3533 = vmatmul.mubr.bf16.gmra.mxu1 %v7289_v56  ;;  %6743 = vmatmul.mubr.bf16.gmra.mxu0 %v7293_v61  ;;  %v7302_v21 = vld [vmem:[%s7539_s20 + $0x5b0] ss:$20 sps:$4 sm:$0xff]  }
 0x255   : > { %9344 = vst [vmem:[#allocation117_spill] sm:$0xff] %v8268_v20  ;;  %9345 = vst [vmem:[#allocation118_spill] sm:$0xff] %v8270_v40  ;;  %3540 = vmatprep.mubr.bf16.mxu1 %v7296_v10  ;;  %6746 = vmatprep.mubr.bf16.mxu0 %v7297_v58 }
 0x256   : > { %v2927_v22 = vpop.f32.mrf.mxu0  ;;  %v3344_v6 = vpop.f32.mrf.mxu1 }
 0x258   : > { %v8272_v42 = vpop.f32.mrf.mxu0  ;;  %v8274_v57 = vpop.f32.mrf.mxu1 }
 0x259   : > { %9346 = vst [vmem:[#allocation119_spill] sm:$0xff] %v8272_v42  ;;  %9347 = vst [vmem:[#allocation120_spill] sm:$0xff] %v8274_v57  ;;  %v7299_v42 = vld [vmem:[%s7539_s20 + $0x7d8] ss:$20 sps:$4 sm:$0xff]  }
 0x25a   : > { %v2930_v20 = vpop.f32.mrf.mxu0  ;;  %v3347_v40 = vpop.f32.mrf.mxu1  ;;  %v7303_v57 = vld [vmem:[%s7539_s20 + $0x5d8] ss:$20 sps:$4 sm:$0xff]  }
 0x25b   : > { %v7306_v20 = vld [vmem:[%s7539_s20 + $0x804] ss:$20 sps:$4 sm:$0xff]   ;;  %v7307_v40 = vld [vmem:[%s7539_s20 + $0x600] ss:$20 sps:$4 sm:$0xff]  }
 0x25c   : > { %v8280_v56 = vpop.f32.mrf.mxu0  ;;  %v8282_v61 = vpop.f32.mrf.mxu1  ;;  %3541 = vmatmul.mubr.bf16.gmra.mxu1 %v7294_v31  ;;  %6747 = vmatmul.mubr.bf16.gmra.mxu0 %v7298_v41 }
 0x25d   : > { %9348 = vst [vmem:[#allocation121_spill] sm:$0xff] %v8280_v56  ;;  %9349 = vst [vmem:[#allocation122_spill] sm:$0xff] %v8282_v61  ;;  %3548 = vmatprep.mubr.bf16.mxu1 %v7301_v54  ;;  %6750 = vmatprep.mubr.bf16.mxu0 %v7302_v21 }
 0x25e   : > { %v2935_v10 = vpop.f32.mrf.mxu0  ;;  %v3352_v58 = vpop.f32.mrf.mxu1 }
 0x260   : > { %v8284_v22 = vpop.f32.mrf.mxu0  ;;  %v8286_v6 = vpop.f32.mrf.mxu1 }
 0x261   : > { %9350 = vst [vmem:[#allocation123_spill] sm:$0xff] %v8284_v22  ;;  %9351 = vst [vmem:[#allocation124_spill] sm:$0xff] %v8286_v6  ;;  %v7304_v22 = vld [vmem:[%s7539_s20 + $0x800] ss:$20 sps:$4 sm:$0xff]   ;;  %v7308_v6 = vld [vmem:[%s7539_s20 + $0x628] ss:$20 sps:$4 sm:$0xff]  }
 0x262   : > { %v2938_v56 = vpop.f32.mrf.mxu0  ;;  %v3355_v61 = vpop.f32.mrf.mxu1 }
 0x263   : > { %v7311_v56 = vld [vmem:[%s7539_s20 + $0x82c] ss:$20 sps:$4 sm:$0xff]   ;;  %v7312_v61 = vld [vmem:[%s7539_s20 + $0x650] ss:$20 sps:$4 sm:$0xff]  }
 0x264   : > { %v8292_v31 = vpop.f32.mrf.mxu0  ;;  %v8294_v41 = vpop.f32.mrf.mxu1  ;;  %3549 = vmatmul.mubr.bf16.gmra.mxu1 %v7299_v42  ;;  %6751 = vmatmul.mubr.bf16.gmra.mxu0 %v7303_v57 }
 0x265   : > { %9352 = vst [vmem:[#allocation125_spill] sm:$0xff] %v8292_v31  ;;  %9353 = vst [vmem:[#allocation126_spill] sm:$0xff] %v8294_v41  ;;  %3556 = vmatprep.mubr.bf16.mxu1 %v7306_v20  ;;  %6754 = vmatprep.mubr.bf16.mxu0 %v7307_v40 }
 0x266   : > { %v2943_v54 = vpop.f32.mrf.mxu0  ;;  %v3360_v21 = vpop.f32.mrf.mxu1 }
 0x268   : > { %v8296_v10 = vpop.f32.mrf.mxu0  ;;  %v8298_v58 = vpop.f32.mrf.mxu1 }
 0x269   : > { %9354 = vst [vmem:[#allocation127_spill] sm:$0xff] %v8296_v10  ;;  %9355 = vst [vmem:[#allocation128_spill] sm:$0xff] %v8298_v58  ;;  %v7309_v10 = vld [vmem:[%s7539_s20 + $0x828] ss:$20 sps:$4 sm:$0xff]   ;;  %v7313_v58 = vld [vmem:[%s7539_s20 + $0x678] ss:$20 sps:$4 sm:$0xff]  }
 0x26a   : > { %v2946_v31 = vpop.f32.mrf.mxu0  ;;  %v3363_v41 = vpop.f32.mrf.mxu1 }
 0x26b   : > { %v7316_v31 = vld [vmem:[%s7539_s20 + $0x854] ss:$20 sps:$4 sm:$0xff]  }
 0x26c   : > { %v8304_v42 = vpop.f32.mrf.mxu0  ;;  %v8306_v57 = vpop.f32.mrf.mxu1  ;;  %3557 = vmatmul.mubr.bf16.gmra.mxu1 %v7304_v22  ;;  %6755 = vmatmul.mubr.bf16.gmra.mxu0 %v7308_v6  ;;  %v7317_v41 = vld [vmem:[%s7539_s20 + $0x6a0] ss:$20 sps:$4 sm:$0xff]  }
 0x26d   : > { %9356 = vst [vmem:[#allocation129_spill] sm:$0xff] %v8304_v42  ;;  %9357 = vst [vmem:[#allocation130_spill] sm:$0xff] %v8306_v57  ;;  %3564 = vmatprep.mubr.bf16.mxu1 %v7311_v56  ;;  %6758 = vmatprep.mubr.bf16.mxu0 %v7312_v61 }
 0x26e   : > { %v2951_v20 = vpop.f32.mrf.mxu0  ;;  %v3368_v40 = vpop.f32.mrf.mxu1 }
 0x270   : > { %v8308_v54 = vpop.f32.mrf.mxu0  ;;  %v8310_v21 = vpop.f32.mrf.mxu1 }
 0x271   : > { %9358 = vst [vmem:[#allocation131_spill] sm:$0xff] %v8308_v54  ;;  %9359 = vst [vmem:[#allocation132_spill] sm:$0xff] %v8310_v21  ;;  %v7314_v54 = vld [vmem:[%s7539_s20 + $0x850] ss:$20 sps:$4 sm:$0xff]   ;;  %v7318_v21 = vld [vmem:[%s7539_s20 + $0x6c8] ss:$20 sps:$4 sm:$0xff]  }
 0x272   : > { %v2954_v42 = vpop.f32.mrf.mxu0  ;;  %v3371_v57 = vpop.f32.mrf.mxu1 }
 0x273   : > { %v7321_v42 = vld [vmem:[%s7539_s20 + $0x87c] ss:$20 sps:$4 sm:$0xff]  }
 0x274   : > { %v8316_v22 = vpop.f32.mrf.mxu0  ;;  %v8318_v6 = vpop.f32.mrf.mxu1  ;;  %3565 = vmatmul.mubr.bf16.gmra.mxu1 %v7309_v10  ;;  %6759 = vmatmul.mubr.bf16.gmra.mxu0 %v7313_v58  ;;  %v7322_v57 = vld [vmem:[%s7539_s20 + $0x6f0] ss:$20 sps:$4 sm:$0xff]  }
 0x275   : > { %9360 = vst [vmem:[#allocation133_spill] sm:$0xff] %v8316_v22  ;;  %9361 = vst [vmem:[#allocation134_spill] sm:$0xff] %v8318_v6  ;;  %3572 = vmatprep.mubr.bf16.mxu1 %v7316_v31  ;;  %6762 = vmatprep.mubr.bf16.mxu0 %v7317_v41 }
 0x276   : > { %v2959_v56 = vpop.f32.mrf.mxu0  ;;  %v3376_v61 = vpop.f32.mrf.mxu1 }
 0x278   : > { %v8320_v20 = vpop.f32.mrf.mxu0  ;;  %v8322_v40 = vpop.f32.mrf.mxu1 }
 0x279   : > { %9362 = vst [vmem:[#allocation135_spill] sm:$0xff] %v8320_v20  ;;  %9363 = vst [vmem:[#allocation136_spill] sm:$0xff] %v8322_v40  ;;  %v7319_v20 = vld [vmem:[%s7539_s20 + $0x878] ss:$20 sps:$4 sm:$0xff]  }
 0x27a   : > { %v2962_v22 = vpop.f32.mrf.mxu0  ;;  %v3379_v6 = vpop.f32.mrf.mxu1  ;;  %v7323_v40 = vld [vmem:[%s7539_s20 + $0x718] ss:$20 sps:$4 sm:$0xff]  }
 0x27b   : > { %v7326_v22 = vld [vmem:[%s7539_s20 + $0x8a4] ss:$20 sps:$4 sm:$0xff]   ;;  %v7327_v6 = vld [vmem:[%s7539_s20 + $0x740] ss:$20 sps:$4 sm:$0xff]  }
 0x27c   : > { %v8328_v10 = vpop.f32.mrf.mxu0  ;;  %v8330_v58 = vpop.f32.mrf.mxu1  ;;  %3573 = vmatmul.mubr.bf16.gmra.mxu1 %v7314_v54  ;;  %6763 = vmatmul.mubr.bf16.gmra.mxu0 %v7318_v21 }
 0x27d   : > { %9364 = vst [vmem:[#allocation137_spill] sm:$0xff] %v8328_v10  ;;  %9365 = vst [vmem:[#allocation138_spill] sm:$0xff] %v8330_v58  ;;  %3580 = vmatprep.mubr.bf16.mxu1 %v7321_v42  ;;  %6766 = vmatprep.mubr.bf16.mxu0 %v7322_v57 }
 0x27e   : > { %v2967_v31 = vpop.f32.mrf.mxu0  ;;  %v3384_v41 = vpop.f32.mrf.mxu1 }
 0x280   : > { %v8332_v56 = vpop.f32.mrf.mxu0  ;;  %v8334_v61 = vpop.f32.mrf.mxu1 }
 0x281   : > { %9366 = vst [vmem:[#allocation139_spill] sm:$0xff] %v8332_v56  ;;  %9367 = vst [vmem:[#allocation140_spill] sm:$0xff] %v8334_v61  ;;  %v7324_v56 = vld [vmem:[%s7539_s20 + $0x8a0] ss:$20 sps:$4 sm:$0xff]   ;;  %v7328_v61 = vld [vmem:[%s7539_s20 + $0x768] ss:$20 sps:$4 sm:$0xff]  }
 0x282   : > { %v2970_v10 = vpop.f32.mrf.mxu0  ;;  %v3387_v58 = vpop.f32.mrf.mxu1 }
 0x283   : > { %v7331_v10 = vld [vmem:[%s7539_s20 + $0x8cc] ss:$20 sps:$4 sm:$0xff]   ;;  %v7332_v58 = vld [vmem:[%s7539_s20 + $0x790] ss:$20 sps:$4 sm:$0xff]  }
 0x284   : > { %v8340_v54 = vpop.f32.mrf.mxu0  ;;  %v8342_v21 = vpop.f32.mrf.mxu1  ;;  %3581 = vmatmul.mubr.bf16.gmra.mxu1 %v7319_v20  ;;  %6767 = vmatmul.mubr.bf16.gmra.mxu0 %v7323_v40 }
 0x285   : > { %9368 = vst [vmem:[#allocation141_spill] sm:$0xff] %v8340_v54  ;;  %9369 = vst [vmem:[#allocation142_spill] sm:$0xff] %v8342_v21  ;;  %3588 = vmatprep.mubr.bf16.mxu1 %v7326_v22  ;;  %6770 = vmatprep.mubr.bf16.mxu0 %v7327_v6 }
 0x286   : > { %v2975_v42 = vpop.f32.mrf.mxu0  ;;  %v3392_v57 = vpop.f32.mrf.mxu1 }
 0x288   : > { %v8344_v31 = vpop.f32.mrf.mxu0  ;;  %v8346_v41 = vpop.f32.mrf.mxu1 }
 0x289   : > { %9370 = vst [vmem:[#allocation143_spill] sm:$0xff] %v8344_v31  ;;  %9371 = vst [vmem:[#allocation144_spill] sm:$0xff] %v8346_v41  ;;  %v7329_v31 = vld [vmem:[%s7539_s20 + $0x8c8] ss:$20 sps:$4 sm:$0xff]   ;;  %v7333_v41 = vld [vmem:[%s7539_s20 + $0x7b8] ss:$20 sps:$4 sm:$0xff]  }
 0x28a   : > { %v2978_v54 = vpop.f32.mrf.mxu0  ;;  %v3395_v21 = vpop.f32.mrf.mxu1 }
 0x28c   : > { %v8352_v20 = vpop.f32.mrf.mxu0  ;;  %v8354_v40 = vpop.f32.mrf.mxu1  ;;  %3589 = vmatmul.mubr.bf16.gmra.mxu1 %v7324_v56  ;;  %6771 = vmatmul.mubr.bf16.gmra.mxu0 %v7328_v61  ;;  %v8371_v61 = vld [vmem:[%s9227_s2] ss:$0 sm:$0xff] }
 0x28d   : > { %9372 = vst [vmem:[#allocation145_spill] sm:$0xff] %v8352_v20  ;;  %9373 = vst [vmem:[#allocation146_spill] sm:$0xff] %v8354_v40  ;;  %3596 = vmatprep.mubr.bf16.mxu1 %v7331_v10  ;;  %6774 = vmatprep.mubr.bf16.mxu0 %v7332_v58  ;;  %v3159_v20 = vadd.f32 %v7994_v16, %v7797_v26  ;;  %v3151_v10 = vadd.f32 %v7982_v60, %v7785_v1  ;;  %v8378_v26 = vld [vmem:[%s9228_s3] ss:$0 sm:$0xff] }
 0x28e   : > { %v2983_v22 = vpop.f32.mrf.mxu0  ;;  %v3400_v6 = vpop.f32.mrf.mxu1 }
 0x28f   : > { %v3162_v22 = vadd.f32 %v7998_v28, %v7801_v30 }
 0x290   : > { %v8356_v42 = vpop.f32.mrf.mxu0  ;;  %v8358_v57 = vpop.f32.mrf.mxu1 }
 0x291   : > { %9374 = vst [vmem:[#allocation147_spill] sm:$0xff] %v8356_v42  ;;  %v3154_v42 = vadd.f32 %v7986_v45, %v7789_v18  ;;  %v3167_v18 = vadd.f32 %v8006_v9, %v7809_v38  ;;  %v3178_v38 = vadd.f32 %v8022_v34, %v7828_v55 }
 0x292   : > { %v2986_v54 = vpop.f32.mrf.mxu0  ;;  %v3403_v21 = vpop.f32.mrf.mxu1 }
 0x294   : > { %v8366_v40 = vpop.f32.mrf.mxu1  ;;  %3597 = vmatmul.mubr.bf16.gmra.mxu1 %v7329_v31  ;;  %v6680_v56 = vpop.f32.mrf.mxu0  ;;  %6775 = vmatmul.mubr.bf16.gmra.mxu0 %v7333_v41 }
 0x295   : > { %9375 = vst [vmem:[#allocation148_spill] sm:$0xff] %v8366_v40  ;;  %v3704_v58 = vadd.f32 %v6680_v56, %v3159_v20  ;;  %3604 = vmatprep.mubr.bf16.mxu1 %v7336_v11  ;;  %6778 = vmatprep.mubr.bf16.mxu0 %v7337_v46  ;;  %v7334_v11 = vld [vmem:[%s7539_s20 + $0x8f0] ss:$20 sps:$4 sm:$0xff]   ;;  %v7338_v20 = vld [vmem:[%s7539_s20 + $0x808] ss:$20 sps:$4 sm:$0xff]  }
 0x296   : > { %v3408_v16 = vpop.f32.mrf.mxu1  ;;  %v3695_v31 = vpop.f32.mrf.mxu0  ;;  %v7341_v56 = vld [vmem:[%s7539_s20 + $0x91c] ss:$20 sps:$4 sm:$0xff]  }
 0x297   : > { %v4215_v41 = vmul.f32 %v8371_v61, %v3704_v58  ;;  %v3696_v6 = vadd.f32 %v3695_v31, %v3151_v10  ;;  %v7342_v16 = vld [vmem:[%s7539_s20 + $0x830] ss:$20 sps:$4 sm:$0xff]   ;;  %v3175_v10 = vadd.f32 %v8018_v36, %v7824_v51  ;;  %v3170_v51 = vadd.f32 %v8010_v50, %v7816_v43 }
 0x298   : > { %v8383_v1 = vpop.f32.mrf.mxu1  ;;  %v6681_v60 = vpop.f32.mrf.mxu0 }
 0x299   : > { %v4350_v46 = vadd.f32 %v8378_v26, %v4215_v41  ;;  %v4213_v54 = vmul.f32 %v8371_v61, %v3696_v6  ;;  %v3707_v21 = vadd.f32 %v6681_v60, %v3162_v22 }
 0x29a   : > { %v3411_v40 = vpop.f32.mrf.mxu1  ;;  %v3698_v30 = vpop.f32.mrf.mxu0 }
 0x29b   : > { %v4216_v28 = vmul.f32 %v8371_v61, %v3707_v21  ;;  %v4606_v58 = vmul.f32 0.01, %v4350_v46  ;;  %v4348_v31 = vadd.f32 %v8378_v26, %v4213_v54  ;;  %v3699_v41 = vadd.f32 %v3698_v30, %v3154_v42  ;;  %v7343_v30 = vld [vmem:[%s7539_s20 + $0x858] ss:$20 sps:$4 sm:$0xff]  }
 0x29c   : > { %v8398_v6 = vpop.f32.mrf.mxu1  ;;  %3605 = vmatmul.mubr.bf16.gmra.mxu1 %v7334_v11  ;;  %v6684_v22 = vpop.f32.mrf.mxu0  ;;  %6779 = vmatmul.mubr.bf16.gmra.mxu0 %v7338_v20  ;;  %vm4478_vm0 = vcmp.ge.f32.partialorder %v4350_v46, 0.0 }
 0x29d   : > { %v4351_v45 = vadd.f32 %v8378_v26, %v4216_v28  ;;  %3612 = vmatprep.mubr.bf16.mxu1 %v7341_v56  ;;  %6782 = vmatprep.mubr.bf16.mxu0 %v7342_v16  ;;  %v4214_v36 = vmul.f32 %v8371_v61, %v3699_v41  ;;  %v3720_v40 = vadd.f32 %v6684_v22, %v3175_v10  ;;  %v4604_v43 = vmul.f32 0.01, %v4348_v31  ;;  %v7339_v16 = vld [vmem:[%s7539_s20 + $0x918] ss:$20 sps:$4 sm:$0xff]   ;;  %v7347_v41 = vld [vmem:[%s7539_s20 + $0x880] ss:$20 sps:$4 sm:$0xff]  }
 0x29e   : > { %v3416_v42 = vpop.f32.mrf.mxu1  ;;  %v3711_v60 = vpop.f32.mrf.mxu0  ;;  %v4734_v20 = vsel %vm4478_vm0, %v4350_v46, %v4606_v58  ;;  %vm4476_vm2 = vcmp.ge.f32.partialorder %v4348_v31, 0.0  ;;  %v7346_v10 = vld [vmem:[%s7539_s20 + $0x944] ss:$20 sps:$4 sm:$0xff]  }
 0x29f   : > { %vm4479_vm1 = vcmp.ge.f32.partialorder %v4351_v45, 0.0  ;;  %v4607_v9 = vmul.f32 0.01, %v4351_v45  ;;  %v3712_v11 = vadd.f32 %v3711_v60, %v3167_v18  ;;  %v4349_v50 = vadd.f32 %v8378_v26, %v4214_v36 }
 0x2a0   : > { %v4219_v54 = vmul.f32 %v8371_v61, %v3720_v40  ;;  %v8414_v21 = vpop.f32.mrf.mxu1  ;;  %v6685_v56 = vpop.f32.mrf.mxu0  ;;  %v3191_v40 = vadd.f32 %v8042_v44, %v7848_v12  ;;  %v3183_v12 = vadd.f32 %v8030_v5, %v7836_v63  ;;  %v3194_v63 = vadd.f32 %v8046_v32, %v7852_v17 }
 0x2a1   : > { %9376 = vst [vmem:[#allocation149_spill] sm:$0xff] %v8414_v21  ;;  %v4735_v28 = vsel %vm4479_vm1, %v4351_v45, %v4607_v9  ;;  %v4217_v55 = vmul.f32 %v8371_v61, %v3712_v11  ;;  %v3723_v34 = vadd.f32 %v6685_v56, %v3178_v38  ;;  %vm4477_vm3 = vcmp.ge.f32.partialorder %v4349_v50, 0.0 }
 0x2a2   : > { %v6215_v22 = vpack.c.bf16 %v4735_v28, %v4734_v20  ;;  %v4605_v46 = vmul.f32 0.01, %v4349_v50  ;;  %v4354_v58 = vadd.f32 %v8378_v26, %v4219_v54  ;;  %v3419_v18 = vpop.f32.mrf.mxu1  ;;  %v3714_v36 = vpop.f32.mrf.mxu0  ;;  %v4732_v21 = vsel %vm4476_vm2, %v4348_v31, %v4604_v43 }
 0x2a3   : > { %v4220_v42 = vmul.f32 %v8371_v61, %v3723_v34  ;;  %v3715_v60 = vadd.f32 %v3714_v36, %v3170_v51  ;;  %v4352_v38 = vadd.f32 %v8378_v26, %v4217_v55  ;;  %v3186_v20 = vadd.f32 %v8034_v3, %v7840_v4  ;;  %v7348_v34 = vld [vmem:[%s7539_s20 + $0x8a8] ss:$20 sps:$4 sm:$0xff]  }
 0x2a4   : > { %6527 = vst [vmem:[%s8426_s11 + $0x8] sm:$0xff] %v6215_v22   ;;  %v4733_v45 = vsel %vm4477_vm3, %v4349_v50, %v4605_v46  ;;  %v8430_v9 = vpop.f32.mrf.mxu1  ;;  %3613 = vmatmul.mubr.bf16.gmra.mxu1 %v7339_v16  ;;  %v6688_v11 = vpop.f32.mrf.mxu0  ;;  %6783 = vmatmul.mubr.bf16.gmra.mxu0 %v7343_v30  ;;  %v4610_v51 = vmul.f32 0.01, %v4354_v58  ;;  %vm4482_vm4 = vcmp.ge.f32.partialorder %v4354_v58, 0.0  ;;  %v7344_v16 = vld [vmem:[%s7539_s20 + $0x940] ss:$20 sps:$4 sm:$0xff]  }
 0x2a5   : > { %v6210_v44 = vpack.c.bf16 %v4733_v45, %v4732_v21  ;;  %v4355_v31 = vadd.f32 %v8378_v26, %v4220_v42  ;;  %3620 = vmatprep.mubr.bf16.mxu1 %v7346_v10  ;;  %6786 = vmatprep.mubr.bf16.mxu0 %v7347_v41  ;;  %v4218_v43 = vmul.f32 %v8371_v61, %v3715_v60  ;;  %vm4480_vm6 = vcmp.ge.f32.partialorder %v4352_v38, 0.0  ;;  %v7351_v22 = vld [vmem:[%s7539_s20 + $0x96c] ss:$20 sps:$4 sm:$0xff]   ;;  %v7352_v46 = vld [vmem:[%s7539_s20 + $0x8d0] ss:$20 sps:$4 sm:$0xff]  }
 0x2a6   : > { %v3736_v50 = vadd.f32 %v6688_v11, %v3191_v40  ;;  %v3424_v54 = vpop.f32.mrf.mxu1  ;;  %v3727_v56 = vpop.f32.mrf.mxu0  ;;  %v4608_v30 = vmul.f32 0.01, %v4352_v38  ;;  %v4738_v10 = vsel %vm4482_vm4, %v4354_v58, %v4610_v51  ;;  %v3207_v45 = vadd.f32 %v8066_v52, %v7872_v47 }
 0x2a7   : > { %6211 = vst [vmem:[%s8426_s11] sm:$0xff] %v6210_v44   ;;  %vm4483_vm5 = vcmp.ge.f32.partialorder %v4355_v31, 0.0  ;;  %v4611_v5 = vmul.f32 0.01, %v4355_v31  ;;  %v3728_v21 = vadd.f32 %v3727_v56, %v3183_v12  ;;  %v4353_v4 = vadd.f32 %v8378_v26, %v4218_v43 }
 0x2a8   : > { %v4223_v3 = vmul.f32 %v8371_v61, %v3736_v50  ;;  %v8444_v28 = vpop.f32.mrf.mxu1  ;;  %v6689_v55 = vpop.f32.mrf.mxu0  ;;  %v4736_v12 = vsel %vm4480_vm6, %v4352_v38, %v4608_v30  ;;  %v3199_v50 = vadd.f32 %v8054_v19, %v7860_v29  ;;  %v3202_v38 = vadd.f32 %v8058_v0, %v7864_v35 }
 0x2a9   : > { %v4739_v17 = vsel %vm4483_vm5, %v4355_v31, %v4611_v5  ;;  %v4221_v32 = vmul.f32 %v8371_v61, %v3728_v21  ;;  %v3739_v41 = vadd.f32 %v6689_v55, %v3194_v63  ;;  %vm4481_vm7 = vcmp.ge.f32.partialorder %v4353_v4, 0.0  ;;  %v7353_v55 = vld [vmem:[%s7539_s20 + $0x8f8] ss:$20 sps:$4 sm:$0xff]  }
 0x2aa   : > { %v6225_v18 = vpack.c.bf16 %v4739_v17, %v4738_v10  ;;  %v4609_v36 = vmul.f32 0.01, %v4353_v4  ;;  %v4358_v40 = vadd.f32 %v8378_v26, %v4223_v3  ;;  %v3427_v42 = vpop.f32.mrf.mxu1  ;;  %v3730_v60 = vpop.f32.mrf.mxu0  ;;  %v3210_v29 = vadd.f32 %v8070_v39, %v7876_v53  ;;  %v7356_v17 = vld [vmem:[%s7539_s20 + $0x994] ss:$20 sps:$4 sm:$0xff]  }
 0x2ab   : > { %v4224_v11 = vmul.f32 %v8371_v61, %v3739_v41  ;;  %v3731_v58 = vadd.f32 %v3730_v60, %v3186_v20  ;;  %v4356_v51 = vadd.f32 %v8378_v26, %v4221_v32  ;;  %v7357_v32 = vld [vmem:[%s7539_s20 + $0x920] ss:$20 sps:$4 sm:$0xff]   ;;  %v3223_v42 = vadd.f32 %v8090_v13, %v7896_v23 }
 0x2ac   : > { %6529 = vst [vmem:[%s8426_s11 + $0x18] sm:$0xff] %v6225_v18   ;;  %v4737_v44 = vsel %vm4481_vm7, %v4353_v4, %v4609_v36  ;;  %v8458_v31 = vpop.f32.mrf.mxu1  ;;  %3621 = vmatmul.mubr.bf16.gmra.mxu1 %v7344_v16  ;;  %v6692_v43 = vpop.f32.mrf.mxu0  ;;  %6787 = vmatmul.mubr.bf16.gmra.mxu0 %v7348_v34  ;;  %v4614_v47 = vmul.f32 0.01, %v4358_v40  ;;  %vm4486_vm8 = vcmp.ge.f32.partialorder %v4358_v40, 0.0  ;;  %v7349_v16 = vld [vmem:[%s7539_s20 + $0x968] ss:$20 sps:$4 sm:$0xff]  }
 0x2ad   : > { %v6220_v54 = vpack.c.bf16 %v4737_v44, %v4736_v12  ;;  %v4359_v52 = vadd.f32 %v8378_v26, %v4224_v11  ;;  %3628 = vmatprep.mubr.bf16.mxu1 %v7351_v22  ;;  %6790 = vmatprep.mubr.bf16.mxu0 %v7352_v46  ;;  %v4222_v20 = vmul.f32 %v8371_v61, %v3731_v58  ;;  %vm4484_vm10 = vcmp.ge.f32.partialorder %v4356_v51, 0.0 }
 0x2ae   : > { %v3752_v56 = vadd.f32 %v6692_v43, %v3207_v45  ;;  %v3432_v63 = vpop.f32.mrf.mxu1  ;;  %v3743_v5 = vpop.f32.mrf.mxu0  ;;  %v4612_v30 = vmul.f32 0.01, %v4356_v51  ;;  %v4742_v34 = vsel %vm4486_vm8, %v4358_v40, %v4614_v47  ;;  %v3215_v43 = vadd.f32 %v8078_v7, %v7884_v2 }
 0x2af   : > { %6528 = vst [vmem:[%s8426_s11 + $0x10] sm:$0xff] %v6220_v54   ;;  %vm4487_vm9 = vcmp.ge.f32.partialorder %v4359_v52, 0.0  ;;  %v4615_v19 = vmul.f32 0.01, %v4359_v52  ;;  %v3744_v21 = vadd.f32 %v3743_v5, %v3199_v50  ;;  %v4357_v35 = vadd.f32 %v8378_v26, %v4222_v20 }
 0x2b0   : > { %v4227_v0 = vmul.f32 %v8371_v61, %v3752_v56  ;;  %v8472_v4 = vpop.f32.mrf.mxu1  ;;  %v6693_v3 = vpop.f32.mrf.mxu0  ;;  %v4740_v45 = vsel %vm4484_vm10, %v4356_v51, %v4612_v30  ;;  %v3218_v51 = vadd.f32 %v8082_v15, %v7888_v8  ;;  %v3226_v2 = vadd.f32 %v8094_v27, %v7900_v33  ;;  %v7354_v56 = vld [vmem:[%s7539_s20 + $0x990] ss:$20 sps:$4 sm:$0xff]  }
 0x2b1   : > { %v4743_v53 = vsel %vm4487_vm9, %v4359_v52, %v4615_v19  ;;  %v4225_v39 = vmul.f32 %v8371_v61, %v3744_v21  ;;  %v3755_v10 = vadd.f32 %v6693_v3, %v3210_v29  ;;  %vm4485_vm11 = vcmp.ge.f32.partialorder %v4357_v35, 0.0  ;;  %v7358_v19 = vld [vmem:[%s7539_s20 + $0x948] ss:$20 sps:$4 sm:$0xff]  }
 0x2b2   : > { %v6235_v41 = vpack.c.bf16 %v4743_v53, %v4742_v34  ;;  %v4613_v22 = vmul.f32 0.01, %v4357_v35  ;;  %v4362_v46 = vadd.f32 %v8378_v26, %v4227_v0  ;;  %v3435_v18 = vpop.f32.mrf.mxu1  ;;  %v3746_v36 = vpop.f32.mrf.mxu0  ;;  %v7361_v30 = vld [vmem:[%s7539_s20 + $0x9bc] ss:$20 sps:$4 sm:$0xff]  }
 0x2b3   : > { %v4228_v60 = vmul.f32 %v8371_v61, %v3755_v10  ;;  %v3747_v40 = vadd.f32 %v3746_v36, %v3202_v38  ;;  %v4360_v58 = vadd.f32 %v8378_v26, %v4225_v39  ;;  %v3239_v39 = vadd.f32 %v8114_v24, %v7920_v14 }
 0x2b4   : > { %6531 = vst [vmem:[%s8426_s11 + $0x28] sm:$0xff] %v6235_v41   ;;  %v4741_v11 = vsel %vm4485_vm11, %v4357_v35, %v4613_v22  ;;  %v8486_v12 = vpop.f32.mrf.mxu1  ;;  %3629 = vmatmul.mubr.bf16.gmra.mxu1 %v7349_v16  ;;  %v6696_v44 = vpop.f32.mrf.mxu0  ;;  %6791 = vmatmul.mubr.bf16.gmra.mxu0 %v7353_v55  ;;  %v4618_v23 = vmul.f32 0.01, %v4362_v46  ;;  %vm4490_vm12 = vcmp.ge.f32.partialorder %v4362_v46, 0.0  ;;  %v7362_v35 = vld [vmem:[%s7539_s20 + $0x970] ss:$20 sps:$4 sm:$0xff]   ;;  %v3231_v36 = vadd.f32 %v8102_v37, %v7908_v49 }
 0x2b5   : > { %v6230_v50 = vpack.c.bf16 %v4741_v11, %v4740_v45  ;;  %v4363_v13 = vadd.f32 %v8378_v26, %v4228_v60  ;;  %3636 = vmatprep.mubr.bf16.mxu1 %v7356_v17  ;;  %6794 = vmatprep.mubr.bf16.mxu0 %v7357_v32  ;;  %v4226_v54 = vmul.f32 %v8371_v61, %v3747_v40  ;;  %vm4488_vm14 = vcmp.ge.f32.partialorder %v4360_v58, 0.0 }
 0x2b6   : > { %v3768_v47 = vadd.f32 %v6696_v44, %v3223_v42  ;;  %v3440_v52 = vpop.f32.mrf.mxu1  ;;  %v3759_v38 = vpop.f32.mrf.mxu0  ;;  %v4616_v63 = vmul.f32 0.01, %v4360_v58  ;;  %v4746_v21 = vsel %vm4490_vm12, %v4362_v46, %v4618_v23  ;;  %v3234_v60 = vadd.f32 %v8106_v62, %v7912_v59 }
 0x2b7   : > { %6530 = vst [vmem:[%s8426_s11 + $0x20] sm:$0xff] %v6230_v50   ;;  %vm4491_vm13 = vcmp.ge.f32.partialorder %v4363_v13, 0.0  ;;  %v4619_v7 = vmul.f32 0.01, %v4363_v13  ;;  %v3760_v20 = vadd.f32 %v3759_v38, %v3215_v43  ;;  %v4361_v8 = vadd.f32 %v8378_v26, %v4226_v54  ;;  %v7359_v43 = vld [vmem:[%s7539_s20 + $0x9b8] ss:$20 sps:$4 sm:$0xff]  }
 0x2b8   : > { %v4231_v15 = vmul.f32 %v8371_v61, %v3768_v47  ;;  %v8500_v5 = vpop.f32.mrf.mxu1  ;;  %v6697_v29 = vpop.f32.mrf.mxu0  ;;  %v4744_v32 = vsel %vm4488_vm14, %v4360_v58, %v4616_v63  ;;  %v3242_v49 = vadd.f32 %v8118_v48, %v7924_v25  ;;  %v7366_v52 = vld [vmem:[%s7539_s20 + $0x9e4] ss:$20 sps:$4 sm:$0xff]   ;;  %v7367_v38 = vld [vmem:[%s7539_s20 + $0x9c0] ss:$20 sps:$4 sm:$0xff]  }
 0x2b9   : > { %v4747_v33 = vsel %vm4491_vm13, %v4363_v13, %v4619_v7  ;;  %v4229_v27 = vmul.f32 %v8371_v61, %v3760_v20  ;;  %v3771_v16 = vadd.f32 %v6697_v29, %v3226_v2  ;;  %vm4489_vm15 = vcmp.ge.f32.partialorder %v4361_v8, 0.0 }
 0x2ba   : > { %v6245_v0 = vpack.c.bf16 %v4747_v33, %v4746_v21  ;;  %v4617_v3 = vmul.f32 0.01, %v4361_v8  ;;  %v4366_v55 = vadd.f32 %v8378_v26, %v4231_v15  ;;  %v3443_v34 = vpop.f32.mrf.mxu1  ;;  %v3762_v53 = vpop.f32.mrf.mxu0  ;;  %v9378_v15 = vld [vmem:[#allocation74_spill] sm:$0xff] }
 0x2bb   : > { %v4232_v10 = vmul.f32 %v8371_v61, %v3771_v16  ;;  %v3763_v17 = vadd.f32 %v3762_v53, %v3218_v51  ;;  %v4364_v22 = vadd.f32 %v8378_v26, %v4229_v27  ;;  %v7363_v51 = vld [vmem:[%s7539_s20 + $0x998] ss:$20 sps:$4 sm:$0xff]  }
 0x2bc   : > { %6533 = vst [vmem:[%s8426_s11 + $0x38] sm:$0xff] %v6245_v0   ;;  %v4745_v41 = vsel %vm4489_vm15, %v4361_v8, %v4617_v3  ;;  %v8514_v46 = vpop.f32.mrf.mxu1  ;;  %3637 = vmatmul.mubr.bf16.gmra.mxu1 %v7354_v56  ;;  %v6700_v18 = vpop.f32.mrf.mxu0  ;;  %6795 = vmatmul.mubr.bf16.gmra.mxu0 %v7358_v19  ;;  %v4622_v14 = vmul.f32 0.01, %v4366_v55  ;;  %vm4494_vm0 = vcmp.ge.f32.partialorder %v4366_v55, 0.0  ;;  %v9377_v8 = vld [vmem:[#allocation33_spill] sm:$0xff]  ;;  %v9380_v3 = vld [vmem:[#allocation70_spill] sm:$0xff] }
 0x2bd   : > { %v6240_v42 = vpack.c.bf16 %v4745_v41, %v4744_v32  ;;  %v4367_v24 = vadd.f32 %v8378_v26, %v4232_v10  ;;  %3644 = vmatprep.mubr.bf16.mxu1 %v7361_v30  ;;  %6798 = vmatprep.mubr.bf16.mxu0 %v7362_v35  ;;  %v4230_v40 = vmul.f32 %v8371_v61, %v3763_v17  ;;  %vm4492_vm2 = vcmp.ge.f32.partialorder %v4364_v22, 0.0  ;;  %v9379_v0 = vld [vmem:[#allocation29_spill] sm:$0xff]  ;;  %v9381_v10 = vld [vmem:[#allocation31_spill] sm:$0xff]  ;;  %v9382_v17 = vld [vmem:[#allocation72_spill] sm:$0xff] }
 0x2be   : > { %v3784_v45 = vadd.f32 %v6700_v18, %v3239_v39  ;;  %v3448_v11 = vpop.f32.mrf.mxu1  ;;  %v3775_v58 = vpop.f32.mrf.mxu0  ;;  %v4620_v50 = vmul.f32 0.01, %v4364_v22  ;;  %v4750_v54 = vsel %vm4494_vm0, %v4366_v55, %v4622_v14  ;;  %v3255_v29 = vadd.f32 %v9378_v15, %v9377_v8  ;;  %v9384_v14 = vld [vmem:[#allocation76_spill] sm:$0xff] }
 0x2bf   : > { %6532 = vst [vmem:[%s8426_s11 + $0x30] sm:$0xff] %v6240_v42   ;;  %vm4495_vm1 = vcmp.ge.f32.partialorder %v4367_v24, 0.0  ;;  %v4623_v37 = vmul.f32 0.01, %v4367_v24  ;;  %v3776_v44 = vadd.f32 %v3775_v58, %v3231_v36  ;;  %v4365_v59 = vadd.f32 %v8378_v26, %v4230_v40  ;;  %v9383_v42 = vld [vmem:[#allocation35_spill] sm:$0xff] }
 0x2c0   : > { %v4235_v62 = vmul.f32 %v8371_v61, %v3784_v45  ;;  %v8528_v23 = vpop.f32.mrf.mxu1  ;;  %v6701_v13 = vpop.f32.mrf.mxu0  ;;  %v4748_v33 = vsel %vm4492_vm2, %v4364_v22, %v4620_v50  ;;  %v3247_v55 = vadd.f32 %v9380_v3, %v9379_v0  ;;  %v3250_v32 = vadd.f32 %v9382_v17, %v9381_v10  ;;  %v7364_v45 = vld [vmem:[%s7539_s20 + $0x9e0] ss:$20 sps:$4 sm:$0xff]  }
 0x2c1   : > { %v4751_v25 = vsel %vm4495_vm1, %v4367_v24, %v4623_v37  ;;  %v4233_v48 = vmul.f32 %v8371_v61, %v3776_v44  ;;  %v3787_v47 = vadd.f32 %v6701_v13, %v3242_v49  ;;  %vm4493_vm3 = vcmp.ge.f32.partialorder %v4365_v59, 0.0  ;;  %v9389_v3 = vld [vmem:[#allocation39_spill] sm:$0xff] }
 0x2c2   : > { %v6255_v2 = vpack.c.bf16 %v4751_v25, %v4750_v54  ;;  %v4621_v7 = vmul.f32 0.01, %v4365_v59  ;;  %v4370_v20 = vadd.f32 %v8378_v26, %v4235_v62  ;;  %v3451_v56 = vpop.f32.mrf.mxu1  ;;  %v3778_v63 = vpop.f32.mrf.mxu0  ;;  %v3258_v24 = vadd.f32 %v9384_v14, %v9383_v42  ;;  %v9391_v17 = vld [vmem:[#allocation43_spill] sm:$0xff] }
 0x2c3   : > { %v4236_v19 = vmul.f32 %v8371_v61, %v3787_v47  ;;  %v3779_v21 = vadd.f32 %v3778_v63, %v3234_v60  ;;  %v4368_v16 = vadd.f32 %v8378_v26, %v4233_v48 }
 0x2c4   : > { %6535 = vst [vmem:[%s8426_s11 + $0x48] sm:$0xff] %v6255_v2   ;;  %v4749_v27 = vsel %vm4493_vm3, %v4365_v59, %v4621_v7  ;;  %v8542_v30 = vpop.f32.mrf.mxu1  ;;  %3645 = vmatmul.mubr.bf16.gmra.mxu1 %v7359_v43  ;;  %v6704_v35 = vpop.f32.mrf.mxu0  ;;  %6799 = vmatmul.mubr.bf16.gmra.mxu0 %v7363_v51  ;;  %v4626_v53 = vmul.f32 0.01, %v4370_v20  ;;  %vm4498_vm4 = vcmp.ge.f32.partialorder %v4370_v20, 0.0  ;;  %v7368_v43 = vld [vmem:[%s7539_s20 + $0x9e8] ss:$20 sps:$4 sm:$0xff]  }
 0x2c5   : > { %v6250_v34 = vpack.c.bf16 %v4749_v27, %v4748_v33  ;;  %v4371_v39 = vadd.f32 %v8378_v26, %v4236_v19  ;;  %3652 = vmatprep.mubr.bf16.mxu1 %v7366_v52  ;;  %6802 = vmatprep.mubr.bf16.mxu0 %v7367_v38  ;;  %v4234_v41 = vmul.f32 %v8371_v61, %v3779_v21  ;;  %vm4496_vm6 = vcmp.ge.f32.partialorder %v4368_v16, 0.0  ;;  %v9385_v52 = vld [vmem:[#allocation41_spill] sm:$0xff]  ;;  %v9386_v38 = vld [vmem:[#allocation82_spill] sm:$0xff]  ;;  %s7377_s20 = sshll.u32 %s7436_s10, 4  ;;  %s7378_s20 = int_to_ptr.vmem [resolvable:$false] %s7377_s20 }
 0x2c6   : > { %v3800_v22 = vadd.f32 %v6704_v35, %v3255_v29  ;;  %v3456_v18 = vpop.f32.mrf.mxu1  ;;  %v3791_v36 = vpop.f32.mrf.mxu0  ;;  %v4624_v11 = vmul.f32 0.01, %v4368_v16  ;;  %v4754_v50 = vsel %vm4498_vm4, %v4370_v20, %v4626_v53  ;;  %v3271_v2 = vadd.f32 %v9386_v38, %v9385_v52  ;;  %v9387_v19 = vld [vmem:[#allocation37_spill] sm:$0xff]  ;;  %v9388_v21 = vld [vmem:[#allocation78_spill] sm:$0xff]  ;;  %s7379_s12 = scalar_lea.vmem %s7378_s20, 16384  ;;  %p7380_p0 = scmp.lt.s32.totalorder %s9179_s30, %s7378_s20 }
 0x2c7   : > { %6534 = vst [vmem:[%s8426_s11 + $0x40] sm:$0xff] %v6250_v34   ;;  %vm4499_vm5 = vcmp.ge.f32.partialorder %v4371_v39, 0.0  ;;  %v4627_v60 = vmul.f32 0.01, %v4371_v39  ;;  %v3792_v40 = vadd.f32 %v3791_v36, %v3247_v55  ;;  %v4369_v58 = vadd.f32 %v8378_v26, %v4234_v41  ;;  %v9390_v55 = vld [vmem:[#allocation80_spill] sm:$0xff]  ;;  %p7381_p1 = scmp.lt.s32.totalorder %s7379_s12, %s7373_s8 }
 0x2c8   : > { %v4239_v49 = vmul.f32 %v8371_v61, %v3800_v22  ;;  %v8556_v37 = vpop.f32.mrf.mxu1  ;;  %v6705_v44 = vpop.f32.mrf.mxu0  ;;  %v4752_v63 = vsel %vm4496_vm6, %v4368_v16, %v4624_v11  ;;  %v3263_v33 = vadd.f32 %v9388_v21, %v9387_v19  ;;  %v3266_v16 = vadd.f32 %v9390_v55, %v9389_v3  ;;  %v9397_v21 = vld [vmem:[#allocation46_spill] sm:$0xff]  ;;  %v9399_v55 = vld [vmem:[#allocation48_spill] sm:$0xff] }
 0x2c9   : > { %v4755_v59 = vsel %vm4499_vm5, %v4371_v39, %v4627_v60  ;;  %v4237_v62 = vmul.f32 %v8371_v61, %v3792_v40  ;;  %v3803_v13 = vadd.f32 %v6705_v44, %v3258_v24  ;;  %vm4497_vm7 = vcmp.ge.f32.partialorder %v4369_v58, 0.0  ;;  %p7382_p2 = por %p7381_p1, %p7380_p0 }
 0x2ca   : > { %v6265_v51 = vpack.c.bf16 %v4755_v59, %v4754_v50  ;;  %v4625_v54 = vmul.f32 0.01, %v4369_v58  ;;  %v4374_v25 = vadd.f32 %v8378_v26, %v4239_v49  ;;  %v3459_v48 = vpop.f32.mrf.mxu1  ;;  %v3794_v47 = vpop.f32.mrf.mxu0 }
 0x2cb   : > { %v4240_v7 = vmul.f32 %v8371_v61, %v3803_v13  ;;  %v3795_v56 = vadd.f32 %v3794_v47, %v3250_v32  ;;  %v4372_v8 = vadd.f32 %v8378_v26, %v4237_v62  ;;  %v9392_v32 = vld [vmem:[#allocation84_spill] sm:$0xff]  ;;  %p7383_p3 = pnand %p7382_p2, %p7376_p13 }
 0x2cc   : > { %6537 = vst [vmem:[%s8426_s11 + $0x58] sm:$0xff] %v6265_v51   ;;  %v4753_v20 = vsel %vm4497_vm7, %v4369_v58, %v4625_v54  ;;  %v8568_v15 = vpop.f32.mrf.mxu1  ;;  %3653 = vmatmul.mubr.bf16.gmra.mxu1 %v7364_v45  ;;  %v6708_v29 = vpop.f32.mrf.mxu0  ;;  %6803 = vmatmul.mubr.bf16.gmra.mxu0 %v7368_v43  ;;  %v4630_v35 = vmul.f32 0.01, %v4374_v25  ;;  %vm4502_vm8 = vcmp.ge.f32.partialorder %v4374_v25, 0.0  ;;  %v3274_v41 = vadd.f32 %v9392_v32, %v9391_v17  ;;  %v9393_v51 = vld [vmem:[#allocation47_spill] sm:$0xff]  ;;  %v9394_v54 = vld [vmem:[#allocation90_spill] sm:$0xff] }
 0x2cd   : > { %v6260_v27 = vpack.c.bf16 %v4753_v20, %v4752_v63  ;;  %v4375_v0 = vadd.f32 %v8378_v26, %v4240_v7  ;;  %v4238_v34 = vmul.f32 %v8371_v61, %v3795_v56  ;;  %v3816_v53 = vadd.f32 %v6708_v29, %v3271_v2  ;;  %v9395_v7 = vld [vmem:[#allocation45_spill] sm:$0xff]  ;;  %v9396_v56 = vld [vmem:[#allocation86_spill] sm:$0xff] }
 0x2ce   : > { %v3464_v39 = vpop.f32.mrf.mxu1  ;;  %v3807_v10 = vpop.f32.mrf.mxu0  ;;  %vm4500_vm10 = vcmp.ge.f32.partialorder %v4372_v8, 0.0  ;;  %v4628_v36 = vmul.f32 0.01, %v4372_v8  ;;  %v4758_v40 = vsel %vm4502_vm8, %v4374_v25, %v4630_v35  ;;  %v3287_v48 = vadd.f32 %v9394_v54, %v9393_v51 }
 0x2cf   : > { %6536 = vst [vmem:[%s8426_s11 + $0x50] sm:$0xff] %v6260_v27   ;;  %vm4503_vm9 = vcmp.ge.f32.partialorder %v4375_v0, 0.0  ;;  %v4631_v22 = vmul.f32 0.01, %v4375_v0  ;;  %v3808_v18 = vadd.f32 %v3807_v10, %v3263_v33  ;;  %v4373_v42 = vadd.f32 %v8378_v26, %v4238_v34  ;;  %v9398_v33 = vld [vmem:[#allocation88_spill] sm:$0xff] }
 0x2d0   : > { %v4243_v14 = vmul.f32 %v8371_v61, %v3816_v53  ;;  %v8581_v24 = vpop.f32.mrf.mxu1  ;;  %v6709_v60 = vpop.f32.mrf.mxu0  ;;  %v4756_v47 = vsel %vm4500_vm10, %v4372_v8, %v4628_v36  ;;  %v3279_v63 = vadd.f32 %v9396_v56, %v9395_v7  ;;  %v3282_v27 = vadd.f32 %v9398_v33, %v9397_v21 }
 0x2d1   : > { %v4759_v45 = vsel %vm4503_vm9, %v4375_v0, %v4631_v22  ;;  %v4241_v11 = vmul.f32 %v8371_v61, %v3808_v18  ;;  %v3819_v58 = vadd.f32 %v6709_v60, %v3274_v41  ;;  %vm4501_vm11 = vcmp.ge.f32.partialorder %v4373_v42, 0.0 }
 0x2d2   : > { %v6275_v49 = vpack.c.bf16 %v4759_v45, %v4758_v40  ;;  %v4629_v44 = vmul.f32 0.01, %v4373_v42  ;;  %v4378_v43 = vadd.f32 %v8378_v26, %v4243_v14  ;;  %v3467_v50 = vpop.f32.mrf.mxu1  ;;  %v3810_v59 = vpop.f32.mrf.mxu0 }
 0x2d3   : > { %v4244_v62 = vmul.f32 %v8371_v61, %v3819_v58  ;;  %v3811_v13 = vadd.f32 %v3810_v59, %v3266_v16  ;;  %v4376_v52 = vadd.f32 %v8378_v26, %v4241_v11  ;;  %v9400_v16 = vld [vmem:[#allocation92_spill] sm:$0xff]  ;;  %v9401_v50 = vld [vmem:[#allocation51_spill] sm:$0xff]  ;;  %v9402_v59 = vld [vmem:[#allocation98_spill] sm:$0xff] }
 0x2d4   : > { %6539 = vst [vmem:[%s8426_s11 + $0x68] sm:$0xff] %v6275_v49   ;;  %v4757_v25 = vsel %vm4501_vm11, %v4373_v42, %v4629_v44  ;;  %v8592_v38 = vpop.f32.mrf.mxu1  ;;  %v6712_v2 = vpop.f32.mrf.mxu0  ;;  %v4634_v29 = vmul.f32 0.01, %v4378_v43  ;;  %vm4506_vm12 = vcmp.ge.f32.partialorder %v4378_v43, 0.0  ;;  %v3290_v34 = vadd.f32 %v9400_v16, %v9399_v55 }
 0x2d5   : > { %v6270_v20 = vpack.c.bf16 %v4757_v25, %v4756_v47  ;;  %v4379_v19 = vadd.f32 %v8378_v26, %v4244_v62  ;;  %v4242_v8 = vmul.f32 %v8371_v61, %v3811_v13  ;;  %v3832_v35 = vadd.f32 %v6712_v2, %v3287_v48  ;;  %v9403_v47 = vld [vmem:[#allocation49_spill] sm:$0xff]  ;;  %v9404_v25 = vld [vmem:[#allocation94_spill] sm:$0xff] }
 0x2d6   : > { %v3472_v0 = vpop.f32.mrf.mxu1  ;;  %v3823_v3 = vpop.f32.mrf.mxu0  ;;  %vm4504_vm14 = vcmp.ge.f32.partialorder %v4376_v52, 0.0  ;;  %v4632_v10 = vmul.f32 0.01, %v4376_v52  ;;  %v4762_v18 = vsel %vm4506_vm12, %v4378_v43, %v4634_v29  ;;  %v3303_v62 = vadd.f32 %v9402_v59, %v9401_v50  ;;  %v9406_v29 = vld [vmem:[#allocation96_spill] sm:$0xff] }
 0x2d7   : > { %6538 = vst [vmem:[%s8426_s11 + $0x60] sm:$0xff] %v6270_v20   ;;  %vm4507_vm13 = vcmp.ge.f32.partialorder %v4379_v19, 0.0  ;;  %v4635_v53 = vmul.f32 0.01, %v4379_v19  ;;  %v3824_v39 = vadd.f32 %v3823_v3, %v3279_v63  ;;  %v4377_v17 = vadd.f32 %v8378_v26, %v4242_v8  ;;  %v9405_v20 = vld [vmem:[#allocation50_spill] sm:$0xff]  ;;  %v9407_v8 = vld [vmem:[#allocation52_spill] sm:$0xff] }
 0x2d8   : > { %v4247_v32 = vmul.f32 %v8371_v61, %v3832_v35  ;;  %v8605_v41 = vpop.f32.mrf.mxu1  ;;  %v6713_v22 = vpop.f32.mrf.mxu0  ;;  %v4760_v13 = vsel %vm4504_vm14, %v4376_v52, %v4632_v10  ;;  %v3295_v2 = vadd.f32 %v9404_v25, %v9403_v47  ;;  %v9408_v35 = vld [vmem:[#allocation100_spill] sm:$0xff]  ;;  %v9412_v47 = vld [vmem:[#allocation102_spill] sm:$0xff] }
 0x2d9   : > { %v4763_v36 = vsel %vm4507_vm13, %v4379_v19, %v4635_v53  ;;  %v4245_v42 = vmul.f32 %v8371_v61, %v3824_v39  ;;  %v3835_v14 = vadd.f32 %v6713_v22, %v3290_v34  ;;  %vm4505_vm15 = vcmp.ge.f32.partialorder %v4377_v17, 0.0 }
 0x2da   : > { %v6285_v60 = vpack.c.bf16 %v4763_v36, %v4762_v18  ;;  %v4633_v40 = vmul.f32 0.01, %v4377_v17  ;;  %v4382_v45 = vadd.f32 %v8378_v26, %v4247_v32  ;;  %v3475_v11 = vpop.f32.mrf.mxu1  ;;  %v3826_v58 = vpop.f32.mrf.mxu0  ;;  %v3298_v19 = vadd.f32 %v9406_v29, %v9405_v20  ;;  %v9414_v20 = vld [vmem:[#allocation104_spill] sm:$0xff] }
 0x2db   : > { %v4248_v49 = vmul.f32 %v8371_v61, %v3835_v14  ;;  %v3827_v44 = vadd.f32 %v3826_v58, %v3282_v27  ;;  %v4380_v51 = vadd.f32 %v8378_v26, %v4245_v42  ;;  %v3306_v0 = vadd.f32 %v9408_v35, %v9407_v8 }
 0x2dc   : > { %6541 = vst [vmem:[%s8426_s11 + $0x78] sm:$0xff] %v6285_v60   ;;  %v4761_v43 = vsel %vm4505_vm15, %v4377_v17, %v4633_v40  ;;  %v8616_v54 = vpop.f32.mrf.mxu1  ;;  %v6716_v48 = vpop.f32.mrf.mxu0  ;;  %v4638_v56 = vmul.f32 0.01, %v4382_v45  ;;  %vm4510_vm0 = vcmp.ge.f32.partialorder %v4382_v45, 0.0 }
 0x2dd   : > { %v6280_v7 = vpack.c.bf16 %v4761_v43, %v4760_v13  ;;  %v4383_v63 = vadd.f32 %v8378_v26, %v4248_v49  ;;  %v4246_v52 = vmul.f32 %v8371_v61, %v3827_v44  ;;  %v3848_v21 = vadd.f32 %v6716_v48, %v3303_v62  ;;  %v9409_v49 = vld [vmem:[#allocation55_spill] sm:$0xff]  ;;  %v9410_v44 = vld [vmem:[#allocation106_spill] sm:$0xff]  ;;  %v9411_v48 = vld [vmem:[#allocation53_spill] sm:$0xff] }
 0x2de   : > { %v3480_v33 = vpop.f32.mrf.mxu1  ;;  %v3839_v27 = vpop.f32.mrf.mxu0  ;;  %vm4508_vm2 = vcmp.ge.f32.partialorder %v4380_v51, 0.0  ;;  %v4636_v16 = vmul.f32 0.01, %v4380_v51  ;;  %v4766_v17 = vsel %vm4510_vm0, %v4382_v45, %v4638_v56  ;;  %v3319_v50 = vadd.f32 %v9410_v44, %v9409_v49  ;;  %v9417_v49 = vld [vmem:[#allocation59_spill] sm:$0xff]  ;;  %v9418_v44 = vld [vmem:[#allocation114_spill] sm:$0xff] }
 0x2df   : > { %6540 = vst [vmem:[%s8426_s11 + $0x70] sm:$0xff] %v6280_v7   ;;  %vm4511_vm1 = vcmp.ge.f32.partialorder %v4383_v63, 0.0  ;;  %v4639_v3 = vmul.f32 0.01, %v4383_v63  ;;  %v3840_v55 = vadd.f32 %v3839_v27, %v3295_v2  ;;  %v4381_v34 = vadd.f32 %v8378_v26, %v4246_v52  ;;  %v9415_v33 = vld [vmem:[#allocation56_spill] sm:$0xff] }
 0x2e0   : > { %v4251_v53 = vmul.f32 %v8371_v61, %v3848_v21  ;;  %v8629_v39 = vpop.f32.mrf.mxu1  ;;  %v6717_v10 = vpop.f32.mrf.mxu0  ;;  %v4764_v59 = vsel %vm4508_vm2, %v4380_v51, %v4636_v16  ;;  %v3311_v25 = vadd.f32 %v9412_v47, %v9411_v48  ;;  %v9416_v27 = vld [vmem:[#allocation108_spill] sm:$0xff]  ;;  %v9419_v47 = vld [vmem:[#allocation57_spill] sm:$0xff] }
 0x2e1   : > { %v4767_v32 = vsel %vm4511_vm1, %v4383_v63, %v4639_v3  ;;  %v4249_v22 = vmul.f32 %v8371_v61, %v3840_v55  ;;  %v3851_v18 = vadd.f32 %v6717_v10, %v3306_v0  ;;  %vm4509_vm3 = vcmp.ge.f32.partialorder %v4381_v34, 0.0  ;;  %v9413_v63 = vld [vmem:[#allocation54_spill] sm:$0xff] }
 0x2e2   : > { %v6295_v36 = vpack.c.bf16 %v4767_v32, %v4766_v17  ;;  %v4637_v42 = vmul.f32 0.01, %v4381_v34  ;;  %v4386_v14 = vadd.f32 %v8378_v26, %v4251_v53  ;;  %v3483_v60 = vpop.f32.mrf.mxu1  ;;  %v3842_v40 = vpop.f32.mrf.mxu0  ;;  %v3314_v29 = vadd.f32 %v9414_v20, %v9413_v63  ;;  %v9421_v20 = vld [vmem:[#allocation58_spill] sm:$0xff] }
 0x2e3   : > { %v4252_v11 = vmul.f32 %v8371_v61, %v3851_v18  ;;  %v3843_v58 = vadd.f32 %v3842_v40, %v3298_v19  ;;  %v4384_v62 = vadd.f32 %v8378_v26, %v4249_v22  ;;  %v3322_v8 = vadd.f32 %v9416_v27, %v9415_v33  ;;  %v9423_v33 = vld [vmem:[#allocation60_spill] sm:$0xff] }
 0x2e4   : > { %6543 = vst [vmem:[%s8426_s11 + $0x88] sm:$0xff] %v6295_v36   ;;  %v4765_v45 = vsel %vm4509_vm3, %v4381_v34, %v4637_v42  ;;  %v8640_v13 = vpop.f32.mrf.mxu1  ;;  %v6720_v43 = vpop.f32.mrf.mxu0  ;;  %v4642_v7 = vmul.f32 0.01, %v4386_v14  ;;  %vm4514_vm4 = vcmp.ge.f32.partialorder %v4386_v14, 0.0  ;;  %v9424_v27 = vld [vmem:[#allocation116_spill] sm:$0xff] }
 0x2e5   : > { %v6290_v2 = vpack.c.bf16 %v4765_v45, %v4764_v59  ;;  %v4387_v56 = vadd.f32 %v8378_v26, %v4252_v11  ;;  %v4250_v51 = vmul.f32 %v8371_v61, %v3843_v58  ;;  %v3864_v19 = vadd.f32 %v6720_v43, %v3319_v50 }
 0x2e6   : > { %v3488_v52 = vpop.f32.mrf.mxu1  ;;  %v3855_v21 = vpop.f32.mrf.mxu0  ;;  %vm4512_vm6 = vcmp.ge.f32.partialorder %v4384_v62, 0.0  ;;  %v4640_v3 = vmul.f32 0.01, %v4384_v62  ;;  %v4770_v10 = vsel %vm4514_vm4, %v4386_v14, %v4642_v7  ;;  %v3335_v50 = vadd.f32 %v9418_v44, %v9417_v49 }
 0x2e7   : > { %6542 = vst [vmem:[%s8426_s11 + $0x80] sm:$0xff] %v6290_v2   ;;  %vm4515_vm5 = vcmp.ge.f32.partialorder %v4387_v56, 0.0  ;;  %v4643_v35 = vmul.f32 0.01, %v4387_v56  ;;  %v3856_v0 = vadd.f32 %v3855_v21, %v3311_v25  ;;  %v4385_v55 = vadd.f32 %v8378_v26, %v4250_v51  ;;  %v9420_v25 = vld [vmem:[#allocation110_spill] sm:$0xff] }
 0x2e8   : > { %v4255_v16 = vmul.f32 %v8371_v61, %v3864_v19  ;;  %v8653_v34 = vpop.f32.mrf.mxu1  ;;  %v6721_v53 = vpop.f32.mrf.mxu0  ;;  %v4768_v59 = vsel %vm4512_vm6, %v4384_v62, %v4640_v3  ;;  %v3327_v2 = vadd.f32 %v9420_v25, %v9419_v47 }
 0x2e9   : > { %v4771_v17 = vsel %vm4515_vm5, %v4387_v56, %v4643_v35  ;;  %v4253_v32 = vmul.f32 %v8371_v61, %v3856_v0  ;;  %v3867_v22 = vadd.f32 %v6721_v53, %v3322_v8  ;;  %vm4513_vm7 = vcmp.ge.f32.partialorder %v4385_v55, 0.0 }
 0x2ea   : > { %v6305_v18 = vpack.c.bf16 %v4771_v17, %v4770_v10  ;;  %v4641_v36 = vmul.f32 0.01, %v4385_v55  ;;  %v4390_v42 = vadd.f32 %v8378_v26, %v4255_v16  ;;  %v3491_v60 = vpop.f32.mrf.mxu1  ;;  %v3858_v40 = vpop.f32.mrf.mxu0  ;;  %v3338_v8 = vadd.f32 %v9424_v27, %v9423_v33 }
 0x2eb   : > { %v4256_v11 = vmul.f32 %v8371_v61, %v3867_v22  ;;  %v3859_v58 = vadd.f32 %v3858_v40, %v3314_v29  ;;  %v4388_v45 = vadd.f32 %v8378_v26, %v4253_v32  ;;  %v9422_v29 = vld [vmem:[#allocation112_spill] sm:$0xff] }
 0x2ec   : > { %6545 = vst [vmem:[%s8426_s11 + $0x98] sm:$0xff] %v6305_v18   ;;  %v4769_v14 = vsel %vm4513_vm7, %v4385_v55, %v4641_v36  ;;  %v8664_v43 = vpop.f32.mrf.mxu1  ;;  %v6724_v48 = vpop.f32.mrf.mxu0  ;;  %v4646_v56 = vmul.f32 0.01, %v4390_v42  ;;  %v3330_v51 = vadd.f32 %v9422_v29, %v9421_v20  ;;  %vm4518_vm8 = vcmp.ge.f32.partialorder %v4390_v42, 0.0 }
 0x2ed   : > { %v6300_v7 = vpack.c.bf16 %v4769_v14, %v4768_v59  ;;  %v4391_v63 = vadd.f32 %v8378_v26, %v4256_v11  ;;  %v4254_v62 = vmul.f32 %v8371_v61, %v3859_v58  ;;  %v3880_v19 = vadd.f32 %v6724_v48, %v3335_v50  ;;  %v9425_v50 = vld [vmem:[#allocation63_spill] sm:$0xff]  ;;  %v9426_v59 = vld [vmem:[#allocation122_spill] sm:$0xff] }
 0x2ee   : > { %v3496_v52 = vpop.f32.mrf.mxu1  ;;  %v3871_v21 = vpop.f32.mrf.mxu0  ;;  %vm4516_vm10 = vcmp.ge.f32.partialorder %v4388_v45, 0.0  ;;  %v4644_v3 = vmul.f32 0.01, %v4388_v45  ;;  %v4774_v17 = vsel %vm4518_vm8, %v4390_v42, %v4646_v56  ;;  %v3351_v14 = vadd.f32 %v9426_v59, %v9425_v50  ;;  %v9428_v56 = vld [vmem:[#allocation118_spill] sm:$0xff] }
 0x2ef   : > { %6544 = vst [vmem:[%s8426_s11 + $0x90] sm:$0xff] %v6300_v7   ;;  %vm4519_vm9 = vcmp.ge.f32.partialorder %v4391_v63, 0.0  ;;  %v4647_v35 = vmul.f32 0.01, %v4391_v63  ;;  %v3872_v0 = vadd.f32 %v3871_v21, %v3327_v2  ;;  %v4389_v55 = vadd.f32 %v8378_v26, %v4254_v62  ;;  %v9427_v7 = vld [vmem:[#allocation61_spill] sm:$0xff]  ;;  %v9430_v62 = vld [vmem:[#allocation120_spill] sm:$0xff] }
 0x2f0   : > { %v4259_v16 = vmul.f32 %v8371_v61, %v3880_v19  ;;  %v8677_v53 = vpop.f32.mrf.mxu1  ;;  %v6725_v10 = vpop.f32.mrf.mxu0  ;;  %v4772_v48 = vsel %vm4516_vm10, %v4388_v45, %v4644_v3 }
 0x2f1   : > { %v4775_v32 = vsel %vm4519_vm9, %v4391_v63, %v4647_v35  ;;  %v4257_v22 = vmul.f32 %v8371_v61, %v3872_v0  ;;  %v3883_v18 = vadd.f32 %v6725_v10, %v3338_v8  ;;  %vm4517_vm11 = vcmp.ge.f32.partialorder %v4389_v55, 0.0  ;;  %v9431_v8 = vld [vmem:[#allocation64_spill] sm:$0xff] }
 0x2f2   : > { %v6315_v36 = vpack.c.bf16 %v4775_v32, %v4774_v17  ;;  %v4645_v60 = vmul.f32 0.01, %v4389_v55  ;;  %v4394_v40 = vadd.f32 %v8378_v26, %v4259_v16  ;;  %v3499_v11 = vpop.f32.mrf.mxu1  ;;  %v3874_v58 = vpop.f32.mrf.mxu0  ;;  %v3343_v63 = vadd.f32 %v9428_v56, %v9427_v7  ;;  %v9432_v35 = vld [vmem:[#allocation124_spill] sm:$0xff] }
 0x2f3   : > { %v4260_v49 = vmul.f32 %v8371_v61, %v3883_v18  ;;  %v3875_v44 = vadd.f32 %v3874_v58, %v3330_v51  ;;  %v4392_v47 = vadd.f32 %v8378_v26, %v4257_v22  ;;  %v8695_v61 = vld [vmem:[%s9228_s3] ss:$0 sm:$0xff]  ;;  %v9429_v51 = vld [vmem:[#allocation62_spill] sm:$0xff]  ;;  %v3354_v0 = vadd.f32 %v9432_v35, %v9431_v8 }
 0x2f4   : > { %6547 = vst [vmem:[%s8426_s11 + $0xa8] sm:$0xff] %v6315_v36   ;;  %v4773_v42 = vsel %vm4517_vm11, %v4389_v55, %v4645_v60  ;;  %v8688_v25 = vpop.f32.mrf.mxu1  ;;  %v6728_v2 = vpop.f32.mrf.mxu0  ;;  %v4650_v29 = vmul.f32 0.01, %v4394_v40  ;;  %v3346_v19 = vadd.f32 %v9430_v62, %v9429_v51  ;;  %vm4522_vm12 = vcmp.ge.f32.partialorder %v4394_v40, 0.0  ;;  %v8703_v26 = vld [vmem:[%s9227_s2] ss:$0 sm:$0xff] }
 0x2f5   : > { %v6310_v20 = vpack.c.bf16 %v4773_v42, %v4772_v48  ;;  %v4395_v45 = vadd.f32 %v8695_v61, %v4260_v49  ;;  %v4258_v52 = vmul.f32 %v8703_v26, %v3875_v44  ;;  %v3896_v21 = vadd.f32 %v6728_v2, %v3351_v14  ;;  %v9433_v42 = vld [vmem:[#allocation67_spill] sm:$0xff]  ;;  %v9434_v2 = vld [vmem:[#allocation130_spill] sm:$0xff] }
 0x2f6   : > { %v3504_v33 = vpop.f32.mrf.mxu1  ;;  %v3887_v27 = vpop.f32.mrf.mxu0  ;;  %vm4520_vm14 = vcmp.ge.f32.partialorder %v4392_v47, 0.0  ;;  %v4648_v16 = vmul.f32 0.01, %v4392_v47  ;;  %v4778_v18 = vsel %vm4522_vm12, %v4394_v40, %v4650_v29  ;;  %v3367_v7 = vadd.f32 %v9434_v2, %v9433_v42  ;;  %v9436_v51 = vld [vmem:[#allocation126_spill] sm:$0xff] }
 0x2f7   : > { %6546 = vst [vmem:[%s8426_s11 + $0xa0] sm:$0xff] %v6310_v20   ;;  %vm4523_vm13 = vcmp.ge.f32.partialorder %v4395_v45, 0.0  ;;  %v4651_v3 = vmul.f32 0.01, %v4395_v45  ;;  %v3888_v55 = vadd.f32 %v3887_v27, %v3343_v63  ;;  %v4393_v10 = vadd.f32 %v8695_v61, %v4258_v52  ;;  %v9437_v33 = vld [vmem:[#allocation66_spill] sm:$0xff]  ;;  %v9438_v27 = vld [vmem:[#allocation128_spill] sm:$0xff] }
 0x2f8   : > { %v4263_v17 = vmul.f32 %v8703_v26, %v3896_v21  ;;  %v8711_v32 = vpop.f32.mrf.mxu1  ;;  %v6729_v22 = vpop.f32.mrf.mxu0  ;;  %v4776_v56 = vsel %vm4520_vm14, %v4392_v47, %v4648_v16  ;;  %v3362_v8 = vadd.f32 %v9438_v27, %v9437_v33  ;;  %v9440_v16 = vld [vmem:[#allocation132_spill] sm:$0xff]  ;;  %v9443_v27 = vld [vmem:[#allocation69_spill] sm:$0xff] }
 0x2f9   : > { %v4779_v36 = vsel %vm4523_vm13, %v4395_v45, %v4651_v3  ;;  %v4261_v60 = vmul.f32 %v8703_v26, %v3888_v55  ;;  %v3899_v11 = vadd.f32 %v6729_v22, %v3354_v0  ;;  %vm4521_vm15 = vcmp.ge.f32.partialorder %v4393_v10, 0.0  ;;  %v9435_v45 = vld [vmem:[#allocation65_spill] sm:$0xff]  ;;  %v9439_v55 = vld [vmem:[#allocation68_spill] sm:$0xff] }
 0x2fa   : > { %v6325_v58 = vpack.c.bf16 %v4779_v36, %v4778_v18  ;;  %v4649_v49 = vmul.f32 0.01, %v4393_v10  ;;  %v4398_v44 = vadd.f32 %v8695_v61, %v4263_v17  ;;  %v3507_v50 = vpop.f32.mrf.mxu1  ;;  %v3890_v59 = vpop.f32.mrf.mxu0  ;;  %v3359_v62 = vadd.f32 %v9436_v51, %v9435_v45  ;;  %v9441_v45 = vld [vmem:[#allocation73_spill] sm:$0xff]  ;;  %v9442_v51 = vld [vmem:[#allocation138_spill] sm:$0xff] }
 0x2fb   : > { %v4264_v14 = vmul.f32 %v8703_v26, %v3899_v11  ;;  %v3891_v48 = vadd.f32 %v3890_v59, %v3346_v19  ;;  %v4396_v63 = vadd.f32 %v8695_v61, %v4261_v60 }
 0x2fc   : > { %6549 = vst [vmem:[%s8426_s11 + $0xb8] sm:$0xff] %v6325_v58   ;;  %v4777_v40 = vsel %vm4521_vm15, %v4393_v10, %v4649_v49  ;;  %v8722_v20 = vpop.f32.mrf.mxu1  ;;  %v6732_v29 = vpop.f32.mrf.mxu0  ;;  %v4654_v21 = vmul.f32 0.01, %v4398_v44  ;;  %vm4526_vm0 = vcmp.ge.f32.partialorder %v4398_v44, 0.0  ;;  %v3370_v10 = vadd.f32 %v9440_v16, %v9439_v55  ;;  %v9445_v55 = vld [vmem:[#allocation71_spill] sm:$0xff]  ;;  %v9446_v16 = vld [vmem:[#allocation136_spill] sm:$0xff] }
 0x2fd   : > { %v6320_v52 = vpack.c.bf16 %v4777_v40, %v4776_v56  ;;  %v4399_v19 = vadd.f32 %v8695_v61, %v4264_v14  ;;  %v4262_v47 = vmul.f32 %v8703_v26, %v3891_v48  ;;  %v3912_v35 = vadd.f32 %v6732_v29, %v3367_v7 }
 0x2fe   : > { %v3512_v0 = vpop.f32.mrf.mxu1  ;;  %v3903_v3 = vpop.f32.mrf.mxu0  ;;  %vm4524_vm2 = vcmp.ge.f32.partialorder %v4396_v63, 0.0  ;;  %v4652_v18 = vmul.f32 0.01, %v4396_v63  ;;  %v4782_v49 = vsel %vm4526_vm0, %v4398_v44, %v4654_v21 }
 0x2ff   : > { %6548 = vst [vmem:[%s8426_s11 + $0xb0] sm:$0xff] %v6320_v52   ;;  %vm4527_vm1 = vcmp.ge.f32.partialorder %v4399_v19, 0.0  ;;  %v4655_v17 = vmul.f32 0.01, %v4399_v19  ;;  %v3904_v22 = vadd.f32 %v3903_v3, %v3359_v62  ;;  %v4397_v36 = vadd.f32 %v8695_v61, %v4262_v47  ;;  %v9444_v47 = vld [vmem:[#allocation134_spill] sm:$0xff] }
 0x300   : > { %v4267_v60 = vmul.f32 %v8703_v26, %v3912_v35  ;;  %v8735_v11 = vpop.f32.mrf.mxu1  ;;  %v6733_v58 = vpop.f32.mrf.mxu0  ;;  %v3383_v62 = vadd.f32 %v9442_v51, %v9441_v45  ;;  %v4780_v52 = vsel %vm4524_vm2, %v4396_v63, %v4652_v18  ;;  %v3375_v35 = vadd.f32 %v9444_v47, %v9443_v27 }
 0x301   : > { %v4783_v50 = vsel %vm4527_vm1, %v4399_v19, %v4655_v17  ;;  %v4265_v59 = vmul.f32 %v8703_v26, %v3904_v22  ;;  %v3915_v14 = vadd.f32 %v6733_v58, %v3370_v10  ;;  %vm4525_vm3 = vcmp.ge.f32.partialorder %v4397_v36, 0.0 }
 0x302   : > { %v6335_v48 = vpack.c.bf16 %v4783_v50, %v4782_v49  ;;  %v4653_v42 = vmul.f32 0.01, %v4397_v36  ;;  %v4402_v2 = vadd.f32 %v8695_v61, %v4267_v60  ;;  %v3515_v7 = vpop.f32.mrf.mxu1  ;;  %v3906_v56 = vpop.f32.mrf.mxu0  ;;  %v3378_v10 = vadd.f32 %v9446_v16, %v9445_v55  ;;  %v9448_v60 = vld [vmem:[#allocation140_spill] sm:$0xff] }
 0x303   : > { %v4268_v40 = vmul.f32 %v8703_v26, %v3915_v14  ;;  %v3907_v29 = vadd.f32 %v3906_v56, %v3362_v8  ;;  %v4400_v21 = vadd.f32 %v8695_v61, %v4265_v59 }
 0x304   : > { %6551 = vst [vmem:[%s8426_s11 + $0xc8] sm:$0xff] %v6335_v48   ;;  %v4781_v44 = vsel %vm4525_vm3, %v4397_v36, %v4653_v42  ;;  %v8746_v19 = vpop.f32.mrf.mxu1  ;;  %v6736_v33 = vpop.f32.mrf.mxu0  ;;  %v4658_v3 = vmul.f32 0.01, %v4402_v2  ;;  %vm4530_vm4 = vcmp.ge.f32.partialorder %v4402_v2, 0.0  ;;  %v9447_v36 = vld [vmem:[#allocation75_spill] sm:$0xff] }
 0x305   : > { %v6330_v0 = vpack.c.bf16 %v4781_v44, %v4780_v52  ;;  %v4403_v8 = vadd.f32 %v8695_v61, %v4268_v40  ;;  %v4266_v63 = vmul.f32 %v8703_v26, %v3907_v29  ;;  %v3928_v17 = vadd.f32 %v6736_v33, %v3383_v62 }
 0x306   : > { %v3520_v22 = vpop.f32.mrf.mxu1  ;;  %v3919_v18 = vpop.f32.mrf.mxu0  ;;  %v3386_v58 = vadd.f32 %v9448_v60, %v9447_v36  ;;  %vm4528_vm6 = vcmp.ge.f32.partialorder %v4400_v21, 0.0  ;;  %v4656_v59 = vmul.f32 0.01, %v4400_v21  ;;  %v4786_v56 = vsel %vm4530_vm4, %v4402_v2, %v4658_v3 }
 0x307   : > { %6550 = vst [vmem:[%s8426_s11 + $0xc0] sm:$0xff] %v6330_v0   ;;  %vm4531_vm5 = vcmp.ge.f32.partialorder %v4403_v8, 0.0  ;;  %v4659_v49 = vmul.f32 0.01, %v4403_v8  ;;  %v3920_v50 = vadd.f32 %v3919_v18, %v3375_v35  ;;  %v4401_v14 = vadd.f32 %v8695_v61, %v4266_v63  ;;  %v9449_v35 = vld [vmem:[#allocation81_spill] sm:$0xff]  ;;  %v9450_v0 = vld [vmem:[#allocation146_spill] sm:$0xff] }
 0x308   : > { %v4271_v48 = vmul.f32 %v8703_v26, %v3928_v17  ;;  %v8759_v42 = vpop.f32.mrf.mxu1  ;;  %v6737_v7 = vpop.f32.mrf.mxu0  ;;  %v3399_v55 = vadd.f32 %v9450_v0, %v9449_v35  ;;  %v4784_v16 = vsel %vm4528_vm6, %v4400_v21, %v4656_v59  ;;  %v9451_v17 = vld [vmem:[#allocation77_spill] sm:$0xff]  ;;  %v9452_v22 = vld [vmem:[#allocation142_spill] sm:$0xff] }
 0x309   : > { %v4787_v40 = vsel %vm4531_vm5, %v4403_v8, %v4659_v49  ;;  %v4269_v29 = vmul.f32 %v8703_v26, %v3920_v50  ;;  %v3931_v45 = vadd.f32 %v6737_v7, %v3386_v58  ;;  %vm4529_vm7 = vcmp.ge.f32.partialorder %v4401_v14, 0.0  ;;  %v9453_v58 = vld [vmem:[#allocation79_spill] sm:$0xff]  ;;  %v9454_v49 = vld [vmem:[#allocation144_spill] sm:$0xff] }
 0x30a   : > { %v6345_v51 = vpack.c.bf16 %v4787_v40, %v4786_v56  ;;  %v4657_v62 = vmul.f32 0.01, %v4401_v14  ;;  %v4406_v52 = vadd.f32 %v8695_v61, %v4271_v48  ;;  %v3523_v44 = vpop.f32.mrf.mxu1  ;;  %v3922_v33 = vpop.f32.mrf.mxu0  ;;  %v3391_v18 = vadd.f32 %v9452_v22, %v9451_v17  ;;  %v9455_v7 = vld [vmem:[#allocation83_spill] sm:$0xff] }
 0x30b   : > { %v4272_v27 = vmul.f32 %v8703_v26, %v3931_v45  ;;  %v3923_v47 = vadd.f32 %v3922_v33, %v3378_v10  ;;  %v4404_v3 = vadd.f32 %v8695_v61, %v4269_v29  ;;  %v3394_v50 = vadd.f32 %v9454_v49, %v9453_v58 }
 0x30c   : > { %6553 = vst [vmem:[%s8426_s11 + $0xd8] sm:$0xff] %v6345_v51   ;;  %v4785_v2 = vsel %vm4529_vm7, %v4401_v14, %v4657_v62  ;;  %v8770_v8 = vpop.f32.mrf.mxu1  ;;  %v6740_v63 = vpop.f32.mrf.mxu0  ;;  %v4662_v60 = vmul.f32 0.01, %v4406_v52  ;;  %vm4534_vm8 = vcmp.ge.f32.partialorder %v4406_v52, 0.0  ;;  %v3402_v56 = vadd.f32 %v8358_v57, %v9455_v7 }
 0x30d   : > { %v6340_v36 = vpack.c.bf16 %v4785_v2, %v4784_v16  ;;  %v4407_v10 = vadd.f32 %v8695_v61, %v4272_v27  ;;  %v4270_v21 = vmul.f32 %v8703_v26, %v3923_v47  ;;  %v3944_v59 = vadd.f32 %v6740_v63, %v3399_v55 }
 0x30e   : > { %v3528_v14 = vpop.f32.mrf.mxu1  ;;  %v3935_v48 = vpop.f32.mrf.mxu0  ;;  %vm4532_vm10 = vcmp.ge.f32.partialorder %v4404_v3, 0.0  ;;  %v4660_v45 = vmul.f32 0.01, %v4404_v3  ;;  %v4790_v27 = vsel %vm4534_vm8, %v4406_v52, %v4662_v60 }
 0x30f   : > { %6552 = vst [vmem:[%s8426_s11 + $0xd0] sm:$0xff] %v6340_v36   ;;  %vm4535_vm9 = vcmp.ge.f32.partialorder %v4407_v10, 0.0  ;;  %v4663_v40 = vmul.f32 0.01, %v4407_v10  ;;  %v3936_v29 = vadd.f32 %v3935_v48, %v3391_v18  ;;  %v4405_v51 = vadd.f32 %v8695_v61, %v4270_v21  ;;  %v9456_v18 = vld [vmem:[#allocation89_spill] sm:$0xff] }
 0x310   : > { %v4275_v62 = vmul.f32 %v8703_v26, %v3944_v59  ;;  %v8783_v44 = vpop.f32.mrf.mxu1  ;;  %v6741_v33 = vpop.f32.mrf.mxu0  ;;  %v3415_v36 = vadd.f32 %v8398_v6, %v9456_v18  ;;  %v4788_v58 = vsel %vm4532_vm10, %v4404_v3, %v4660_v45  ;;  %v9457_v21 = vld [vmem:[#allocation85_spill] sm:$0xff]  ;;  %v9458_v59 = vld [vmem:[#allocation148_spill] sm:$0xff] }
 0x311   : > { %v4791_v47 = vsel %vm4535_vm9, %v4407_v10, %v4663_v40  ;;  %v4273_v35 = vmul.f32 %v8703_v26, %v3936_v29  ;;  %v3947_v57 = vadd.f32 %v6741_v33, %v3402_v56  ;;  %vm4533_vm11 = vcmp.ge.f32.partialorder %v4405_v51, 0.0  ;;  %v9459_v56 = vld [vmem:[#allocation87_spill] sm:$0xff] }
 0x312   : > { %v6355_v0 = vpack.c.bf16 %v4791_v47, %v4790_v27  ;;  %v4661_v55 = vmul.f32 0.01, %v4405_v51  ;;  %v4410_v16 = vadd.f32 %v8695_v61, %v4275_v62  ;;  %v3531_v2 = vpop.f32.mrf.mxu1  ;;  %v3938_v63 = vpop.f32.mrf.mxu0  ;;  %v3407_v14 = vadd.f32 %v9458_v59, %v9457_v21  ;;  %v9461_v62 = vld [vmem:[#allocation149_spill] sm:$0xff] }
 0x313   : > { %v4276_v17 = vmul.f32 %v8703_v26, %v3947_v57  ;;  %v3939_v22 = vadd.f32 %v3938_v63, %v3394_v50  ;;  %v4408_v60 = vadd.f32 %v8695_v61, %v4273_v35  ;;  %v3410_v6 = vadd.f32 %v8383_v1, %v9459_v56 }
 0x314   : > { %6555 = vst [vmem:[%s8426_s11 + $0xe8] sm:$0xff] %v6355_v0   ;;  %v4789_v52 = vsel %vm4533_vm11, %v4405_v51, %v4661_v55  ;;  %v8794_v10 = vpop.f32.mrf.mxu1  ;;  %v6744_v49 = vpop.f32.mrf.mxu0  ;;  %v4666_v7 = vmul.f32 0.01, %v4410_v16  ;;  %vm4538_vm12 = vcmp.ge.f32.partialorder %v4410_v16, 0.0  ;;  %v9460_v51 = vld [vmem:[#allocation91_spill] sm:$0xff] }
 0x315   : > { %v6350_v48 = vpack.c.bf16 %v4789_v52, %v4788_v58  ;;  %v4411_v50 = vadd.f32 %v8695_v61, %v4276_v17  ;;  %v4274_v3 = vmul.f32 %v8703_v26, %v3939_v22  ;;  %v3960_v40 = vadd.f32 %v6744_v49, %v3415_v36 }
 0x316   : > { %v3536_v29 = vpop.f32.mrf.mxu1  ;;  %v3951_v45 = vpop.f32.mrf.mxu0  ;;  %v3418_v33 = vadd.f32 %v9461_v62, %v9460_v51  ;;  %vm4536_vm14 = vcmp.ge.f32.partialorder %v4408_v60, 0.0  ;;  %v4664_v35 = vmul.f32 0.01, %v4408_v60  ;;  %v4794_v2 = vsel %vm4538_vm12, %v4410_v16, %v4666_v7  ;;  %v9464_v62 = vld [vmem:[#allocation95_spill] sm:$0xff] }
 0x317   : > { %6554 = vst [vmem:[%s8426_s11 + $0xe0] sm:$0xff] %v6350_v48   ;;  %vm4539_vm13 = vcmp.ge.f32.partialorder %v4411_v50, 0.0  ;;  %v4667_v27 = vmul.f32 0.01, %v4411_v50  ;;  %v3952_v47 = vadd.f32 %v3951_v45, %v3407_v14  ;;  %v4409_v57 = vadd.f32 %v8695_v61, %v4274_v3  ;;  %v9462_v14 = vld [vmem:[#allocation97_spill] sm:$0xff] }
 0x318   : > { %v4279_v0 = vmul.f32 %v8703_v26, %v3960_v40  ;;  %v8807_v1 = vpop.f32.mrf.mxu1  ;;  %v6745_v55 = vpop.f32.mrf.mxu0  ;;  %v3431_v48 = vadd.f32 %v8458_v31, %v9462_v14  ;;  %v4792_v56 = vsel %vm4536_vm14, %v4408_v60, %v4664_v35  ;;  %v9463_v40 = vld [vmem:[#allocation93_spill] sm:$0xff]  ;;  %v3426_v31 = vadd.f32 %v8444_v28, %v9464_v62  ;;  %v9465_v35 = vld [vmem:[#allocation99_spill] sm:$0xff] }
 0x319   : > { %v4795_v63 = vsel %vm4539_vm13, %v4411_v50, %v4667_v27  ;;  %v4277_v17 = vmul.f32 %v8703_v26, %v3952_v47  ;;  %v3963_v22 = vadd.f32 %v6745_v55, %v3418_v33  ;;  %vm4537_vm15 = vcmp.ge.f32.partialorder %v4409_v57, 0.0 }
 0x31a   : > { %v6365_v18 = vpack.c.bf16 %v4795_v63, %v4794_v2  ;;  %v4665_v36 = vmul.f32 0.01, %v4409_v57  ;;  %v4414_v58 = vadd.f32 %v8695_v61, %v4279_v0  ;;  %v3539_v52 = vpop.f32.mrf.mxu1  ;;  %v3954_v49 = vpop.f32.mrf.mxu0  ;;  %v3423_v29 = vadd.f32 %v8430_v9, %v9463_v40 }
 0x31b   : > { %v4280_v21 = vmul.f32 %v8703_v26, %v3963_v22  ;;  %v3955_v59 = vadd.f32 %v3954_v49, %v3410_v6  ;;  %v4412_v7 = vadd.f32 %v8695_v61, %v4277_v17 }
 0x31c   : > { %6557 = vst [vmem:[%s8426_s11 + $0xf8] sm:$0xff] %v6365_v18   ;;  %v4793_v16 = vsel %vm4537_vm15, %v4409_v57, %v4665_v36  ;;  %v8818_v50 = vpop.f32.mrf.mxu1  ;;  %v6748_v3 = vpop.f32.mrf.mxu0  ;;  %v4670_v51 = vmul.f32 0.01, %v4414_v58  ;;  %vm4542_vm0 = vcmp.ge.f32.partialorder %v4414_v58, 0.0  ;;  %v3434_v57 = vadd.f32 %v8472_v4, %v9465_v35 }
 0x31d   : > { %v6360_v45 = vpack.c.bf16 %v4793_v16, %v4792_v56  ;;  %v4415_v6 = vadd.f32 %v8695_v61, %v4280_v21  ;;  %v4278_v60 = vmul.f32 %v8703_v26, %v3955_v59  ;;  %v3976_v33 = vadd.f32 %v6748_v3, %v3431_v48  ;;  %v9466_v16 = vld [vmem:[#allocation105_spill] sm:$0xff] }
 0x31e   : > { %v3544_v27 = vpop.f32.mrf.mxu1  ;;  %v3967_v47 = vpop.f32.mrf.mxu0  ;;  %vm4540_vm2 = vcmp.ge.f32.partialorder %v4412_v7, 0.0  ;;  %v4668_v55 = vmul.f32 0.01, %v4412_v7  ;;  %v4798_v22 = vsel %vm4542_vm0, %v4414_v58, %v4670_v51  ;;  %v3447_v3 = vadd.f32 %v8514_v46, %v9466_v16 }
 0x31f   : > { %6556 = vst [vmem:[%s8426_s11 + $0xf0] sm:$0xff] %v6360_v45   ;;  %vm4543_vm1 = vcmp.ge.f32.partialorder %v4415_v6, 0.0  ;;  %v4671_v0 = vmul.f32 0.01, %v4415_v6  ;;  %v3968_v9 = vadd.f32 %v3967_v47, %v3423_v29  ;;  %v4413_v2 = vadd.f32 %v8695_v61, %v4278_v60  ;;  %v9468_v27 = vld [vmem:[#allocation103_spill] sm:$0xff] }
 0x320   : > { %v4283_v63 = vmul.f32 %v8703_v26, %v3976_v33  ;;  %v8831_v28 = vpop.f32.mrf.mxu1  ;;  %v6749_v17 = vpop.f32.mrf.mxu0  ;;  %v4796_v40 = vsel %vm4540_vm2, %v4412_v7, %v4668_v55  ;;  %v3442_v46 = vadd.f32 %v8500_v5, %v9468_v27 }
 0x321   : > { %v4799_v18 = vsel %vm4543_vm1, %v4415_v6, %v4671_v0  ;;  %v4281_v36 = vmul.f32 %v8703_v26, %v3968_v9  ;;  %v3979_v4 = vadd.f32 %v6749_v17, %v3434_v57  ;;  %vm4541_vm3 = vcmp.ge.f32.partialorder %v4413_v2, 0.0  ;;  %v9467_v6 = vld [vmem:[#allocation101_spill] sm:$0xff]  ;;  %v9469_v0 = vld [vmem:[#allocation107_spill] sm:$0xff] }
 0x322   : > { %v6375_v52 = vpack.c.bf16 %v4799_v18, %v4798_v22  ;;  %v4669_v49 = vmul.f32 0.01, %v4413_v2  ;;  %v4418_v21 = vadd.f32 %v8695_v61, %v4283_v63  ;;  %v3547_v59 = vpop.f32.mrf.mxu1  ;;  %v3970_v14 = vpop.f32.mrf.mxu0  ;;  %v3439_v62 = vadd.f32 %v8486_v12, %v9467_v6 }
 0x323   : > { %v4284_v48 = vmul.f32 %v8703_v26, %v3979_v4  ;;  %v3971_v56 = vadd.f32 %v3970_v14, %v3426_v31  ;;  %v4416_v29 = vadd.f32 %v8695_v61, %v4281_v36  ;;  %v3450_v9 = vadd.f32 %v8528_v23, %v9469_v0  ;;  %v9473_v0 = vld [vmem:[#allocation115_spill] sm:$0xff] }
 0x324   : > { %6559 = vst [vmem:[%s8426_s11 + $0x108] sm:$0xff] %v6375_v52   ;;  %v4797_v58 = vsel %vm4541_vm3, %v4413_v2, %v4669_v49  ;;  %v8842_v45 = vpop.f32.mrf.mxu1  ;;  %v6752_v51 = vpop.f32.mrf.mxu0  ;;  %v4674_v33 = vmul.f32 0.01, %v4418_v21  ;;  %vm4546_vm4 = vcmp.ge.f32.partialorder %v4418_v21, 0.0 }
 0x325   : > { %v6370_v60 = vpack.c.bf16 %v4797_v58, %v4796_v40  ;;  %v4419_v31 = vadd.f32 %v8695_v61, %v4284_v48  ;;  %v4282_v7 = vmul.f32 %v8703_v26, %v3971_v56  ;;  %v3992_v47 = vadd.f32 %v6752_v51, %v3447_v3  ;;  %v9470_v3 = vld [vmem:[#allocation113_spill] sm:$0xff] }
 0x326   : > { %v3552_v35 = vpop.f32.mrf.mxu1  ;;  %v3983_v57 = vpop.f32.mrf.mxu0  ;;  %vm4544_vm6 = vcmp.ge.f32.partialorder %v4416_v29, 0.0  ;;  %v4672_v2 = vmul.f32 0.01, %v4416_v29  ;;  %v4802_v18 = vsel %vm4546_vm4, %v4418_v21, %v4674_v33  ;;  %v3463_v40 = vadd.f32 %v8568_v15, %v9470_v3 }
 0x327   : > { %6558 = vst [vmem:[%s8426_s11 + $0x100] sm:$0xff] %v6370_v60   ;;  %vm4547_vm5 = vcmp.ge.f32.partialorder %v4419_v31, 0.0  ;;  %v4675_v55 = vmul.f32 0.01, %v4419_v31  ;;  %v3984_v12 = vadd.f32 %v3983_v57, %v3439_v62  ;;  %v4417_v63 = vadd.f32 %v8695_v61, %v4282_v7  ;;  %v9471_v60 = vld [vmem:[#allocation109_spill] sm:$0xff]  ;;  %v9472_v7 = vld [vmem:[#allocation111_spill] sm:$0xff] }
 0x328   : > { %v4287_v17 = vmul.f32 %v8703_v26, %v3992_v47  ;;  %v8855_v5 = vpop.f32.mrf.mxu1  ;;  %v6753_v22 = vpop.f32.mrf.mxu0  ;;  %v4800_v58 = vsel %vm4544_vm6, %v4416_v29, %v4672_v2  ;;  %v3455_v33 = vadd.f32 %v8542_v30, %v9471_v60  ;;  %v3458_v15 = vadd.f32 %v8556_v37, %v9472_v7  ;;  %v9475_v60 = vld [vmem:[#allocation117_spill] sm:$0xff]  ;;  %v9476_v7 = vld [vmem:[#allocation119_spill] sm:$0xff] }
 0x329   : > { %v4803_v36 = vsel %vm4547_vm5, %v4419_v31, %v4675_v55  ;;  %v4285_v4 = vmul.f32 %v8703_v26, %v3984_v12  ;;  %v3995_v23 = vadd.f32 %v6753_v22, %v3450_v9  ;;  %vm4545_vm7 = vcmp.ge.f32.partialorder %v4417_v63, 0.0 }
 0x32a   : > { %v6385_v52 = vpack.c.bf16 %v4803_v36, %v4802_v18  ;;  %v4673_v49 = vmul.f32 0.01, %v4417_v63  ;;  %v4422_v59 = vadd.f32 %v8695_v61, %v4287_v17  ;;  %v3555_v14 = vpop.f32.mrf.mxu1  ;;  %v3986_v48 = vpop.f32.mrf.mxu0  ;;  %v3466_v9 = vadd.f32 %v8581_v24, %v9473_v0 }
 0x32b   : > { %v4288_v56 = vmul.f32 %v8703_v26, %v3995_v23  ;;  %v3987_v16 = vadd.f32 %v3986_v48, %v3442_v46  ;;  %v4420_v51 = vadd.f32 %v8695_v61, %v4285_v4 }
 0x32c   : > { %6561 = vst [vmem:[%s8426_s11 + $0x118] sm:$0xff] %v6385_v52   ;;  %v4801_v21 = vsel %vm4545_vm7, %v4417_v63, %v4673_v49  ;;  %v8866_v6 = vpop.f32.mrf.mxu1  ;;  %v6756_v62 = vpop.f32.mrf.mxu0  ;;  %v4678_v27 = vmul.f32 0.01, %v4422_v59  ;;  %vm4550_vm8 = vcmp.ge.f32.partialorder %v4422_v59, 0.0 }
 0x32d   : > { %v6380_v31 = vpack.c.bf16 %v4801_v21, %v4800_v58  ;;  %v4423_v46 = vadd.f32 %v8695_v61, %v4288_v56  ;;  %v4286_v29 = vmul.f32 %v8703_v26, %v3987_v16  ;;  %v4008_v47 = vadd.f32 %v6756_v62, %v3463_v40  ;;  %v9474_v16 = vld [vmem:[#allocation121_spill] sm:$0xff] }
 0x32e   : > { %v3560_v35 = vpop.f32.mrf.mxu1  ;;  %v3999_v57 = vpop.f32.mrf.mxu0  ;;  %vm4548_vm10 = vcmp.ge.f32.partialorder %v4420_v51, 0.0  ;;  %v4676_v12 = vmul.f32 0.01, %v4420_v51  ;;  %v4806_v22 = vsel %vm4550_vm8, %v4422_v59, %v4678_v27  ;;  %v3479_v3 = vadd.f32 %v8616_v54, %v9474_v16 }
 0x32f   : > { %6560 = vst [vmem:[%s8426_s11 + $0x110] sm:$0xff] %v6380_v31   ;;  %vm4551_vm9 = vcmp.ge.f32.partialorder %v4423_v46, 0.0  ;;  %v4679_v55 = vmul.f32 0.01, %v4423_v46  ;;  %v4000_v30 = vadd.f32 %v3999_v57, %v3455_v33  ;;  %v4421_v2 = vadd.f32 %v8695_v61, %v4286_v29  ;;  %v9477_v35 = vld [vmem:[#allocation123_spill] sm:$0xff] }
 0x330   : > { %v4291_v63 = vmul.f32 %v8703_v26, %v4008_v47  ;;  %v8879_v37 = vpop.f32.mrf.mxu1  ;;  %v6757_v17 = vpop.f32.mrf.mxu0  ;;  %v4804_v40 = vsel %vm4548_vm10, %v4420_v51, %v4676_v12  ;;  %v3471_v33 = vadd.f32 %v8592_v38, %v9475_v60  ;;  %v3474_v54 = vadd.f32 %v8605_v41, %v9476_v7 }
 0x331   : > { %v4807_v18 = vsel %vm4551_vm9, %v4423_v46, %v4679_v55  ;;  %v4289_v36 = vmul.f32 %v8703_v26, %v4000_v30  ;;  %v4011_v24 = vadd.f32 %v6757_v17, %v3466_v9  ;;  %vm4549_vm11 = vcmp.ge.f32.partialorder %v4421_v2, 0.0 }
 0x332   : > { %v6395_v4 = vpack.c.bf16 %v4807_v18, %v4806_v22  ;;  %v4677_v23 = vmul.f32 0.01, %v4421_v2  ;;  %v4426_v52 = vadd.f32 %v8695_v61, %v4291_v63  ;;  %v3563_v49 = vpop.f32.mrf.mxu1  ;;  %v4002_v14 = vpop.f32.mrf.mxu0  ;;  %v3482_v57 = vadd.f32 %v8629_v39, %v9477_v35 }
 0x333   : > { %v4292_v48 = vmul.f32 %v8703_v26, %v4011_v24  ;;  %v4003_v56 = vadd.f32 %v4002_v14, %v3458_v15  ;;  %v4424_v58 = vadd.f32 %v8695_v61, %v4289_v36  ;;  %v9478_v14 = vld [vmem:[#allocation129_spill] sm:$0xff] }
 0x334   : > { %6563 = vst [vmem:[%s8426_s11 + $0x128] sm:$0xff] %v6395_v4   ;;  %v4805_v59 = vsel %vm4549_vm11, %v4421_v2, %v4677_v23  ;;  %v8890_v21 = vpop.f32.mrf.mxu1  ;;  %v6760_v62 = vpop.f32.mrf.mxu0  ;;  %v4682_v27 = vmul.f32 0.01, %v4426_v52  ;;  %vm4554_vm12 = vcmp.ge.f32.partialorder %v4426_v52, 0.0 }
 0x335   : > { %v6390_v31 = vpack.c.bf16 %v4805_v59, %v4804_v40  ;;  %v4427_v46 = vadd.f32 %v8695_v61, %v4292_v48  ;;  %v4290_v51 = vmul.f32 %v8703_v26, %v4003_v56  ;;  %v4024_v15 = vadd.f32 %v6760_v62, %v3479_v3  ;;  %v9479_v59 = vld [vmem:[#allocation125_spill] sm:$0xff] }
 0x336   : > { %v3568_v29 = vpop.f32.mrf.mxu1  ;;  %v4015_v47 = vpop.f32.mrf.mxu0  ;;  %vm4552_vm14 = vcmp.ge.f32.partialorder %v4424_v58, 0.0  ;;  %v4680_v9 = vmul.f32 0.01, %v4424_v58  ;;  %v4810_v2 = vsel %vm4554_vm12, %v4426_v52, %v4682_v27  ;;  %v3495_v48 = vadd.f32 %v8664_v43, %v9478_v14  ;;  %v9480_v27 = vld [vmem:[#allocation127_spill] sm:$0xff] }
 0x337   : > { %6562 = vst [vmem:[%s8426_s11 + $0x120] sm:$0xff] %v6390_v31   ;;  %vm4555_vm13 = vcmp.ge.f32.partialorder %v4427_v46, 0.0  ;;  %v4683_v0 = vmul.f32 0.01, %v4427_v46  ;;  %v4016_v38 = vadd.f32 %v4015_v47, %v3471_v33  ;;  %v4425_v55 = vadd.f32 %v8695_v61, %v4290_v51  ;;  %v9481_v51 = vld [vmem:[#allocation131_spill] sm:$0xff] }
 0x338   : > { %v4295_v30 = vmul.f32 %v8703_v26, %v4024_v15  ;;  %v8903_v41 = vpop.f32.mrf.mxu1  ;;  %v6761_v12 = vpop.f32.mrf.mxu0  ;;  %v4808_v56 = vsel %vm4552_vm14, %v4424_v58, %v4680_v9  ;;  %v3487_v62 = vadd.f32 %v8640_v13, %v9479_v59  ;;  %v3490_v43 = vadd.f32 %v8653_v34, %v9480_v27  ;;  %v9485_v27 = vld [vmem:[#allocation139_spill] sm:$0xff] }
 0x339   : > { %v4811_v63 = vsel %vm4555_vm13, %v4427_v46, %v4683_v0  ;;  %v4293_v17 = vmul.f32 %v8703_v26, %v4016_v38  ;;  %v4027_v39 = vadd.f32 %v6761_v12, %v3482_v57  ;;  %vm4553_vm15 = vcmp.ge.f32.partialorder %v4425_v55, 0.0 }
 0x33a   : > { %v6405_v22 = vpack.c.bf16 %v4811_v63, %v4810_v2  ;;  %v4681_v18 = vmul.f32 0.01, %v4425_v55  ;;  %v4430_v36 = vadd.f32 %v8695_v61, %v4295_v30  ;;  %v3571_v24 = vpop.f32.mrf.mxu1  ;;  %v4018_v4 = vpop.f32.mrf.mxu0  ;;  %v3498_v15 = vadd.f32 %v8677_v53, %v9481_v51 }
 0x33b   : > { %v4296_v23 = vmul.f32 %v8703_v26, %v4027_v39  ;;  %v4019_v49 = vadd.f32 %v4018_v4, %v3474_v54  ;;  %v4428_v16 = vadd.f32 %v8695_v61, %v4293_v17 }
 0x33c   : > { %6565 = vst [vmem:[%s8426_s11 + $0x138] sm:$0xff] %v6405_v22   ;;  %v4809_v52 = vsel %vm4553_vm15, %v4425_v55, %v4681_v18  ;;  %v8914_v3 = vpop.f32.mrf.mxu1  ;;  %v6764_v40 = vpop.f32.mrf.mxu0  ;;  %v4686_v33 = vmul.f32 0.01, %v4430_v36  ;;  %vm4558_vm0 = vcmp.ge.f32.partialorder %v4430_v36, 0.0  ;;  %v9482_v18 = vld [vmem:[#allocation137_spill] sm:$0xff] }
 0x33d   : > { %v6400_v60 = vpack.c.bf16 %v4809_v52, %v4808_v56  ;;  %v4431_v31 = vadd.f32 %v8695_v61, %v4296_v23  ;;  %v4294_v58 = vmul.f32 %v8703_v26, %v4019_v49  ;;  %v4040_v46 = vadd.f32 %v6764_v40, %v3495_v48  ;;  %v9483_v48 = vld [vmem:[#allocation133_spill] sm:$0xff] }
 0x33e   : > { %v3576_v7 = vpop.f32.mrf.mxu1  ;;  %v4031_v54 = vpop.f32.mrf.mxu0  ;;  %vm4556_vm2 = vcmp.ge.f32.partialorder %v4428_v16, 0.0  ;;  %v4684_v47 = vmul.f32 0.01, %v4428_v16  ;;  %v4814_v38 = vsel %vm4558_vm0, %v4430_v36, %v4686_v33  ;;  %v3511_v24 = vadd.f32 %v8722_v20, %v9482_v18 }
 0x33f   : > { %6564 = vst [vmem:[%s8426_s11 + $0x130] sm:$0xff] %v6400_v60   ;;  %vm4559_vm1 = vcmp.ge.f32.partialorder %v4431_v31, 0.0  ;;  %v4687_v29 = vmul.f32 0.01, %v4431_v31  ;;  %v4032_v13 = vadd.f32 %v4031_v54, %v3487_v62  ;;  %v4429_v35 = vadd.f32 %v8695_v61, %v4294_v58  ;;  %v9484_v62 = vld [vmem:[#allocation135_spill] sm:$0xff] }
 0x340   : > { %v4299_v57 = vmul.f32 %v8703_v26, %v4040_v46  ;;  %v8927_v34 = vpop.f32.mrf.mxu1  ;;  %v6765_v0 = vpop.f32.mrf.mxu0  ;;  %v4812_v4 = vsel %vm4556_vm2, %v4428_v16, %v4684_v47  ;;  %v3503_v56 = vadd.f32 %v8688_v25, %v9483_v48  ;;  %v3506_v20 = vadd.f32 %v8711_v32, %v9484_v62 }
 0x341   : > { %v4815_v9 = vsel %vm4559_vm1, %v4431_v31, %v4687_v29  ;;  %v4297_v55 = vmul.f32 %v8703_v26, %v4032_v13  ;;  %v4043_v53 = vadd.f32 %v6765_v0, %v3498_v15  ;;  %vm4557_vm3 = vcmp.ge.f32.partialorder %v4429_v35, 0.0 }
 0x342   : > { %v6415_v30 = vpack.c.bf16 %v4815_v9, %v4814_v38  ;;  %v4685_v12 = vmul.f32 0.01, %v4429_v35  ;;  %v4434_v2 = vadd.f32 %v8695_v61, %v4299_v57  ;;  %v3579_v63 = vpop.f32.mrf.mxu1  ;;  %v4034_v17 = vpop.f32.mrf.mxu0 }
 0x343   : > { %v4300_v39 = vmul.f32 %v8703_v26, %v4043_v53  ;;  %v4035_v22 = vadd.f32 %v4034_v17, %v3490_v43  ;;  %v4432_v23 = vadd.f32 %v8695_v61, %v4297_v55  ;;  %v3514_v43 = vadd.f32 %v8735_v11, %v9485_v27  ;;  %v9486_v53 = vld [vmem:[#allocation145_spill] sm:$0xff] }
 0x344   : > { %6567 = vst [vmem:[%s8426_s11 + $0x148] sm:$0xff] %v6415_v30   ;;  %v4813_v36 = vsel %vm4557_vm3, %v4429_v35, %v4685_v12  ;;  %v8938_v49 = vpop.f32.mrf.mxu1  ;;  %v6768_v14 = vpop.f32.mrf.mxu0  ;;  %v4690_v40 = vmul.f32 0.01, %v4434_v2  ;;  %vm4562_vm4 = vcmp.ge.f32.partialorder %v4434_v2, 0.0  ;;  %v3527_v30 = vadd.f32 %v8770_v8, %v9486_v53 }
 0x345   : > { %v6410_v52 = vpack.c.bf16 %v4813_v36, %v4812_v4  ;;  %v4435_v59 = vadd.f32 %v8695_v61, %v4300_v39  ;;  %v4298_v16 = vmul.f32 %v8703_v26, %v4035_v22  ;;  %v4056_v60 = vadd.f32 %v6768_v14, %v3511_v24  ;;  %v9487_v22 = vld [vmem:[#allocation141_spill] sm:$0xff]  ;;  %v9488_v14 = vld [vmem:[#allocation143_spill] sm:$0xff] }
 0x346   : > { %v3584_v33 = vpop.f32.mrf.mxu1  ;;  %v4047_v31 = vpop.f32.mrf.mxu0  ;;  %vm4560_vm6 = vcmp.ge.f32.partialorder %v4432_v23, 0.0  ;;  %v4688_v46 = vmul.f32 0.01, %v4432_v23  ;;  %v4818_v15 = vsel %vm4562_vm4, %v4434_v2, %v4690_v40  ;;  %v3519_v18 = vadd.f32 %v8746_v19, %v9487_v22  ;;  %v9489_v40 = vld [vmem:[#allocation147_spill] sm:$0xff] }
 0x347   : > { %6566 = vst [vmem:[%s8426_s11 + $0x140] sm:$0xff] %v6410_v52   ;;  %vm4563_vm5 = vcmp.ge.f32.partialorder %v4435_v59, 0.0  ;;  %v4691_v58 = vmul.f32 0.01, %v4435_v59  ;;  %v4048_v25 = vadd.f32 %v4047_v31, %v3503_v56  ;;  %v4433_v7 = vadd.f32 %v8695_v61, %v4298_v16 }
 0x348   : > { %v4303_v54 = vmul.f32 %v8703_v26, %v4056_v60  ;;  %v8951_v32 = vpop.f32.mrf.mxu1  ;;  %v6769_v51 = vpop.f32.mrf.mxu0  ;;  %v4816_v12 = vsel %vm4560_vm6, %v4432_v23, %v4688_v46  ;;  %v3522_v8 = vadd.f32 %v8759_v42, %v9488_v14 }
 0x349   : > { %v4819_v29 = vsel %vm4563_vm5, %v4435_v59, %v4691_v58  ;;  %v4301_v13 = vmul.f32 %v8703_v26, %v4048_v25  ;;  %v4059_v11 = vadd.f32 %v6769_v51, %v3514_v43  ;;  %vm4561_vm7 = vcmp.ge.f32.partialorder %v4433_v7, 0.0 }
 0x34a   : > { %v6425_v47 = vpack.c.bf16 %v4819_v29, %v4818_v15  ;;  %v4689_v35 = vmul.f32 0.01, %v4433_v7  ;;  %v4438_v57 = vadd.f32 %v8695_v61, %v4303_v54  ;;  %v3587_v0 = vpop.f32.mrf.mxu1  ;;  %v4050_v38 = vpop.f32.mrf.mxu0  ;;  %v3530_v59 = vadd.f32 %v8783_v44, %v9489_v40  ;;  %v9490_v29 = vld [vmem:[#allocation7_spill] sm:$0xff] }
 0x34b   : > { %v4304_v9 = vmul.f32 %v8703_v26, %v4059_v11  ;;  %v4051_v55 = vadd.f32 %v4050_v38, %v3506_v20  ;;  %v4436_v63 = vadd.f32 %v8695_v61, %v4301_v13  ;;  %v3543_v13 = vadd.f32 %v8818_v50, %v9490_v29  ;;  %v9491_v38 = vld [vmem:[#allocation5_spill] sm:$0xff] }
 0x34c   : > { %6569 = vst [vmem:[%s8426_s11 + $0x158] sm:$0xff] %v6425_v47   ;;  %v4817_v2 = vsel %vm4561_vm7, %v4433_v7, %v4689_v35  ;;  %v8962_v17 = vpop.f32.mrf.mxu1  ;;  %v6772_v39 = vpop.f32.mrf.mxu0  ;;  %v4694_v4 = vmul.f32 0.01, %v4438_v57  ;;  %vm4566_vm8 = vcmp.ge.f32.partialorder %v4438_v57, 0.0  ;;  %v9025_v29 = vld [vmem:[%s9227_s2] ss:$0 sm:$0xff] }
 0x34d   : > { %v6420_v24 = vpack.c.bf16 %v4817_v2, %v4816_v12  ;;  %v4439_v36 = vadd.f32 %v8695_v61, %v4304_v9  ;;  %v4302_v23 = vmul.f32 %v8703_v26, %v4051_v55  ;;  %v4072_v48 = vadd.f32 %v6772_v39, %v3527_v30  ;;  %v9492_v12 = vld [vmem:[#allocation6_spill] sm:$0xff] }
 0x34e   : > { %v3592_v56 = vpop.f32.mrf.mxu1  ;;  %v4063_v52 = vpop.f32.mrf.mxu0  ;;  %vm4564_vm10 = vcmp.ge.f32.partialorder %v4436_v63, 0.0  ;;  %v4692_v20 = vmul.f32 0.01, %v4436_v63  ;;  %v4822_v31 = vsel %vm4566_vm8, %v4438_v57, %v4694_v4  ;;  %v3535_v9 = vadd.f32 %v8794_v10, %v9491_v38 }
 0x34f   : > { %6568 = vst [vmem:[%s8426_s11 + $0x150] sm:$0xff] %v6420_v24   ;;  %vm4567_vm9 = vcmp.ge.f32.partialorder %v4439_v36, 0.0  ;;  %v4695_v62 = vmul.f32 0.01, %v4439_v36  ;;  %v4064_v19 = vadd.f32 %v4063_v52, %v3519_v18  ;;  %v4437_v16 = vadd.f32 %v8695_v61, %v4302_v23  ;;  %v9493_v18 = vld [vmem:[#allocation8_spill] sm:$0xff] }
 0x350   : > { %v4307_v60 = vmul.f32 %v8703_v26, %v4072_v48  ;;  %v8975_v42 = vpop.f32.mrf.mxu1  ;;  %v6773_v33 = vpop.f32.mrf.mxu0  ;;  %v4820_v11 = vsel %vm4564_vm10, %v4436_v63, %v4692_v20  ;;  %v3538_v50 = vadd.f32 %v8807_v1, %v9492_v12  ;;  %v3546_v24 = vadd.f32 %v8831_v28, %v9493_v18 }
 0x351   : > { %v4823_v27 = vsel %vm4567_vm9, %v4439_v36, %v4695_v62  ;;  %v4305_v43 = vmul.f32 %v8703_v26, %v4064_v19  ;;  %v4075_v44 = vadd.f32 %v6773_v33, %v3530_v59  ;;  %vm4565_vm11 = vcmp.ge.f32.partialorder %v4437_v16, 0.0  ;;  %v9494_v33 = vld [vmem:[#allocation11_spill] sm:$0xff] }
 0x352   : > { %v6435_v58 = vpack.c.bf16 %v4823_v27, %v4822_v31  ;;  %v4693_v25 = vmul.f32 0.01, %v4437_v16  ;;  %v4442_v46 = vadd.f32 %v8695_v61, %v4307_v60  ;;  %v3595_v7 = vpop.f32.mrf.mxu1  ;;  %v4066_v54 = vpop.f32.mrf.mxu0  ;;  %v3559_v31 = vadd.f32 %v8866_v6, %v9494_v33 }
 0x353   : > { %v4308_v51 = vmul.f32 %v8703_v26, %v4075_v44  ;;  %v4067_v15 = vadd.f32 %v4066_v54, %v3522_v8  ;;  %v4440_v35 = vadd.f32 %v8695_v61, %v4305_v43  ;;  %v9012_v44 = vld [vmem:[%s9228_s3] ss:$0 sm:$0xff] }
 0x354   : > { %6571 = vst [vmem:[%s8426_s11 + $0x168] sm:$0xff] %v6435_v58   ;;  %v4821_v47 = vsel %vm4565_vm11, %v4437_v16, %v4693_v25  ;;  %v8986_v57 = vpop.f32.mrf.mxu1  ;;  %v6776_v0 = vpop.f32.mrf.mxu0  ;;  %v4698_v53 = vmul.f32 0.01, %v4442_v46  ;;  %vm4570_vm12 = vcmp.ge.f32.partialorder %v4442_v46, 0.0 }
 0x355   : > { %v6430_v55 = vpack.c.bf16 %v4821_v47, %v4820_v11  ;;  %v4443_v30 = vadd.f32 %v8695_v61, %v4308_v51  ;;  %v4306_v2 = vmul.f32 %v8703_v26, %v4067_v15  ;;  %v4088_v63 = vadd.f32 %v6776_v0, %v3543_v13  ;;  %v9496_v51 = vld [vmem:[#allocation10_spill] sm:$0xff]  ;;  %v9497_v0 = vld [vmem:[#allocation12_spill] sm:$0xff] }
 0x356   : > { %v3600_v39 = vpop.f32.mrf.mxu1  ;;  %v4079_v22 = vpop.f32.mrf.mxu0  ;;  %vm4568_vm14 = vcmp.ge.f32.partialorder %v4440_v35, 0.0  ;;  %v4696_v36 = vmul.f32 0.01, %v4440_v35  ;;  %v4826_v48 = vsel %vm4570_vm12, %v4442_v46, %v4698_v53  ;;  %v3554_v15 = vadd.f32 %v8855_v5, %v9496_v51 }
 0x357   : > { %6570 = vst [vmem:[%s8426_s11 + $0x160] sm:$0xff] %v6430_v55   ;;  %vm4571_vm13 = vcmp.ge.f32.partialorder %v4443_v30, 0.0  ;;  %v4699_v4 = vmul.f32 0.01, %v4443_v30  ;;  %v4080_v10 = vadd.f32 %v4079_v22, %v3535_v9  ;;  %v4441_v14 = vadd.f32 %v8695_v61, %v4306_v2 }
 0x358   : > { %v4311_v8 = vmul.f32 %v8703_v26, %v4088_v63  ;;  %v8999_v1 = vpop.f32.mrf.mxu1  ;;  %v6777_v23 = vpop.f32.mrf.mxu0  ;;  %v4824_v27 = vsel %vm4568_vm14, %v4440_v35, %v4696_v36 }
 0x359   : > { %v4827_v56 = vsel %vm4571_vm13, %v4443_v30, %v4699_v4  ;;  %v4309_v52 = vmul.f32 %v8703_v26, %v4080_v10  ;;  %v4091_v28 = vadd.f32 %v6777_v23, %v3546_v24  ;;  %vm4569_vm15 = vcmp.ge.f32.partialorder %v4441_v14, 0.0 }
 0x35a   : > { %v6445_v40 = vpack.c.bf16 %v4827_v56, %v4826_v48  ;;  %v4697_v59 = vmul.f32 0.01, %v4441_v14  ;;  %v4446_v62 = vadd.f32 %v8695_v61, %v4311_v8  ;;  %v3603_v19 = vpop.f32.mrf.mxu1  ;;  %v4082_v20 = vpop.f32.mrf.mxu0 }
 0x35b   : > { %v4312_v16 = vmul.f32 %v8703_v26, %v4091_v28  ;;  %v4083_v60 = vadd.f32 %v4082_v20, %v3538_v50  ;;  %v4444_v61 = vadd.f32 %v9012_v44, %v4309_v52  ;;  %v9495_v26 = vld [vmem:[#allocation9_spill] sm:$0xff] }
 0x35c   : > { %6573 = vst [vmem:[%s8426_s11 + $0x178] sm:$0xff] %v6445_v40   ;;  %v4825_v43 = vsel %vm4569_vm15, %v4441_v14, %v4697_v59  ;;  %v9015_v58 = vpop.f32.mrf.mxu1  ;;  %v6780_v25 = vpop.f32.mrf.mxu0  ;;  %v3551_v46 = vadd.f32 %v8842_v45, %v9495_v26  ;;  %v4702_v6 = vmul.f32 0.01, %v4446_v62  ;;  %vm4574_vm0 = vcmp.ge.f32.partialorder %v4446_v62, 0.0  ;;  %v9498_v14 = vld [vmem:[#allocation15_spill] sm:$0xff]  ;;  %v9499_v40 = vld [vmem:[#allocation13_spill] sm:$0xff] }
 0x35d   : > { %v6440_v7 = vpack.c.bf16 %v4825_v43, %v4824_v27  ;;  %v4447_v54 = vadd.f32 %v9012_v44, %v4312_v16  ;;  %v4310_v13 = vmul.f32 %v9025_v29, %v4083_v60  ;;  %v4104_v11 = vadd.f32 %v6780_v25, %v3559_v31  ;;  %v9500_v16 = vld [vmem:[#allocation14_spill] sm:$0xff]  ;;  %v9501_v43 = vld [vmem:[#allocation16_spill] sm:$0xff] }
 0x35e   : > { %v3608_v47 = vpop.f32.mrf.mxu1  ;;  %v4095_v35 = vpop.f32.mrf.mxu0  ;;  %v3562_v45 = vadd.f32 %v8879_v37, %v9497_v0  ;;  %vm4572_vm2 = vcmp.ge.f32.partialorder %v4444_v61, 0.0  ;;  %v4700_v5 = vmul.f32 0.01, %v4444_v61  ;;  %v4830_v50 = vsel %vm4574_vm0, %v4446_v62, %v4702_v6 }
 0x35f   : > { %6572 = vst [vmem:[%s8426_s11 + $0x170] sm:$0xff] %v6440_v7   ;;  %vm4575_vm1 = vcmp.ge.f32.partialorder %v4447_v54, 0.0  ;;  %v4703_v38 = vmul.f32 0.01, %v4447_v54  ;;  %v4096_v9 = vadd.f32 %v4095_v35, %v3551_v46  ;;  %v4445_v55 = vadd.f32 %v9012_v44, %v4310_v13 }
 0x360   : > { %v4315_v53 = vmul.f32 %v9025_v29, %v4104_v11  ;;  %v9033_v30 = vpop.f32.mrf.mxu1  ;;  %v6781_v12 = vpop.f32.mrf.mxu0  ;;  %v3575_v8 = vadd.f32 %v8914_v3, %v9498_v14  ;;  %v4828_v23 = vsel %vm4572_vm2, %v4444_v61, %v4700_v5  ;;  %v3567_v59 = vadd.f32 %v8890_v21, %v9499_v40 }
 0x361   : > { %v4831_v2 = vsel %vm4575_vm1, %v4447_v54, %v4703_v38  ;;  %v4313_v63 = vmul.f32 %v9025_v29, %v4096_v9  ;;  %v4107_v37 = vadd.f32 %v6781_v12, %v3562_v45  ;;  %vm4573_vm3 = vcmp.ge.f32.partialorder %v4445_v55, 0.0  ;;  %v9502_v9 = vld [vmem:[#allocation19_spill] sm:$0xff] }
 0x362   : > { %v6455_v39 = vpack.c.bf16 %v4831_v2, %v4830_v50  ;;  %v4701_v22 = vmul.f32 0.01, %v4445_v55  ;;  %v4450_v18 = vadd.f32 %v9012_v44, %v4315_v53  ;;  %v3611_v24 = vpop.f32.mrf.mxu1  ;;  %v4098_v4 = vpop.f32.mrf.mxu0  ;;  %v3570_v3 = vadd.f32 %v8903_v41, %v9500_v16 }
 0x363   : > { %v4316_v10 = vmul.f32 %v9025_v29, %v4107_v37  ;;  %v4099_v36 = vadd.f32 %v4098_v4, %v3554_v15  ;;  %v4448_v56 = vadd.f32 %v9012_v44, %v4313_v63  ;;  %v3578_v61 = vadd.f32 %v8927_v34, %v9501_v43  ;;  %v9503_v63 = vld [vmem:[#allocation17_spill] sm:$0xff]  ;;  %v9504_v24 = vld [vmem:[#allocation18_spill] sm:$0xff] }
 0x364   : > { %6575 = vst [vmem:[%s8426_s11 + $0x188] sm:$0xff] %v6455_v39   ;;  %v4829_v48 = vsel %vm4573_vm3, %v4445_v55, %v4701_v22  ;;  %v9044_v52 = vpop.f32.mrf.mxu1  ;;  %v6784_v28 = vpop.f32.mrf.mxu0  ;;  %v4706_v19 = vmul.f32 0.01, %v4450_v18  ;;  %vm4578_vm4 = vcmp.ge.f32.partialorder %v4450_v18, 0.0  ;;  %v3591_v5 = vadd.f32 %v8962_v17, %v9502_v9 }
 0x365   : > { %v6450_v62 = vpack.c.bf16 %v4829_v48, %v4828_v23  ;;  %v4451_v20 = vadd.f32 %v9012_v44, %v4316_v10  ;;  %v4314_v60 = vmul.f32 %v9025_v29, %v4099_v36  ;;  %v4120_v33 = vadd.f32 %v6784_v28, %v3575_v8  ;;  %v9505_v8 = vld [vmem:[#allocation20_spill] sm:$0xff] }
 0x366   : > { %v3616_v31 = vpop.f32.mrf.mxu1  ;;  %v4111_v27 = vpop.f32.mrf.mxu0  ;;  %vm4576_vm6 = vcmp.ge.f32.partialorder %v4448_v56, 0.0  ;;  %v4704_v26 = vmul.f32 0.01, %v4448_v56  ;;  %v4834_v54 = vsel %vm4578_vm4, %v4450_v18, %v4706_v19  ;;  %v3583_v37 = vadd.f32 %v8938_v49, %v9503_v63 }
 0x367   : > { %6574 = vst [vmem:[%s8426_s11 + $0x180] sm:$0xff] %v6450_v62   ;;  %vm4579_vm5 = vcmp.ge.f32.partialorder %v4451_v20, 0.0  ;;  %v4707_v25 = vmul.f32 0.01, %v4451_v20  ;;  %v4112_v21 = vadd.f32 %v4111_v27, %v3567_v59  ;;  %v4449_v46 = vadd.f32 %v9012_v44, %v4314_v60 }
 0x368   : > { %v4319_v7 = vmul.f32 %v9025_v29, %v4120_v33  ;;  %v9057_v41 = vpop.f32.mrf.mxu1  ;;  %v6785_v6 = vpop.f32.mrf.mxu0  ;;  %v4832_v55 = vsel %vm4576_vm6, %v4448_v56, %v4704_v26  ;;  %v3586_v17 = vadd.f32 %v8951_v32, %v9504_v24  ;;  %v3594_v23 = vadd.f32 %v8975_v42, %v9505_v8 }
 0x369   : > { %v4835_v51 = vsel %vm4579_vm5, %v4451_v20, %v4707_v25  ;;  %v4317_v15 = vmul.f32 %v9025_v29, %v4112_v21  ;;  %v4123_v34 = vadd.f32 %v6785_v6, %v3578_v61  ;;  %vm4577_vm7 = vcmp.ge.f32.partialorder %v4449_v46, 0.0  ;;  %v9506_v61 = vld [vmem:[#allocation23_spill] sm:$0xff] }
 0x36a   : > { %v6465_v13 = vpack.c.bf16 %v4835_v51, %v4834_v54  ;;  %v4705_v11 = vmul.f32 0.01, %v4449_v46  ;;  %v4454_v47 = vadd.f32 %v9012_v44, %v4319_v7  ;;  %v3619_v35 = vpop.f32.mrf.mxu1  ;;  %v4114_v0 = vpop.f32.mrf.mxu0  ;;  %v3607_v25 = vadd.f32 %v9015_v58, %v9506_v61  ;;  %v9507_v54 = vld [vmem:[#allocation21_spill] sm:$0xff] }
 0x36b   : > { %v4320_v45 = vmul.f32 %v9025_v29, %v4123_v34  ;;  %v4115_v38 = vadd.f32 %v4114_v0, %v3570_v3  ;;  %v4452_v12 = vadd.f32 %v9012_v44, %v4317_v15  ;;  %v3599_v51 = vadd.f32 %v8986_v57, %v9507_v54 }
 0x36c   : > { %6577 = vst [vmem:[%s8426_s11 + $0x198] sm:$0xff] %v6465_v13   ;;  %v4833_v53 = vsel %vm4577_vm7, %v4449_v46, %v4705_v11  ;;  %v9068_v50 = vpop.f32.mrf.mxu1  ;;  %v6788_v2 = vpop.f32.mrf.mxu0  ;;  %v4710_v22 = vmul.f32 0.01, %v4454_v47  ;;  %vm4582_vm8 = vcmp.ge.f32.partialorder %v4454_v47, 0.0  ;;  %v9508_v11 = vld [vmem:[#allocation22_spill] sm:$0xff] }
 0x36d   : > { %v6460_v39 = vpack.c.bf16 %v4833_v53, %v4832_v55  ;;  %v4455_v18 = vadd.f32 %v9012_v44, %v4320_v45  ;;  %v4318_v4 = vmul.f32 %v9025_v29, %v4115_v38  ;;  %v4136_v10 = vadd.f32 %v6788_v2, %v3591_v5  ;;  %v9509_v38 = vld [vmem:[#allocation24_spill] sm:$0xff] }
 0x36e   : > { %v3624_v36 = vpop.f32.mrf.mxu1  ;;  %v4127_v14 = vpop.f32.mrf.mxu0  ;;  %vm4580_vm10 = vcmp.ge.f32.partialorder %v4452_v12, 0.0  ;;  %v4708_v56 = vmul.f32 0.01, %v4452_v12  ;;  %v4838_v62 = vsel %vm4582_vm8, %v4454_v47, %v4710_v22  ;;  %v3602_v58 = vadd.f32 %v8999_v1, %v9508_v11 }
 0x36f   : > { %6576 = vst [vmem:[%s8426_s11 + $0x190] sm:$0xff] %v6460_v39   ;;  %vm4583_vm9 = vcmp.ge.f32.partialorder %v4455_v18, 0.0  ;;  %v4711_v48 = vmul.f32 0.01, %v4455_v18  ;;  %v4128_v49 = vadd.f32 %v4127_v14, %v3583_v37  ;;  %v4453_v28 = vadd.f32 %v9012_v44, %v4318_v4  ;;  %v9510_v14 = vld [vmem:[#allocation27_spill] sm:$0xff] }
 0x370   : > { %v4323_v40 = vmul.f32 %v9025_v29, %v4136_v10  ;;  %v9081_v32 = vpop.f32.mrf.mxu1  ;;  %v6789_v59 = vpop.f32.mrf.mxu0  ;;  %v4836_v21 = vsel %vm4580_vm10, %v4452_v12, %v4708_v56  ;;  %v3610_v9 = vadd.f32 %v9033_v30, %v9509_v38  ;;  %v3623_v8 = vadd.f32 %v9068_v50, %v9510_v14 }
 0x371   : > { %v4839_v19 = vsel %vm4583_vm9, %v4455_v18, %v4711_v48  ;;  %v4321_v20 = vmul.f32 %v9025_v29, %v4128_v49  ;;  %v4139_v42 = vadd.f32 %v6789_v59, %v3594_v23  ;;  %vm4581_vm11 = vcmp.ge.f32.partialorder %v4453_v28, 0.0 }
 0x372   : > { %v6475_v16 = vpack.c.bf16 %v4839_v19, %v4838_v62  ;;  %v4709_v3 = vmul.f32 0.01, %v4453_v28  ;;  %v4458_v60 = vadd.f32 %v9012_v44, %v4323_v40  ;;  %v3627_v33 = vpop.f32.mrf.mxu1  ;;  %v4130_v31 = vpop.f32.mrf.mxu0  ;;  %v9511_v40 = vld [vmem:[#allocation25_spill] sm:$0xff] }
 0x373   : > { %v4324_v27 = vmul.f32 %v9025_v29, %v4139_v42  ;;  %v4131_v43 = vadd.f32 %v4130_v31, %v3586_v17  ;;  %v4456_v46 = vadd.f32 %v9012_v44, %v4321_v20  ;;  %v3615_v59 = vadd.f32 %v9044_v52, %v9511_v40  ;;  %v9512_v42 = vld [vmem:[#allocation26_spill] sm:$0xff]  ;;  %v9513_v31 = vld [vmem:[#allocation28_spill] sm:$0xff] }
 0x374   : > { %6579 = vst [vmem:[%s8426_s11 + $0x1a8] sm:$0xff] %v6475_v16   ;;  %v4837_v26 = vsel %vm4581_vm11, %v4453_v28, %v4709_v3  ;;  %v9092_v7 = vpop.f32.mrf.mxu1  ;;  %v6792_v6 = vpop.f32.mrf.mxu0  ;;  %v4714_v34 = vmul.f32 0.01, %v4458_v60  ;;  %vm4586_vm12 = vcmp.ge.f32.partialorder %v4458_v60, 0.0  ;;  %v3618_v16 = vadd.f32 %v9057_v41, %v9512_v42 }
 0x375   : > { %v6470_v15 = vpack.c.bf16 %v4837_v26, %v4836_v21  ;;  %v4459_v13 = vadd.f32 %v9012_v44, %v4324_v27  ;;  %v4322_v47 = vmul.f32 %v9025_v29, %v4131_v43  ;;  %v4152_v35 = vadd.f32 %v6792_v6, %v3607_v25 }
 0x376   : > { %v3632_v0 = vpop.f32.mrf.mxu1  ;;  %v4143_v45 = vpop.f32.mrf.mxu0  ;;  %vm4584_vm14 = vcmp.ge.f32.partialorder %v4456_v46, 0.0  ;;  %v4712_v55 = vmul.f32 0.01, %v4456_v46  ;;  %v4842_v63 = vsel %vm4586_vm12, %v4458_v60, %v4714_v34  ;;  %v3626_v27 = vadd.f32 %v9081_v32, %v9513_v31 }
 0x377   : > { %6578 = vst [vmem:[%s8426_s11 + $0x1a0] sm:$0xff] %v6470_v15   ;;  %vm4587_vm13 = vcmp.ge.f32.partialorder %v4459_v13, 0.0  ;;  %v4715_v5 = vmul.f32 0.01, %v4459_v13  ;;  %v4144_v57 = vadd.f32 %v4143_v45, %v3599_v51  ;;  %v4457_v53 = vadd.f32 %v9012_v44, %v4322_v47  ;;  %v9514_v45 = vld [vmem:[#allocation34_spill] sm:$0xff] }
 0x378   : > { %v4327_v12 = vmul.f32 %v9025_v29, %v4152_v35  ;;  %v9105_v1 = vpop.f32.mrf.mxu1  ;;  %v6793_v2 = vpop.f32.mrf.mxu0  ;;  %v4840_v23 = vsel %vm4584_vm14, %v4456_v46, %v4712_v55  ;;  %v9515_v55 = vld [vmem:[#allocation30_spill] sm:$0xff] }
 0x379   : > { %v4843_v37 = vsel %vm4587_vm13, %v4459_v13, %v4715_v5  ;;  %v4325_v39 = vmul.f32 %v9025_v29, %v4144_v57  ;;  %v4155_v30 = vadd.f32 %v6793_v2, %v3610_v9  ;;  %vm4585_vm15 = vcmp.ge.f32.partialorder %v4457_v53, 0.0 }
 0x37a   : > { %v6485_v22 = vpack.c.bf16 %v4843_v37, %v4842_v63  ;;  %v4713_v18 = vmul.f32 0.01, %v4457_v53  ;;  %v4462_v24 = vadd.f32 %v9012_v44, %v4327_v12  ;;  %v3635_v17 = vpop.f32.mrf.mxu1  ;;  %v4146_v4 = vpop.f32.mrf.mxu0  ;;  %v9516_v37 = vld [vmem:[#allocation32_spill] sm:$0xff] }
 0x37b   : > { %v4328_v10 = vmul.f32 %v9025_v29, %v4155_v30  ;;  %v4147_v36 = vadd.f32 %v4146_v4, %v3602_v58  ;;  %v4460_v49 = vadd.f32 %v9012_v44, %v4325_v39  ;;  %v3634_v39 = vadd.f32 %v9105_v1, %v9516_v37  ;;  %v9517_v17 = vld [vmem:[#allocation36_spill] sm:$0xff] }
 0x37c   : > { %6581 = vst [vmem:[%s8426_s11 + $0x1b8] sm:$0xff] %v6485_v22   ;;  %v4841_v48 = vsel %vm4585_vm15, %v4457_v53, %v4713_v18  ;;  %v3638_v56 = vpop.f32.mrf.mxu1  ;;  %v6796_v28 = vpop.f32.mrf.mxu0  ;;  %v4718_v19 = vmul.f32 0.01, %v4462_v24  ;;  %vm4590_vm0 = vcmp.ge.f32.partialorder %v4462_v24, 0.0  ;;  %v3631_v53 = vadd.f32 %v9092_v7, %v9515_v55 }
 0x37d   : > { %v6480_v62 = vpack.c.bf16 %v4841_v48, %v4840_v23  ;;  %v4463_v20 = vadd.f32 %v9012_v44, %v4328_v10  ;;  %v4326_v50 = vmul.f32 %v9025_v29, %v4147_v36  ;;  %v4168_v3 = vadd.f32 %v6796_v28, %v3623_v8 }
 0x37e   : > { %v3640_v60 = vpop.f32.mrf.mxu1  ;;  %v4159_v33 = vpop.f32.mrf.mxu0  ;;  %vm4588_vm2 = vcmp.ge.f32.partialorder %v4460_v49, 0.0  ;;  %v4716_v61 = vmul.f32 0.01, %v4460_v49  ;;  %v4846_v46 = vsel %vm4590_vm0, %v4462_v24, %v4718_v19  ;;  %v3639_v38 = vadd.f32 %v3638_v56, %v9514_v45 }
 0x37f   : > { %6580 = vst [vmem:[%s8426_s11 + $0x1b0] sm:$0xff] %v6480_v62   ;;  %vm4591_vm1 = vcmp.ge.f32.partialorder %v4463_v20, 0.0  ;;  %v4719_v43 = vmul.f32 0.01, %v4463_v20  ;;  %v4160_v52 = vadd.f32 %v4159_v33, %v3615_v59  ;;  %v4461_v25 = vadd.f32 %v9012_v44, %v4326_v50 }
 0x380   : > { %v4331_v21 = vmul.f32 %v9025_v29, %v4168_v3  ;;  %v3641_v41 = vpop.f32.mrf.mxu1  ;;  %v6797_v26 = vpop.f32.mrf.mxu0  ;;  %v4844_v35 = vsel %vm4588_vm2, %v4460_v49, %v4716_v61 }
 0x381   : > { %v4847_v6 = vsel %vm4591_vm1, %v4463_v20, %v4719_v43  ;;  %v4329_v54 = vmul.f32 %v9025_v29, %v4160_v52  ;;  %v4171_v51 = vadd.f32 %v6797_v26, %v3626_v27  ;;  %vm4589_vm3 = vcmp.ge.f32.partialorder %v4461_v25, 0.0  ;;  %v9518_v43 = vld [vmem:[#allocation38_spill] sm:$0xff] }
 0x382   : > { %v6495_v32 = vpack.c.bf16 %v4847_v6, %v4846_v46  ;;  %v4717_v15 = vmul.f32 0.01, %v4461_v25  ;;  %v4466_v34 = vadd.f32 %v9012_v44, %v4331_v21  ;;  %v3643_v13 = vpop.f32.mrf.mxu1  ;;  %v4162_v11 = vpop.f32.mrf.mxu0  ;;  %v3642_v4 = vadd.f32 %v3641_v41, %v9517_v17  ;;  %v9519_v41 = vld [vmem:[#allocation42_spill] sm:$0xff] }
 0x383   : > { %v4332_v58 = vmul.f32 %v9025_v29, %v4171_v51  ;;  %v4163_v47 = vadd.f32 %v4162_v11, %v3618_v16  ;;  %v4464_v9 = vadd.f32 %v9012_v44, %v4329_v54  ;;  %v9520_v54 = vld [vmem:[#allocation40_spill] sm:$0xff] }
 0x384   : > { %6583 = vst [vmem:[%s8426_s11 + $0x1c8] sm:$0xff] %v6495_v32   ;;  %v4845_v0 = vsel %vm4589_vm3, %v4461_v25, %v4717_v15  ;;  %v3646_v5 = vpop.f32.mrf.mxu1  ;;  %v6800_v57 = vpop.f32.mrf.mxu0  ;;  %v4722_v2 = vmul.f32 0.01, %v4466_v34  ;;  %vm4594_vm4 = vcmp.ge.f32.partialorder %v4466_v34, 0.0 }
 0x385   : > { %v6490_v12 = vpack.c.bf16 %v4845_v0, %v4844_v35  ;;  %v4467_v63 = vadd.f32 %v9012_v44, %v4332_v58  ;;  %v4330_v30 = vmul.f32 %v9025_v29, %v4163_v47  ;;  %v4184_v22 = vadd.f32 %v6800_v57, %v3639_v38  ;;  %v9521_v38 = vld [vmem:[#allocation44_spill] sm:$0xff] }
 0x386   : > { %v3648_v18 = vpop.f32.mrf.mxu1  ;;  %v4175_v24 = vpop.f32.mrf.mxu0  ;;  %vm4592_vm6 = vcmp.ge.f32.partialorder %v4464_v9, 0.0  ;;  %v4720_v7 = vmul.f32 0.01, %v4464_v9  ;;  %v4850_v48 = vsel %vm4594_vm4, %v4466_v34, %v4722_v2  ;;  %v3647_v52 = vadd.f32 %v3646_v5, %v9518_v43 }
 0x387   : > { %6582 = vst [vmem:[%s8426_s11 + $0x1c0] sm:$0xff] %v6490_v12   ;;  %vm4595_vm5 = vcmp.ge.f32.partialorder %v4467_v63, 0.0  ;;  %v4723_v10 = vmul.f32 0.01, %v4467_v63  ;;  %v4176_v36 = vadd.f32 %v4175_v24, %v3631_v53  ;;  %v4465_v14 = vadd.f32 %v9012_v44, %v4330_v30 }
 0x388   : > { %v4335_v8 = vmul.f32 %v9025_v29, %v4184_v22  ;;  %v3649_v1 = vpop.f32.mrf.mxu1  ;;  %v6801_v23 = vpop.f32.mrf.mxu0  ;;  %v4848_v50 = vsel %vm4592_vm6, %v4464_v9, %v4720_v7 }
 0x389   : > { %v4851_v49 = vsel %vm4595_vm5, %v4467_v63, %v4723_v10  ;;  %v4333_v56 = vmul.f32 %v9025_v29, %v4176_v36  ;;  %v4187_v28 = vadd.f32 %v6801_v23, %v3642_v4  ;;  %vm4593_vm7 = vcmp.ge.f32.partialorder %v4465_v14, 0.0 }
 0x38a   : > { %v6505_v40 = vpack.c.bf16 %v4851_v49, %v4850_v48  ;;  %v4721_v59 = vmul.f32 0.01, %v4465_v14  ;;  %v4470_v62 = vadd.f32 %v9012_v44, %v4335_v8  ;;  %v3651_v19 = vpop.f32.mrf.mxu1  ;;  %v4178_v20 = vpop.f32.mrf.mxu0  ;;  %v3650_v51 = vadd.f32 %v3649_v1, %v9520_v54 }
 0x38b   : > { %v4336_v42 = vmul.f32 %v9025_v29, %v4187_v28  ;;  %v4179_v16 = vadd.f32 %v4178_v20, %v3634_v39  ;;  %v4468_v60 = vadd.f32 %v9012_v44, %v4333_v56 }
 0x38c   : > { %6585 = vst [vmem:[%s8426_s11 + $0x1d8] sm:$0xff] %v6505_v40   ;;  %v4849_v3 = vsel %vm4593_vm7, %v4465_v14, %v4721_v59  ;;  %v3654_v33 = vpop.f32.mrf.mxu1  ;;  %v6804_v31 = vpop.f32.mrf.mxu0  ;;  %v4726_v61 = vmul.f32 0.01, %v4470_v62  ;;  %vm4598_vm8 = vcmp.ge.f32.partialorder %v4470_v62, 0.0 }
 0x38d   : > { %v6500_v27 = vpack.c.bf16 %v4849_v3, %v4848_v50  ;;  %v4471_v25 = vadd.f32 %v9012_v44, %v4336_v42  ;;  %v4334_v21 = vmul.f32 %v9025_v29, %v4179_v16  ;;  %v3655_v26 = vadd.f32 %v3654_v33, %v9519_v41 }
 0x38e   : > { %v3656_v46 = vpop.f32.mrf.mxu1  ;;  %v4191_v6 = vpop.f32.mrf.mxu0  ;;  %vm4596_vm10 = vcmp.ge.f32.partialorder %v4468_v60, 0.0  ;;  %v4724_v34 = vmul.f32 0.01, %v4468_v60  ;;  %v4854_v35 = vsel %vm4598_vm8, %v4470_v62, %v4726_v61 }
 0x38f   : > { %6584 = vst [vmem:[%s8426_s11 + $0x1d0] sm:$0xff] %v6500_v27   ;;  %vm4599_vm9 = vcmp.ge.f32.partialorder %v4471_v25, 0.0  ;;  %v4727_v32 = vmul.f32 0.01, %v4471_v25  ;;  %v4192_v15 = vadd.f32 %v4191_v6, %v3647_v52  ;;  %v4469_v13 = vadd.f32 %v9012_v44, %v4334_v21 }
 0x390   : > { %v4200_v11 = vadd.f32 %v6804_v31, %v3655_v26  ;;  %v3657_v58 = vpop.f32.mrf.mxu1  ;;  %v6805_v47 = vpop.f32.mrf.mxu0  ;;  %v4852_v37 = vsel %vm4596_vm10, %v4468_v60, %v4724_v34 }
 0x391   : > { %v4855_v0 = vsel %vm4599_vm9, %v4471_v25, %v4727_v32  ;;  %v4337_v45 = vmul.f32 %v9025_v29, %v4192_v15  ;;  %v3658_v9 = vadd.f32 %v3657_v58, %v9521_v38  ;;  %vm4597_vm11 = vcmp.ge.f32.partialorder %v4469_v13, 0.0 }
 0x392   : > { %v6515_v5 = vpack.c.bf16 %v4855_v0, %v4854_v35  ;;  %v4725_v57 = vmul.f32 0.01, %v4469_v13  ;;  %v4339_v55 = vmul.f32 %v9025_v29, %v4200_v11  ;;  %v3659_v53 = vpop.f32.mrf.mxu1  ;;  %v4194_v12 = vpop.f32.mrf.mxu0 }
 0x393   : > { %v4203_v2 = vadd.f32 %v6805_v47, %v3658_v9  ;;  %v4195_v63 = vadd.f32 %v4194_v12, %v3650_v51  ;;  %v4472_v22 = vadd.f32 %v9012_v44, %v4337_v45 }
 0x394   : > { %6587 = vst [vmem:[%s8426_s11 + $0x1e8] sm:$0xff] %v6515_v5   ;;  %v4853_v39 = vsel %vm4597_vm11, %v4469_v13, %v4725_v57  ;;  %v4474_v30 = vadd.f32 %v9012_v44, %v4339_v55 }
 0x395   : > { %v6510_v18 = vpack.c.bf16 %v4853_v39, %v4852_v37  ;;  %v4340_v24 = vmul.f32 %v9025_v29, %v4203_v2  ;;  %v4338_v17 = vmul.f32 %v9025_v29, %v4195_v63  ;;  %v4728_v36 = vmul.f32 0.01, %v4472_v22 }
 0x396   : > { %v4730_v4 = vmul.f32 0.01, %v4474_v30  ;;  %vm4602_vm12 = vcmp.ge.f32.partialorder %v4474_v30, 0.0  ;;  %vm4600_vm13 = vcmp.ge.f32.partialorder %v4472_v22, 0.0 }
 0x397   : > { %6586 = vst [vmem:[%s8426_s11 + $0x1e0] sm:$0xff] %v6510_v18   ;;  %v4475_v10 = vadd.f32 %v9012_v44, %v4340_v24  ;;  %v4473_v7 = vadd.f32 %v9012_v44, %v4338_v17  ;;  %v4856_v23 = vsel %vm4600_vm13, %v4472_v22, %v4728_v36 }
 0x398   : > { %v4858_v29 = vsel %vm4602_vm12, %v4474_v30, %v4730_v4 }
 0x399   : > { %vm4603_vm14 = vcmp.ge.f32.partialorder %v4475_v10, 0.0  ;;  %v4731_v14 = vmul.f32 0.01, %v4475_v10  ;;  %vm4601_vm15 = vcmp.ge.f32.partialorder %v4473_v7, 0.0  ;;  %v4729_v8 = vmul.f32 0.01, %v4473_v7 }
 0x39b   : > { %v4859_v1 = vsel %vm4603_vm14, %v4475_v10, %v4731_v14  ;;  %v4857_v49 = vsel %vm4601_vm15, %v4473_v7, %v4729_v8 }
 0x39c   : > { %v6525_v48 = vpack.c.bf16 %v4859_v1, %v4858_v29  ;;  %v6520_v44 = vpack.c.bf16 %v4857_v49, %v4856_v23 }
 0x39e   : > { %6589 = vst [vmem:[%s8426_s11 + $0x1f8] sm:$0xff] %v6525_v48   ;;  %6588 = vst [vmem:[%s8426_s11 + $0x1f0] sm:$0xff] %v6520_v44  }
 0x39f   : > { %7386 = shalt.err (!%p7383_p3)
}
 0x3a0   : > { %s7387_s9 = scalar_lea.hbm %s9177_s7, 8192  ;;  %s7391_s14 = scalar_lea.hbm %s9229_s4, 32768 }
 0x3a1   : > { %p7388_p4 = scmp.ne.s32.totalorder %s9177_s7, %s7387_s9  ;;  %p7392_p9 = scmp.lt.s32.totalorder %s9177_s7, %s9229_s4 }
 0x3a2   : > { %p7393_p10 = scmp.lt.s32.totalorder %s7391_s14, %s7387_s9 }
 0x3a3   : > { %p7389_p7 = pnand %p7388_p4, %p7502_p5 }
 0x3a4   : > { %p7394_p11 = por %p7393_p10, %p7392_p9 }
 0x3a5   : > { %p7390_p8 = pneg %p7389_p7 }
 0x3a7   : > { %p7395_p12 = pnand %p7394_p11, %p7390_p8 }
 0x3a9   : > { %7398 = shalt.err (!%p7395_p12)
}
 0x3aa   : > { %s7437_s27 = smov 64   ;;  %s7438_s28 = smov 4  }
 0x3ab   : > { %6839 = dma.vmem_to_hbm [thread:$0]  (%p7502_p5), %s9179_s30, 8192, %s9177_s7, %s9185_s19, %s7437_s27, %s7437_s27, %s7438_s28  }
 0x3ac PF: > { %p6845_p13 = scmp.ge.s32.totalorder %s7433_s18, 2  ;;  %s5529_s29 = sand.u32 1, %s7421_s15  }
 0x3ad   : > { %s5530_s5 = scalar_lea.sflag [#allocation3], %s5529_s29 }
 0x3ae   : > { %p6842_p0 = pnand %p6845_p13, %p7506_p6 }
 0x3b0   : > { %p6843_p1 = pneg %p6842_p0 }
 0x3b2   : > { %7416 = dma.done.wait (%p6843_p1), %s5530_s5, 8192  }
 0x3b3   : > { %7418 = vsyncadd (%p6843_p1), %s5530_s5, 4294959104  ;;  %p14_p2 = scmp.ge.s32.totalorder %s7489_s21, 6   ;;  %s9522_s15 = smov %s7425_s16 }
 0x3b4   : > { %s9523_s16 = smov %s7429_s17  ;;  %s9524_s17 = smov %s7500_s24 }
 0x3b5   : > { %s9525_s18 = smov %s7489_s21  ;;  %16 = sbr.rel (!%p14_p2) target bundleno = 3 (0x3), region = 71 }
 0x3ba   :  { %5535 = vsyncpa [#allocation3], 1 }
 0x3bb   :  { %5537 = vsyncpa [#allocation3 + $0x1], 1 }

</bundles_post_ra>
